<compile_context>
chip_gen: v7x
topology: tpu7x:2x2x1
jax: 0.10.0
libtpu: 0.0.40
codegen_flags: <defaults>
</compile_context>

<pallas_src>
import functools
import math

import numpy as np
import jax
import jax.numpy as jnp
from jax.experimental import pallas as pl
from jax.experimental.pallas import tpu as pltpu


def _round_up(x, m):
    return ((x + m - 1) // m) * m


# ----------------------------------------------------------------------------
# Tiled GEMM kernel (convs via im2col, output projection)
# ----------------------------------------------------------------------------
def _matmul_kernel(a_ref, b_ref, bias_ref, o_ref, acc_ref, *, activation):
    @pl.when(pl.program_id(2) == 0)
    def _():
        acc_ref[...] = jnp.zeros_like(acc_ref)

    acc_ref[...] += jnp.dot(a_ref[...], b_ref[...],
                            preferred_element_type=jnp.float32)

    @pl.when(pl.program_id(2) == pl.num_programs(2) - 1)
    def _():
        out = acc_ref[...] + bias_ref[...]
        if activation == "relu":
            out = jnp.maximum(out, 0.0)
        o_ref[...] = out.astype(o_ref.dtype)


def pallas_matmul(a, b, bias=None, activation=None):
    """out = act(a @ b + bias).  a:(M,K) b:(K,N) bias:(N,).  bf16 MXU inputs,
    f32 accumulate + f32 epilogue.  No M padding / output slicing: ragged tail
    blocks are masked on store."""
    M, K = a.shape
    K2, N = b.shape
    assert K == K2
    if bias is None:
        bias = jnp.zeros((N,), jnp.float32)
    bias2d = bias.astype(jnp.float32).reshape(1, N)

    a = a.astype(jnp.bfloat16)
    b = b.astype(jnp.bfloat16)

    # K tiling with an f32 accumulator only kicks in for large K; zero-pad K so
    # the reduction never accumulates out-of-bounds garbage.
    if K > 1024:
        TK = 512
        Kp = _round_up(K, TK)
        if Kp != K:
            a = jnp.pad(a, ((0, 0), (0, Kp - K)))
            b = jnp.pad(b, ((0, Kp - K), (0, 0)))
    else:
        TK, Kp = K, K

    TM = 128 if M > 256 else M          # single full-dim block for small M
    TN = 256 if N > 512 else N
    grid = (pl.cdiv(M, TM), pl.cdiv(N, TN), Kp // TK)

    return pl.pallas_call(
        functools.partial(_matmul_kernel, activation=activation),
        grid=grid,
        in_specs=[
            pl.BlockSpec((TM, TK), lambda i, j, kk: (i, kk)),
            pl.BlockSpec((TK, TN), lambda i, j, kk: (kk, j)),
            pl.BlockSpec((1, TN), lambda i, j, kk: (0, j)),
        ],
        out_specs=pl.BlockSpec((TM, TN), lambda i, j, kk: (i, j)),
        out_shape=jax.ShapeDtypeStruct((M, N), jnp.float32),
        scratch_shapes=[pltpu.VMEM((TM, TN), jnp.float32)],
        compiler_params=pltpu.CompilerParams(
            dimension_semantics=("parallel", "parallel", "arbitrary"),
            vmem_limit_bytes=32 * 1024 * 1024),
    )(a, b, bias2d)


# ----------------------------------------------------------------------------
# Fused transformer-encoder-layer + cross-attention kernel (one launch / layer)
# ----------------------------------------------------------------------------
def _layer_kernel(text_ref, img_ref,
                  wqkv_ref, bqkv_ref, wo_ref, bo_ref,
                  ln1w_ref, ln1b_ref,
                  w1_ref, b1_ref, w2_ref, b2_ref,
                  ln2w_ref, ln2b_ref,
                  wqc_ref, bqc_ref, wkvc_ref, bkvc_ref, woc_ref, boc_ref,
                  out_ref, *, num_heads, eps):
    f32 = jnp.float32
    bf16 = jnp.bfloat16

    x = text_ref[...].astype(f32)        # (S, D)
    img = img_ref[...].astype(f32)       # (Sk, D)
    S, D = x.shape
    dh = D // num_heads
    scale = 1.0 / math.sqrt(dh)

    def mm(a, w_ref, b_ref):
        # bf16 MXU inputs, f32 accumulation, f32 bias add.
        return jnp.dot(a.astype(bf16), w_ref[...],
                       preferred_element_type=f32) + b_ref[...]

    def layer_norm(y, w_ref, b_ref):
        mean = jnp.mean(y, axis=-1, keepdims=True)
        var = jnp.mean(jnp.square(y - mean), axis=-1, keepdims=True)
        return (y - mean) * jax.lax.rsqrt(var + eps) * w_ref[...] + b_ref[...]

    def mha_heads(q, k, v):
        # q:(Sq,D) k,v:(Skv,D) f32 -> (Sq,D) context.  Heads stay inside the
        # kernel (static unrolled loop over column slices); softmax in f32,
        # normalization applied after the PV dot with an EUP reciprocal.
        ctxs = []
        for h in range(num_heads):
            sl = slice(h * dh, (h + 1) * dh)
            qh = q[:, sl].astype(bf16)
            kh = k[:, sl].astype(bf16)
            vh = v[:, sl].astype(bf16)
            s = jax.lax.dot_general(               # q @ k^T  -> (Sq, Skv)
                qh, kh, (((1,), (1,)), ((), ())),
                preferred_element_type=f32) * scale
            m = jnp.max(s, axis=-1, keepdims=True)
            p = jnp.exp(s - m)
            denom = jnp.sum(p, axis=-1, keepdims=True)
            ctx = jnp.dot(p.astype(bf16), vh, preferred_element_type=f32)
            ctxs.append(ctx * pl.reciprocal(denom, approx=True))
        return jnp.concatenate(ctxs, axis=-1)      # (Sq, D)

    # ---- self-attention (packed QKV projection: one GEMM) -------------------
    qkv = mm(x, wqkv_ref, bqkv_ref)                # (S, 3D)
    q, k, v = qkv[:, :D], qkv[:, D:2 * D], qkv[:, 2 * D:]
    attn = mm(mha_heads(q, k, v), wo_ref, bo_ref)  # (S, D)

    # ---- residual + LayerNorm1 ----------------------------------------------
    x = layer_norm(x + attn, ln1w_ref, ln1b_ref)

    # ---- FFN (ReLU) ----------------------------------------------------------
    h1 = jnp.maximum(mm(x, w1_ref, b1_ref), 0.0)   # (S, F)
    h2 = mm(h1, w2_ref, b2_ref)                    # (S, D)

    # ---- residual + LayerNorm2 ------------------------------------------------
    x = layer_norm(x + h2, ln2w_ref, ln2b_ref)

    # ---- cross-attention: Q from text, packed K/V from image features --------
    qc = mm(x, wqc_ref, bqc_ref)                   # (S, D)
    kvc = mm(img, wkvc_ref, bkvc_ref)              # (Sk, 2D)
    kc, vc = kvc[:, :D], kvc[:, D:]
    cross = mm(mha_heads(qc, kc, vc), woc_ref, boc_ref)

    out_ref[...] = (x + cross).astype(out_ref.dtype)


_LAYER_WEIGHT_NAMES = ("wqkv", "bqkv", "wo", "bo",
                       "ln1w", "ln1b",
                       "w1", "b1", "w2", "b2",
                       "ln2w", "ln2b",
                       "wq_c", "bq_c", "wkv_c", "bkv_c", "wo_c", "bo_c")


def pallas_transformer_cross_layer(text, img, lp, *, num_heads, eps=1e-5):
    """One pallas_call per layer: encoder layer + cross-attn + residual."""
    B, S, D = text.shape
    Sk = img.shape[1]
    weights = [lp[n] for n in _LAYER_WEIGHT_NAMES]
    w_specs = [pl.BlockSpec(w.shape, lambda b: (0, 0)) for w in weights]

    return pl.pallas_call(
        functools.partial(_layer_kernel, num_heads=num_heads, eps=eps),
        grid=(B,),
        in_specs=[pl.BlockSpec((None, S, D), lambda b: (b, 0, 0)),
                  pl.BlockSpec((None, Sk, D), lambda b: (b, 0, 0))] + w_specs,
        out_specs=pl.BlockSpec((None, S, D), lambda b: (b, 0, 0)),
        out_shape=jax.ShapeDtypeStruct((B, S, D), jnp.float32),
        compiler_params=pltpu.CompilerParams(
            dimension_semantics=("parallel",),        # batch axis -> v7x 2nd TC
            vmem_limit_bytes=32 * 1024 * 1024),
    )(text.astype(jnp.float32), img.astype(jnp.float32), *weights)


# ----------------------------------------------------------------------------
# Glue ops (plain JAX): im2col, pooling, embedding lookup
# ----------------------------------------------------------------------------
def im2col(x, kh, kw, stride, pad):
    """x: NHWC -> patches (B*Ho*Wo, kh*kw*C) in (kh, kw, C) ordering."""
    # TODO(synk): for production image sizes move im2col into the kernel via
    # manual strided DMA instead of kh*kw concatenated HBM slices.
    B, H, W, C = x.shape
    xp = jnp.pad(x, ((0, 0), (pad, pad), (pad, pad), (0, 0)))
    Ho = (H + 2 * pad - kh) // stride + 1
    Wo = (W + 2 * pad - kw) // stride + 1
    cols = []
    for i in range(kh):
        for j in range(kw):
            cols.append(xp[:, i:i + stride * Ho:stride, j:j + stride * Wo:stride, :])
    patches = jnp.concatenate(cols, axis=-1)          # (B, Ho, Wo, kh*kw*C)
    return patches.reshape(B * Ho * Wo, kh * kw * C), Ho, Wo


def conv_bn_relu(x, p, k, stride, pad, bn_eps=1e-5):
    """Conv2d + BatchNorm(eval: running mean=0, var=1) + ReLU as one GEMM."""
    B = x.shape[0]
    patches, Ho, Wo = im2col(x, k, k, stride, pad)
    scale = p["gamma"] * (1.0 / math.sqrt(1.0 + bn_eps))   # gamma/sqrt(var+eps)
    w_eff = p["w"] * scale[None, :]
    b_eff = p["b"] * scale + p["beta"]
    # TODO(synk): conv1/conv3 output channels (64/32) are < 128 lanes; padding
    # them would need a slice before the next im2col, so they are left as-is.
    out = pallas_matmul(patches, w_eff, b_eff, activation="relu")
    return out.reshape(B, Ho, Wo, -1)


def maxpool2d(x, k=3, stride=2, pad=1):
    # TODO(synk): max-pool window extraction kept in plain JAX glue.
    B, H, W, C = x.shape
    xp = jnp.pad(x, ((0, 0), (pad, pad), (pad, pad), (0, 0)),
                 constant_values=-jnp.inf)
    Ho = (H + 2 * pad - k) // stride + 1
    Wo = (W + 2 * pad - k) // stride + 1
    out = None
    for i in range(k):
        for j in range(k):
            s = xp[:, i:i + stride * Ho:stride, j:j + stride * Wo:stride, :]
            out = s if out is None else jnp.maximum(out, s)
    return out


def _adaptive_pool_matrix(in_size, out_size):
    P = np.zeros((out_size, in_size), np.float32)
    for i in range(out_size):
        start = (i * in_size) // out_size
        end = -(-((i + 1) * in_size) // out_size)      # ceil
        P[i, start:end] = 1.0 / (end - start)
    return jnp.asarray(P)


def adaptive_avg_pool2d(x, out_hw):
    B, H, W, C = x.shape
    if (H, W) == tuple(out_hw):        # identity for the 28x28 demo path
        return x
    Ph = _adaptive_pool_matrix(H, out_hw[0])
    Pw = _adaptive_pool_matrix(W, out_hw[1])
    return jnp.einsum("oh,bhwc,pw->bopc", Ph, x, Pw)


# ----------------------------------------------------------------------------
# Full forward pass
# ----------------------------------------------------------------------------
def forward(params, input_ids, images, *, num_heads, vocab_size):
    # ---- image encoder -------------------------------------------------------
    x = jnp.transpose(images, (0, 2, 3, 1)).astype(jnp.float32)   # NCHW -> NHWC
    x = conv_bn_relu(x, params["conv1"], k=7, stride=2, pad=3)
    x = maxpool2d(x, k=3, stride=2, pad=1)
    x = conv_bn_relu(x, params["conv2"], k=3, stride=1, pad=1)
    x = conv_bn_relu(x, params["conv3"], k=3, stride=1, pad=1)
    x = adaptive_avg_pool2d(x, (7, 7))
    B, Hh, Ww, C = x.shape
    image_features = x.reshape(B, Hh * Ww, C)                     # (B, 49, D)

    # ---- text path -----------------------------------------------------------
    seq_len = input_ids.shape[1]
    text = params["embedding"][input_ids]                         # (B, S, D)
    text = text + params["pos_enc"][:seq_len][None]

    # ---- fused transformer + cross-attention layers (1 kernel each) ----------
    for lp in params["layers"]:
        text = pallas_transformer_cross_layer(text, image_features, lp,
                                              num_heads=num_heads)

    # ---- output projection (N padded to a 128-lane multiple, sliced back) ----
    D = text.shape[-1]
    logits = pallas_matmul(text.reshape(-1, D), params["out_w"], params["out_b"])
    logits = logits[:, :vocab_size]
    return logits.reshape(B, seq_len, vocab_size)


# ----------------------------------------------------------------------------
# Deterministic parameter init (synthetic; mirrors module shapes)
# ----------------------------------------------------------------------------
def init_params(key, vocab_size, embed_dim, num_heads, num_layers):
    ffn_dim = embed_dim * 4
    D = embed_dim
    keys = iter(jax.random.split(key, 512))

    def nrm(shape, scale=0.05, dtype=jnp.float32):
        return (scale * jax.random.normal(next(keys), shape, jnp.float32)).astype(dtype)

    def conv_block(cin, cout, k):
        # weight stored as (k*k*cin, cout), i.e. torch (cout,cin,kh,kw) permuted
        return dict(w=nrm((k * k * cin, cout)), b=nrm((cout,)),
                    gamma=1.0 + nrm((cout,)), beta=nrm((cout,)))

    vocab_pad = _round_up(vocab_size, 128)
    params = dict(
        conv1=conv_block(3, 64, 7),
        conv2=conv_block(64, 128, 3),
        conv3=conv_block(128, embed_dim, 3),
        embedding=nrm((vocab_size, embed_dim), 0.1),
        pos_enc=nrm((1000, embed_dim), 0.1),
        # output projection: lane-dense N (padded with zero columns)
        out_w=jnp.pad(nrm((embed_dim, vocab_size)),
                      ((0, 0), (0, vocab_pad - vocab_size))),
        out_b=jnp.pad(nrm((vocab_size,)), (0, vocab_pad - vocab_size)),
    )

    bf16 = jnp.bfloat16
    layers = []
    for _ in range(num_layers):
        layers.append(dict(
            # self-attention, packed QKV ([q;k;v] column order = torch in_proj^T)
            wqkv=nrm((D, 3 * D), dtype=bf16), bqkv=nrm((1, 3 * D)),
            wo=nrm((D, D), dtype=bf16), bo=nrm((1, D)),
            ln1w=jnp.ones((1, D), jnp.float32), ln1b=jnp.zeros((1, D), jnp.float32),
            w1=nrm((D, ffn_dim), dtype=bf16), b1=nrm((1, ffn_dim)),
            w2=nrm((ffn_dim, D), dtype=bf16), b2=nrm((1, D)),
            ln2w=jnp.ones((1, D), jnp.float32), ln2b=jnp.zeros((1, D), jnp.float32),
            # cross-attention: Q from text, packed KV from image features
            wq_c=nrm((D, D), dtype=bf16), bq_c=nrm((1, D)),
            wkv_c=nrm((D, 2 * D), dtype=bf16), bkv_c=nrm((1, 2 * D)),
            wo_c=nrm((D, D), dtype=bf16), bo_c=nrm((1, D)),
        ))
    params["layers"] = layers
    return params


# ----------------------------------------------------------------------------
if __name__ == "__main__":
    VOCAB = 64
    EMBED = 32
    HEADS = 4
    LAYERS = 2
    BATCH = 2
    SEQ = 8
    IMG = 28      # 28x28 -> conv s2 -> 14x14 -> maxpool s2 -> 7x7 -> adaptive 7x7

    key = jax.random.PRNGKey(0)
    k_param, k_ids, k_img = jax.random.split(key, 3)

    params = init_params(k_param, VOCAB, EMBED, HEADS, LAYERS)
    input_ids = jax.random.randint(k_ids, (BATCH, SEQ), 0, VOCAB, dtype=jnp.int32)
    images = jax.random.normal(k_img, (BATCH, 3, IMG, IMG), jnp.float32)  # NCHW

    fwd = jax.jit(functools.partial(forward, num_heads=HEADS, vocab_size=VOCAB))
    logits = fwd(params, input_ids, images)
    jax.block_until_ready(logits)

    assert logits.shape == (BATCH, SEQ, VOCAB), logits.shape
    assert bool(jnp.all(jnp.isfinite(logits)))
    print("KERNEL_OK")
</pallas_src>

<mosaic_0001>
module attributes {stable_mosaic.version = 11 : i64} {
  func.func @_matmul_kernel(%arg0: i32, %arg1: i32, %arg2: i32, %arg3: memref<128x147xbf16, #tpu.memory_space<vmem>>, %arg4: memref<147x64xbf16, #tpu.memory_space<vmem>>, %arg5: memref<1x64xf32, #tpu.memory_space<vmem>>, %arg6: memref<128x64xf32, #tpu.memory_space<vmem>>, %arg7: memref<128x64xf32, #tpu.memory_space<vmem>>) attributes {dimension_semantics = [#tpu.dimension_semantics<parallel>, #tpu.dimension_semantics<parallel>, #tpu.dimension_semantics<arbitrary>], iteration_bounds = array<i64: 4, 1, 1>, scalar_prefetch = 0 : i64, scratch_operands = 1 : i64, tpu.core_type = #tpu.core_type<tc>, window_params = [{transform_indices = @transform_0, window_bounds = array<i64: 128, 147>}, {transform_indices = @transform_1, window_bounds = array<i64: 147, 64>}, {transform_indices = @transform_2, window_bounds = array<i64: 1, 64>}, {transform_indices = @transform_3, window_bounds = array<i64: 128, 64>}]} {
    %c0_i32 = arith.constant 0 : i32
    %0 = arith.cmpi eq, %arg2, %c0_i32 : i32
    %1 = arith.extui %0 : i1 to i32
    %c0_i32_0 = arith.constant 0 : i32
    %2 = arith.cmpi ne, %1, %c0_i32_0 : i32
    scf.if %2 {
      %cst_10 = arith.constant 0.000000e+00 : f32
      %12 = vector.broadcast %cst_10 : f32 to vector<128x64xf32>
      %c0_11 = arith.constant 0 : index
      %c0_12 = arith.constant 0 : index
      %13 = vector.load %arg7[%c0_11, %c0_12] : memref<128x64xf32, #tpu.memory_space<vmem>>, vector<128x64xf32>
      tpu.vector_store %arg7[%c0_11, %c0_12], %12 {strides = array<i32>} : memref<128x64xf32, #tpu.memory_space<vmem>>, vector<128x64xf32>,
    } else {
    }
    %c0 = arith.constant 0 : index
    %c0_1 = arith.constant 0 : index
    %3 = vector.load %arg7[%c0, %c0_1] : memref<128x64xf32, #tpu.memory_space<vmem>>, vector<128x64xf32>
    %c0_2 = arith.constant 0 : index
    %c0_3 = arith.constant 0 : index
    %4 = vector.load %arg3[%c0_2, %c0_3] : memref<128x147xbf16, #tpu.memory_space<vmem>>, vector<128x147xbf16>
    %c0_4 = arith.constant 0 : index
    %c0_5 = arith.constant 0 : index
    %5 = vector.load %arg4[%c0_4, %c0_5] : memref<147x64xbf16, #tpu.memory_space<vmem>>, vector<147x64xbf16>
    %cst = arith.constant dense<0.000000e+00> : vector<128x64xf32>
    %6 = tpu.matmul %4, %5, %cst {dimension_numbers = #tpu.dot_dimension_numbers<[1], [0], [0], [1], [0, 0, 1, 1], [], []>} : vector<128x147xbf16>, vector<147x64xbf16>, vector<128x64xf32> -> vector<128x64xf32>
    %7 = arith.addf %3, %6 : vector<128x64xf32>
    %c0_6 = arith.constant 0 : index
    %c0_7 = arith.constant 0 : index
    %8 = vector.load %arg7[%c0_6, %c0_7] : memref<128x64xf32, #tpu.memory_space<vmem>>, vector<128x64xf32>
    tpu.vector_store %arg7[%c0_6, %c0_7], %7 {strides = array<i32>} : memref<128x64xf32, #tpu.memory_space<vmem>>, vector<128x64xf32>,
    %c0_i32_8 = arith.constant 0 : i32
    %9 = arith.cmpi eq, %arg2, %c0_i32_8 : i32
    %10 = arith.extui %9 : i1 to i32
    %c0_i32_9 = arith.constant 0 : i32
    %11 = arith.cmpi ne, %10, %c0_i32_9 : i32
    scf.if %11 {
      %c0_10 = arith.constant 0 : index
      %c0_11 = arith.constant 0 : index
      %12 = vector.load %arg7[%c0_10, %c0_11] : memref<128x64xf32, #tpu.memory_space<vmem>>, vector<128x64xf32>
      %c0_12 = arith.constant 0 : index
      %c0_13 = arith.constant 0 : index
      %13 = vector.load %arg5[%c0_12, %c0_13] : memref<1x64xf32, #tpu.memory_space<vmem>>, vector<1x64xf32>
      %14 = vector.broadcast %13 : vector<1x64xf32> to vector<128x64xf32>
      %15 = arith.addf %12, %14 : vector<128x64xf32>
      %cst_14 = arith.constant 0.000000e+00 : f32
      %16 = vector.broadcast %cst_14 : f32 to vector<128x64xf32>
      %17 = arith.maximumf %15, %16 : vector<128x64xf32>
      %c0_15 = arith.constant 0 : index
      %c0_16 = arith.constant 0 : index
      %18 = vector.load %arg6[%c0_15, %c0_16] : memref<128x64xf32, #tpu.memory_space<vmem>>, vector<128x64xf32>
      tpu.vector_store %arg6[%c0_15, %c0_16], %17 {strides = array<i32>} : memref<128x64xf32, #tpu.memory_space<vmem>>, vector<128x64xf32>,
    } else {
    }
    return
  }
  func.func @transform_0(%arg0: i32, %arg1: i32, %arg2: i32) -> (i32, i32) {
    %c0_i32 = arith.constant 0 : i32
    return %arg0, %arg2 : i32, i32
  }
  func.func @transform_1(%arg0: i32, %arg1: i32, %arg2: i32) -> (i32, i32) {
    %c0_i32 = arith.constant 0 : i32
    return %arg2, %arg1 : i32, i32
  }
  func.func @transform_2(%arg0: i32, %arg1: i32, %arg2: i32) -> (i32, i32) {
    %c0_i32 = arith.constant 0 : i32
    %c0_i32_0 = arith.constant 0 : i32
    return %c0_i32, %arg1 : i32, i32
  }
  func.func @transform_3(%arg0: i32, %arg1: i32, %arg2: i32) -> (i32, i32) {
    %c0_i32 = arith.constant 0 : i32
    return %arg0, %arg1 : i32, i32
  }
}

module attributes {stable_mosaic.version = 11 : i64} {
  func.func @_matmul_kernel(%arg0: i32, %arg1: i32, %arg2: i32, %arg3: memref<98x576xbf16, #tpu.memory_space<vmem>>, %arg4: memref<576x128xbf16, #tpu.memory_space<vmem>>, %arg5: memref<1x128xf32, #tpu.memory_space<vmem>>, %arg6: memref<98x128xf32, #tpu.memory_space<vmem>>, %arg7: memref<98x128xf32, #tpu.memory_space<vmem>>) attributes {dimension_semantics = [#tpu.dimension_semantics<parallel>, #tpu.dimension_semantics<parallel>, #tpu.dimension_semantics<arbitrary>], iteration_bounds = array<i64: 1, 1, 1>, scalar_prefetch = 0 : i64, scratch_operands = 1 : i64, tpu.core_type = #tpu.core_type<tc>, window_params = [{transform_indices = @transform_0, window_bounds = array<i64: 98, 576>}, {transform_indices = @transform_1, window_bounds = array<i64: 576, 128>}, {transform_indices = @transform_2, window_bounds = array<i64: 1, 128>}, {transform_indices = @transform_3, window_bounds = array<i64: 98, 128>}]} {
    %c0_i32 = arith.constant 0 : i32
    %0 = arith.cmpi eq, %arg2, %c0_i32 : i32
    %1 = arith.extui %0 : i1 to i32
    %c0_i32_0 = arith.constant 0 : i32
    %2 = arith.cmpi ne, %1, %c0_i32_0 : i32
    scf.if %2 {
      %cst_10 = arith.constant 0.000000e+00 : f32
      %12 = vector.broadcast %cst_10 : f32 to vector<98x128xf32>
      %c0_11 = arith.constant 0 : index
      %c0_12 = arith.constant 0 : index
      %13 = vector.load %arg7[%c0_11, %c0_12] : memref<98x128xf32, #tpu.memory_space<vmem>>, vector<98x128xf32>
      tpu.vector_store %arg7[%c0_11, %c0_12], %12 {strides = array<i32>} : memref<98x128xf32, #tpu.memory_space<vmem>>, vector<98x128xf32>,
    } else {
    }
    %c0 = arith.constant 0 : index
    %c0_1 = arith.constant 0 : index
    %3 = vector.load %arg7[%c0, %c0_1] : memref<98x128xf32, #tpu.memory_space<vmem>>, vector<98x128xf32>
    %c0_2 = arith.constant 0 : index
    %c0_3 = arith.constant 0 : index
    %4 = vector.load %arg3[%c0_2, %c0_3] : memref<98x576xbf16, #tpu.memory_space<vmem>>, vector<98x576xbf16>
    %c0_4 = arith.constant 0 : index
    %c0_5 = arith.constant 0 : index
    %5 = vector.load %arg4[%c0_4, %c0_5] : memref<576x128xbf16, #tpu.memory_space<vmem>>, vector<576x128xbf16>
    %cst = arith.constant dense<0.000000e+00> : vector<98x128xf32>
    %6 = tpu.matmul %4, %5, %cst {dimension_numbers = #tpu.dot_dimension_numbers<[1], [0], [0], [1], [0, 0, 1, 1], [], []>} : vector<98x576xbf16>, vector<576x128xbf16>, vector<98x128xf32> -> vector<98x128xf32>
    %7 = arith.addf %3, %6 : vector<98x128xf32>
    %c0_6 = arith.constant 0 : index
    %c0_7 = arith.constant 0 : index
    %8 = vector.load %arg7[%c0_6, %c0_7] : memref<98x128xf32, #tpu.memory_space<vmem>>, vector<98x128xf32>
    tpu.vector_store %arg7[%c0_6, %c0_7], %7 {strides = array<i32>} : memref<98x128xf32, #tpu.memory_space<vmem>>, vector<98x128xf32>,
    %c0_i32_8 = arith.constant 0 : i32
    %9 = arith.cmpi eq, %arg2, %c0_i32_8 : i32
    %10 = arith.extui %9 : i1 to i32
    %c0_i32_9 = arith.constant 0 : i32
    %11 = arith.cmpi ne, %10, %c0_i32_9 : i32
    scf.if %11 {
      %c0_10 = arith.constant 0 : index
      %c0_11 = arith.constant 0 : index
      %12 = vector.load %arg7[%c0_10, %c0_11] : memref<98x128xf32, #tpu.memory_space<vmem>>, vector<98x128xf32>
      %c0_12 = arith.constant 0 : index
      %c0_13 = arith.constant 0 : index
      %13 = vector.load %arg5[%c0_12, %c0_13] : memref<1x128xf32, #tpu.memory_space<vmem>>, vector<1x128xf32>
      %14 = vector.broadcast %13 : vector<1x128xf32> to vector<98x128xf32>
      %15 = arith.addf %12, %14 : vector<98x128xf32>
      %cst_14 = arith.constant 0.000000e+00 : f32
      %16 = vector.broadcast %cst_14 : f32 to vector<98x128xf32>
      %17 = arith.maximumf %15, %16 : vector<98x128xf32>
      %c0_15 = arith.constant 0 : index
      %c0_16 = arith.constant 0 : index
      %18 = vector.load %arg6[%c0_15, %c0_16] : memref<98x128xf32, #tpu.memory_space<vmem>>, vector<98x128xf32>
      tpu.vector_store %arg6[%c0_15, %c0_16], %17 {strides = array<i32>} : memref<98x128xf32, #tpu.memory_space<vmem>>, vector<98x128xf32>,
    } else {
    }
    return
  }
  func.func @transform_0(%arg0: i32, %arg1: i32, %arg2: i32) -> (i32, i32) {
    %c0_i32 = arith.constant 0 : i32
    return %arg0, %arg2 : i32, i32
  }
  func.func @transform_1(%arg0: i32, %arg1: i32, %arg2: i32) -> (i32, i32) {
    %c0_i32 = arith.constant 0 : i32
    return %arg2, %arg1 : i32, i32
  }
  func.func @transform_2(%arg0: i32, %arg1: i32, %arg2: i32) -> (i32, i32) {
    %c0_i32 = arith.constant 0 : i32
    %c0_i32_0 = arith.constant 0 : i32
    return %c0_i32, %arg1 : i32, i32
  }
  func.func @transform_3(%arg0: i32, %arg1: i32, %arg2: i32) -> (i32, i32) {
    %c0_i32 = arith.constant 0 : i32
    return %arg0, %arg1 : i32, i32
  }
}

module attributes {stable_mosaic.version = 11 : i64} {
  func.func @_matmul_kernel(%arg0: i32, %arg1: i32, %arg2: i32, %arg3: memref<98x512xbf16, #tpu.memory_space<vmem>>, %arg4: memref<512x32xbf16, #tpu.memory_space<vmem>>, %arg5: memref<1x32xf32, #tpu.memory_space<vmem>>, %arg6: memref<98x32xf32, #tpu.memory_space<vmem>>, %arg7: memref<98x32xf32, #tpu.memory_space<vmem>>) attributes {dimension_semantics = [#tpu.dimension_semantics<parallel>, #tpu.dimension_semantics<parallel>, #tpu.dimension_semantics<arbitrary>], iteration_bounds = array<i64: 1, 1, 3>, scalar_prefetch = 0 : i64, scratch_operands = 1 : i64, tpu.core_type = #tpu.core_type<tc>, window_params = [{transform_indices = @transform_0, window_bounds = array<i64: 98, 512>}, {transform_indices = @transform_1, window_bounds = array<i64: 512, 32>}, {transform_indices = @transform_2, window_bounds = array<i64: 1, 32>}, {transform_indices = @transform_3, window_bounds = array<i64: 98, 32>}]} {
    %c0_i32 = arith.constant 0 : i32
    %0 = arith.cmpi eq, %arg2, %c0_i32 : i32
    %1 = arith.extui %0 : i1 to i32
    %c0_i32_0 = arith.constant 0 : i32
    %2 = arith.cmpi ne, %1, %c0_i32_0 : i32
    scf.if %2 {
      %cst_9 = arith.constant 0.000000e+00 : f32
      %12 = vector.broadcast %cst_9 : f32 to vector<98x32xf32>
      %c0_10 = arith.constant 0 : index
      %c0_11 = arith.constant 0 : index
      %13 = vector.load %arg7[%c0_10, %c0_11] : memref<98x32xf32, #tpu.memory_space<vmem>>, vector<98x32xf32>
      tpu.vector_store %arg7[%c0_10, %c0_11], %12 {strides = array<i32>} : memref<98x32xf32, #tpu.memory_space<vmem>>, vector<98x32xf32>,
    } else {
    }
    %c0 = arith.constant 0 : index
    %c0_1 = arith.constant 0 : index
    %3 = vector.load %arg7[%c0, %c0_1] : memref<98x32xf32, #tpu.memory_space<vmem>>, vector<98x32xf32>
    %c0_2 = arith.constant 0 : index
    %c0_3 = arith.constant 0 : index
    %4 = vector.load %arg3[%c0_2, %c0_3] : memref<98x512xbf16, #tpu.memory_space<vmem>>, vector<98x512xbf16>
    %c0_4 = arith.constant 0 : index
    %c0_5 = arith.constant 0 : index
    %5 = vector.load %arg4[%c0_4, %c0_5] : memref<512x32xbf16, #tpu.memory_space<vmem>>, vector<512x32xbf16>
    %cst = arith.constant dense<0.000000e+00> : vector<98x32xf32>
    %6 = tpu.matmul %4, %5, %cst {dimension_numbers = #tpu.dot_dimension_numbers<[1], [0], [0], [1], [0, 0, 1, 1], [], []>} : vector<98x512xbf16>, vector<512x32xbf16>, vector<98x32xf32> -> vector<98x32xf32>
    %7 = arith.addf %3, %6 : vector<98x32xf32>
    %c0_6 = arith.constant 0 : index
    %c0_7 = arith.constant 0 : index
    %8 = vector.load %arg7[%c0_6, %c0_7] : memref<98x32xf32, #tpu.memory_space<vmem>>, vector<98x32xf32>
    tpu.vector_store %arg7[%c0_6, %c0_7], %7 {strides = array<i32>} : memref<98x32xf32, #tpu.memory_space<vmem>>, vector<98x32xf32>,
    %c2_i32 = arith.constant 2 : i32
    %9 = arith.cmpi eq, %arg2, %c2_i32 : i32
    %10 = arith.extui %9 : i1 to i32
    %c0_i32_8 = arith.constant 0 : i32
    %11 = arith.cmpi ne, %10, %c0_i32_8 : i32
    scf.if %11 {
      %c0_9 = arith.constant 0 : index
      %c0_10 = arith.constant 0 : index
      %12 = vector.load %arg7[%c0_9, %c0_10] : memref<98x32xf32, #tpu.memory_space<vmem>>, vector<98x32xf32>
      %c0_11 = arith.constant 0 : index
      %c0_12 = arith.constant 0 : index
      %13 = vector.load %arg5[%c0_11, %c0_12] : memref<1x32xf32, #tpu.memory_space<vmem>>, vector<1x32xf32>
      %14 = vector.broadcast %13 : vector<1x32xf32> to vector<98x32xf32>
      %15 = arith.addf %12, %14 : vector<98x32xf32>
      %cst_13 = arith.constant 0.000000e+00 : f32
      %16 = vector.broadcast %cst_13 : f32 to vector<98x32xf32>
      %17 = arith.maximumf %15, %16 : vector<98x32xf32>
      %c0_14 = arith.constant 0 : index
      %c0_15 = arith.constant 0 : index
      %18 = vector.load %arg6[%c0_14, %c0_15] : memref<98x32xf32, #tpu.memory_space<vmem>>, vector<98x32xf32>
      tpu.vector_store %arg6[%c0_14, %c0_15], %17 {strides = array<i32>} : memref<98x32xf32, #tpu.memory_space<vmem>>, vector<98x32xf32>,
    } else {
    }
    return
  }
  func.func @transform_0(%arg0: i32, %arg1: i32, %arg2: i32) -> (i32, i32) {
    %c0_i32 = arith.constant 0 : i32
    return %arg0, %arg2 : i32, i32
  }
  func.func @transform_1(%arg0: i32, %arg1: i32, %arg2: i32) -> (i32, i32) {
    %c0_i32 = arith.constant 0 : i32
    return %arg2, %arg1 : i32, i32
  }
  func.func @transform_2(%arg0: i32, %arg1: i32, %arg2: i32) -> (i32, i32) {
    %c0_i32 = arith.constant 0 : i32
    %c0_i32_0 = arith.constant 0 : i32
    return %c0_i32, %arg1 : i32, i32
  }
  func.func @transform_3(%arg0: i32, %arg1: i32, %arg2: i32) -> (i32, i32) {
    %c0_i32 = arith.constant 0 : i32
    return %arg0, %arg1 : i32, i32
  }
}

module attributes {stable_mosaic.version = 11 : i64} {
  func.func @_layer_kernel(%arg0: i32, %arg1: memref<1x8x32xf32, #tpu.memory_space<vmem>>, %arg2: memref<1x49x32xf32, #tpu.memory_space<vmem>>, %arg3: memref<32x96xbf16, #tpu.memory_space<vmem>>, %arg4: memref<1x96xf32, #tpu.memory_space<vmem>>, %arg5: memref<32x32xbf16, #tpu.memory_space<vmem>>, %arg6: memref<1x32xf32, #tpu.memory_space<vmem>>, %arg7: memref<1x32xf32, #tpu.memory_space<vmem>>, %arg8: memref<1x32xf32, #tpu.memory_space<vmem>>, %arg9: memref<32x128xbf16, #tpu.memory_space<vmem>>, %arg10: memref<1x128xf32, #tpu.memory_space<vmem>>, %arg11: memref<128x32xbf16, #tpu.memory_space<vmem>>, %arg12: memref<1x32xf32, #tpu.memory_space<vmem>>, %arg13: memref<1x32xf32, #tpu.memory_space<vmem>>, %arg14: memref<1x32xf32, #tpu.memory_space<vmem>>, %arg15: memref<32x32xbf16, #tpu.memory_space<vmem>>, %arg16: memref<1x32xf32, #tpu.memory_space<vmem>>, %arg17: memref<32x64xbf16, #tpu.memory_space<vmem>>, %arg18: memref<1x64xf32, #tpu.memory_space<vmem>>, %arg19: memref<32x32xbf16, #tpu.memory_space<vmem>>, %arg20: memref<1x32xf32, #tpu.memory_space<vmem>>, %arg21: memref<1x8x32xf32, #tpu.memory_space<vmem>>) attributes {dimension_semantics = [#tpu.dimension_semantics<parallel>], iteration_bounds = array<i64: 2>, scalar_prefetch = 0 : i64, scratch_operands = 0 : i64, tpu.core_type = #tpu.core_type<tc>, window_params = [{transform_indices = @transform_0, window_bounds = array<i64: 1, 8, 32>}, {transform_indices = @transform_1, window_bounds = array<i64: 1, 49, 32>}, {pipeline_mode = #tpu.pipeline_mode<synchronous>, transform_indices = @transform_2, window_bounds = array<i64: 32, 96>}, {pipeline_mode = #tpu.pipeline_mode<synchronous>, transform_indices = @transform_3, window_bounds = array<i64: 1, 96>}, {pipeline_mode = #tpu.pipeline_mode<synchronous>, transform_indices = @transform_4, window_bounds = array<i64: 32, 32>}, {pipeline_mode = #tpu.pipeline_mode<synchronous>, transform_indices = @transform_5, window_bounds = array<i64: 1, 32>}, {pipeline_mode = #tpu.pipeline_mode<synchronous>, transform_indices = @transform_6, window_bounds = array<i64: 1, 32>}, {pipeline_mode = #tpu.pipeline_mode<synchronous>, transform_indices = @transform_7, window_bounds = array<i64: 1, 32>}, {pipeline_mode = #tpu.pipeline_mode<synchronous>, transform_indices = @transform_8, window_bounds = array<i64: 32, 128>}, {pipeline_mode = #tpu.pipeline_mode<synchronous>, transform_indices = @transform_9, window_bounds = array<i64: 1, 128>}, {pipeline_mode = #tpu.pipeline_mode<synchronous>, transform_indices = @transform_10, window_bounds = array<i64: 128, 32>}, {pipeline_mode = #tpu.pipeline_mode<synchronous>, transform_indices = @transform_11, window_bounds = array<i64: 1, 32>}, {pipeline_mode = #tpu.pipeline_mode<synchronous>, transform_indices = @transform_12, window_bounds = array<i64: 1, 32>}, {pipeline_mode = #tpu.pipeline_mode<synchronous>, transform_indices = @transform_13, window_bounds = array<i64: 1, 32>}, {pipeline_mode = #tpu.pipeline_mode<synchronous>, transform_indices = @transform_14, window_bounds = array<i64: 32, 32>}, {pipeline_mode = #tpu.pipeline_mode<synchronous>, transform_indices = @transform_15, window_bounds = array<i64: 1, 32>}, {pipeline_mode = #tpu.pipeline_mode<synchronous>, transform_indices = @transform_16, window_bounds = array<i64: 32, 64>}, {pipeline_mode = #tpu.pipeline_mode<synchronous>, transform_indices = @transform_17, window_bounds = array<i64: 1, 64>}, {pipeline_mode = #tpu.pipeline_mode<synchronous>, transform_indices = @transform_18, window_bounds = array<i64: 32, 32>}, {pipeline_mode = #tpu.pipeline_mode<synchronous>, transform_indices = @transform_19, window_bounds = array<i64: 1, 32>}, {transform_indices = @transform_20, window_bounds = array<i64: 1, 8, 32>}]} {
    %c0 = arith.constant 0 : index
    %c0_0 = arith.constant 0 : index
    %c0_1 = arith.constant 0 : index
    %0 = vector.load %arg1[%c0, %c0_0, %c0_1] : memref<1x8x32xf32, #tpu.memory_space<vmem>>, vector<1x8x32xf32>
    %1 = vector.shape_cast %0 : vector<1x8x32xf32> to vector<8x32xf32>
    %c0_2 = arith.constant 0 : index
    %c0_3 = arith.constant 0 : index
    %c0_4 = arith.constant 0 : index
    %2 = vector.load %arg2[%c0_2, %c0_3, %c0_4] : memref<1x49x32xf32, #tpu.memory_space<vmem>>, vector<1x49x32xf32>
    %3 = vector.shape_cast %2 : vector<1x49x32xf32> to vector<49x32xf32>
    %4 = arith.truncf %1 : vector<8x32xf32> to vector<8x32xbf16>
    %c0_5 = arith.constant 0 : index
    %c0_6 = arith.constant 0 : index
    %5 = vector.load %arg3[%c0_5, %c0_6] : memref<32x96xbf16, #tpu.memory_space<vmem>>, vector<32x96xbf16>
    %cst = arith.constant dense<0.000000e+00> : vector<8x96xf32>
    %6 = tpu.matmul %4, %5, %cst {dimension_numbers = #tpu.dot_dimension_numbers<[1], [0], [0], [1], [0, 0, 1, 1], [], []>} : vector<8x32xbf16>, vector<32x96xbf16>, vector<8x96xf32> -> vector<8x96xf32>
    %c0_7 = arith.constant 0 : index
    %c0_8 = arith.constant 0 : index
    %7 = vector.load %arg4[%c0_7, %c0_8] : memref<1x96xf32, #tpu.memory_space<vmem>>, vector<1x96xf32>
    %8 = vector.broadcast %7 : vector<1x96xf32> to vector<8x96xf32>
    %9 = arith.addf %6, %8 : vector<8x96xf32>
    %10 = vector.extract_strided_slice %9 {offsets = [0, 0], sizes = [8, 32], strides = [1, 1]} : vector<8x96xf32> to vector<8x32xf32>
    %11 = vector.extract_strided_slice %9 {offsets = [0, 32], sizes = [8, 32], strides = [1, 1]} : vector<8x96xf32> to vector<8x32xf32>
    %12 = vector.extract_strided_slice %9 {offsets = [0, 64], sizes = [8, 32], strides = [1, 1]} : vector<8x96xf32> to vector<8x32xf32>
    %13 = vector.extract_strided_slice %10 {offsets = [0, 0], sizes = [8, 8], strides = [1, 1]} : vector<8x32xf32> to vector<8x8xf32>
    %14 = arith.truncf %13 : vector<8x8xf32> to vector<8x8xbf16>
    %15 = vector.extract_strided_slice %11 {offsets = [0, 0], sizes = [8, 8], strides = [1, 1]} : vector<8x32xf32> to vector<8x8xf32>
    %16 = arith.truncf %15 : vector<8x8xf32> to vector<8x8xbf16>
    %17 = vector.extract_strided_slice %12 {offsets = [0, 0], sizes = [8, 8], strides = [1, 1]} : vector<8x32xf32> to vector<8x8xf32>
    %18 = arith.truncf %17 : vector<8x8xf32> to vector<8x8xbf16>
    %cst_9 = arith.constant dense<0.000000e+00> : vector<8x8xf32>
    %19 = tpu.matmul %14, %16, %cst_9 {dimension_numbers = #tpu.dot_dimension_numbers<[1], [1], [0], [0], [0, 0, 1, 0], [], []>} : vector<8x8xbf16>, vector<8x8xbf16>, vector<8x8xf32> -> vector<8x8xf32>
    %cst_10 = arith.constant 0.353553385 : f32
    %20 = vector.broadcast %cst_10 : f32 to vector<8x8xf32>
    %21 = arith.mulf %19, %20 : vector<8x8xf32>
    %cst_11 = arith.constant dense<0xFF800000> : vector<8xf32>
    %22 = vector.multi_reduction <maximumf>, %21, %cst_11 [1] : vector<8x8xf32> to vector<8xf32>
    %23 = vector.shape_cast %22 : vector<8xf32> to vector<8x1xf32>
    %24 = vector.broadcast %23 : vector<8x1xf32> to vector<8x8xf32>
    %25 = arith.subf %21, %24 : vector<8x8xf32>
    %26 = math.exp %25 : vector<8x8xf32>
    %cst_12 = arith.constant dense<0.000000e+00> : vector<8xf32>
    %27 = vector.multi_reduction <add>, %26, %cst_12 [1] : vector<8x8xf32> to vector<8xf32>
    %28 = vector.shape_cast %27 : vector<8xf32> to vector<8x1xf32>
    %29 = arith.truncf %26 : vector<8x8xf32> to vector<8x8xbf16>
    %cst_13 = arith.constant dense<0.000000e+00> : vector<8x8xf32>
    %30 = tpu.matmul %29, %18, %cst_13 {dimension_numbers = #tpu.dot_dimension_numbers<[1], [0], [0], [1], [0, 0, 1, 1], [], []>} : vector<8x8xbf16>, vector<8x8xbf16>, vector<8x8xf32> -> vector<8x8xf32>
    %31 = tpu.reciprocal %28 {approx = true} : vector<8x1xf32> -> vector<8x1xf32>
    %32 = vector.broadcast %31 : vector<8x1xf32> to vector<8x8xf32>
    %33 = arith.mulf %30, %32 : vector<8x8xf32>
    %34 = vector.extract_strided_slice %10 {offsets = [0, 8], sizes = [8, 8], strides = [1, 1]} : vector<8x32xf32> to vector<8x8xf32>
    %35 = arith.truncf %34 : vector<8x8xf32> to vector<8x8xbf16>
    %36 = vector.extract_strided_slice %11 {offsets = [0, 8], sizes = [8, 8], strides = [1, 1]} : vector<8x32xf32> to vector<8x8xf32>
    %37 = arith.truncf %36 : vector<8x8xf32> to vector<8x8xbf16>
    %38 = vector.extract_strided_slice %12 {offsets = [0, 8], sizes = [8, 8], strides = [1, 1]} : vector<8x32xf32> to vector<8x8xf32>
    %39 = arith.truncf %38 : vector<8x8xf32> to vector<8x8xbf16>
    %cst_14 = arith.constant dense<0.000000e+00> : vector<8x8xf32>
    %40 = tpu.matmul %35, %37, %cst_14 {dimension_numbers = #tpu.dot_dimension_numbers<[1], [1], [0], [0], [0, 0, 1, 0], [], []>} : vector<8x8xbf16>, vector<8x8xbf16>, vector<8x8xf32> -> vector<8x8xf32>
    %cst_15 = arith.constant 0.353553385 : f32
    %41 = vector.broadcast %cst_15 : f32 to vector<8x8xf32>
    %42 = arith.mulf %40, %41 : vector<8x8xf32>
    %cst_16 = arith.constant dense<0xFF800000> : vector<8xf32>
    %43 = vector.multi_reduction <maximumf>, %42, %cst_16 [1] : vector<8x8xf32> to vector<8xf32>
    %44 = vector.shape_cast %43 : vector<8xf32> to vector<8x1xf32>
    %45 = vector.broadcast %44 : vector<8x1xf32> to vector<8x8xf32>
    %46 = arith.subf %42, %45 : vector<8x8xf32>
    %47 = math.exp %46 : vector<8x8xf32>
    %cst_17 = arith.constant dense<0.000000e+00> : vector<8xf32>
    %48 = vector.multi_reduction <add>, %47, %cst_17 [1] : vector<8x8xf32> to vector<8xf32>
    %49 = vector.shape_cast %48 : vector<8xf32> to vector<8x1xf32>
    %50 = arith.truncf %47 : vector<8x8xf32> to vector<8x8xbf16>
    %cst_18 = arith.constant dense<0.000000e+00> : vector<8x8xf32>
    %51 = tpu.matmul %50, %39, %cst_18 {dimension_numbers = #tpu.dot_dimension_numbers<[1], [0], [0], [1], [0, 0, 1, 1], [], []>} : vector<8x8xbf16>, vector<8x8xbf16>, vector<8x8xf32> -> vector<8x8xf32>
    %52 = tpu.reciprocal %49 {approx = true} : vector<8x1xf32> -> vector<8x1xf32>
    %53 = vector.broadcast %52 : vector<8x1xf32> to vector<8x8xf32>
    %54 = arith.mulf %51, %53 : vector<8x8xf32>
    %55 = vector.extract_strided_slice %10 {offsets = [0, 16], sizes = [8, 8], strides = [1, 1]} : vector<8x32xf32> to vector<8x8xf32>
    %56 = arith.truncf %55 : vector<8x8xf32> to vector<8x8xbf16>
    %57 = vector.extract_strided_slice %11 {offsets = [0, 16], sizes = [8, 8], strides = [1, 1]} : vector<8x32xf32> to vector<8x8xf32>
    %58 = arith.truncf %57 : vector<8x8xf32> to vector<8x8xbf16>
    %59 = vector.extract_strided_slice %12 {offsets = [0, 16], sizes = [8, 8], strides = [1, 1]} : vector<8x32xf32> to vector<8x8xf32>
    %60 = arith.truncf %59 : vector<8x8xf32> to vector<8x8xbf16>
    %cst_19 = arith.constant dense<0.000000e+00> : vector<8x8xf32>
    %61 = tpu.matmul %56, %58, %cst_19 {dimension_numbers = #tpu.dot_dimension_numbers<[1], [1], [0], [0], [0, 0, 1, 0], [], []>} : vector<8x8xbf16>, vector<8x8xbf16>, vector<8x8xf32> -> vector<8x8xf32>
    %cst_20 = arith.constant 0.353553385 : f32
    %62 = vector.broadcast %cst_20 : f32 to vector<8x8xf32>
    %63 = arith.mulf %61, %62 : vector<8x8xf32>
    %cst_21 = arith.constant dense<0xFF800000> : vector<8xf32>
    %64 = vector.multi_reduction <maximumf>, %63, %cst_21 [1] : vector<8x8xf32> to vector<8xf32>
    %65 = vector.shape_cast %64 : vector<8xf32> to vector<8x1xf32>
    %66 = vector.broadcast %65 : vector<8x1xf32> to vector<8x8xf32>
    %67 = arith.subf %63, %66 : vector<8x8xf32>
    %68 = math.exp %67 : vector<8x8xf32>
    %cst_22 = arith.constant dense<0.000000e+00> : vector<8xf32>
    %69 = vector.multi_reduction <add>, %68, %cst_22 [1] : vector<8x8xf32> to vector<8xf32>
    %70 = vector.shape_cast %69 : vector<8xf32> to vector<8x1xf32>
    %71 = arith.truncf %68 : vector<8x8xf32> to vector<8x8xbf16>
    %cst_23 = arith.constant dense<0.000000e+00> : vector<8x8xf32>
    %72 = tpu.matmul %71, %60, %cst_23 {dimension_numbers = #tpu.dot_dimension_numbers<[1], [0], [0], [1], [0, 0, 1, 1], [], []>} : vector<8x8xbf16>, vector<8x8xbf16>, vector<8x8xf32> -> vector<8x8xf32>
    %73 = tpu.reciprocal %70 {approx = true} : vector<8x1xf32> -> vector<8x1xf32>
    %74 = vector.broadcast %73 : vector<8x1xf32> to vector<8x8xf32>
    %75 = arith.mulf %72, %74 : vector<8x8xf32>
    %76 = vector.extract_strided_slice %10 {offsets = [0, 24], sizes = [8, 8], strides = [1, 1]} : vector<8x32xf32> to vector<8x8xf32>
    %77 = arith.truncf %76 : vector<8x8xf32> to vector<8x8xbf16>
    %78 = vector.extract_strided_slice %11 {offsets = [0, 24], sizes = [8, 8], strides = [1, 1]} : vector<8x32xf32> to vector<8x8xf32>
    %79 = arith.truncf %78 : vector<8x8xf32> to vector<8x8xbf16>
    %80 = vector.extract_strided_slice %12 {offsets = [0, 24], sizes = [8, 8], strides = [1, 1]} : vector<8x32xf32> to vector<8x8xf32>
    %81 = arith.truncf %80 : vector<8x8xf32> to vector<8x8xbf16>
    %cst_24 = arith.constant dense<0.000000e+00> : vector<8x8xf32>
    %82 = tpu.matmul %77, %79, %cst_24 {dimension_numbers = #tpu.dot_dimension_numbers<[1], [1], [0], [0], [0, 0, 1, 0], [], []>} : vector<8x8xbf16>, vector<8x8xbf16>, vector<8x8xf32> -> vector<8x8xf32>
    %cst_25 = arith.constant 0.353553385 : f32
    %83 = vector.broadcast %cst_25 : f32 to vector<8x8xf32>
    %84 = arith.mulf %82, %83 : vector<8x8xf32>
    %cst_26 = arith.constant dense<0xFF800000> : vector<8xf32>
    %85 = vector.multi_reduction <maximumf>, %84, %cst_26 [1] : vector<8x8xf32> to vector<8xf32>
    %86 = vector.shape_cast %85 : vector<8xf32> to vector<8x1xf32>
    %87 = vector.broadcast %86 : vector<8x1xf32> to vector<8x8xf32>
    %88 = arith.subf %84, %87 : vector<8x8xf32>
    %89 = math.exp %88 : vector<8x8xf32>
    %cst_27 = arith.constant dense<0.000000e+00> : vector<8xf32>
    %90 = vector.multi_reduction <add>, %89, %cst_27 [1] : vector<8x8xf32> to vector<8xf32>
    %91 = vector.shape_cast %90 : vector<8xf32> to vector<8x1xf32>
    %92 = arith.truncf %89 : vector<8x8xf32> to vector<8x8xbf16>
    %cst_28 = arith.constant dense<0.000000e+00> : vector<8x8xf32>
    %93 = tpu.matmul %92, %81, %cst_28 {dimension_numbers = #tpu.dot_dimension_numbers<[1], [0], [0], [1], [0, 0, 1, 1], [], []>} : vector<8x8xbf16>, vector<8x8xbf16>, vector<8x8xf32> -> vector<8x8xf32>
    %94 = tpu.reciprocal %91 {approx = true} : vector<8x1xf32> -> vector<8x1xf32>
    %95 = vector.broadcast %94 : vector<8x1xf32> to vector<8x8xf32>
    %96 = arith.mulf %93, %95 : vector<8x8xf32>
    %97 = tpu.concatenate %33, %54, %75, %96 in 1 : vector<8x8xf32>, vector<8x8xf32>, vector<8x8xf32>, vector<8x8xf32> -> vector<8x32xf32>
    %98 = arith.truncf %97 : vector<8x32xf32> to vector<8x32xbf16>
    %c0_29 = arith.constant 0 : index
    %c0_30 = arith.constant 0 : index
    %99 = vector.load %arg5[%c0_29, %c0_30] : memref<32x32xbf16, #tpu.memory_space<vmem>>, vector<32x32xbf16>
    %cst_31 = arith.constant dense<0.000000e+00> : vector<8x32xf32>
    %100 = tpu.matmul %98, %99, %cst_31 {dimension_numbers = #tpu.dot_dimension_numbers<[1], [0], [0], [1], [0, 0, 1, 1], [], []>} : vector<8x32xbf16>, vector<32x32xbf16>, vector<8x32xf32> -> vector<8x32xf32>
    %c0_32 = arith.constant 0 : index
    %c0_33 = arith.constant 0 : index
    %101 = vector.load %arg6[%c0_32, %c0_33] : memref<1x32xf32, #tpu.memory_space<vmem>>, vector<1x32xf32>
    %102 = vector.broadcast %101 : vector<1x32xf32> to vector<8x32xf32>
    %103 = arith.addf %100, %102 : vector<8x32xf32>
    %104 = arith.addf %1, %103 : vector<8x32xf32>
    %cst_34 = arith.constant dense<0.000000e+00> : vector<8xf32>
    %105 = vector.multi_reduction <add>, %104, %cst_34 [1] : vector<8x32xf32> to vector<8xf32>
    %106 = vector.shape_cast %105 : vector<8xf32> to vector<8x1xf32>
    %cst_35 = arith.constant 3.200000e+01 : f32
    %107 = vector.broadcast %cst_35 : f32 to vector<8x1xf32>
    %108 = arith.divf %106, %107 : vector<8x1xf32>
    %109 = vector.broadcast %108 : vector<8x1xf32> to vector<8x32xf32>
    %110 = arith.subf %104, %109 : vector<8x32xf32>
    %111 = arith.mulf %110, %110 : vector<8x32xf32>
    %cst_36 = arith.constant dense<0.000000e+00> : vector<8xf32>
    %112 = vector.multi_reduction <add>, %111, %cst_36 [1] : vector<8x32xf32> to vector<8xf32>
    %113 = vector.shape_cast %112 : vector<8xf32> to vector<8x1xf32>
    %cst_37 = arith.constant 3.200000e+01 : f32
    %114 = vector.broadcast %cst_37 : f32 to vector<8x1xf32>
    %115 = arith.divf %113, %114 : vector<8x1xf32>
    %116 = vector.broadcast %108 : vector<8x1xf32> to vector<8x32xf32>
    %117 = arith.subf %104, %116 : vector<8x32xf32>
    %cst_38 = arith.constant 9.99999974E-6 : f32
    %118 = vector.broadcast %cst_38 : f32 to vector<8x1xf32>
    %119 = arith.addf %115, %118 : vector<8x1xf32>
    %120 = math.rsqrt %119 : vector<8x1xf32>
    %121 = vector.broadcast %120 : vector<8x1xf32> to vector<8x32xf32>
    %122 = arith.mulf %117, %121 : vector<8x32xf32>
    %c0_39 = arith.constant 0 : index
    %c0_40 = arith.constant 0 : index
    %123 = vector.load %arg7[%c0_39, %c0_40] : memref<1x32xf32, #tpu.memory_space<vmem>>, vector<1x32xf32>
    %124 = vector.broadcast %123 : vector<1x32xf32> to vector<8x32xf32>
    %125 = arith.mulf %122, %124 : vector<8x32xf32>
    %c0_41 = arith.constant 0 : index
    %c0_42 = arith.constant 0 : index
    %126 = vector.load %arg8[%c0_41, %c0_42] : memref<1x32xf32, #tpu.memory_space<vmem>>, vector<1x32xf32>
    %127 = vector.broadcast %126 : vector<1x32xf32> to vector<8x32xf32>
    %128 = arith.addf %125, %127 : vector<8x32xf32>
    %129 = arith.truncf %128 : vector<8x32xf32> to vector<8x32xbf16>
    %c0_43 = arith.constant 0 : index
    %c0_44 = arith.constant 0 : index
    %130 = vector.load %arg9[%c0_43, %c0_44] : memref<32x128xbf16, #tpu.memory_space<vmem>>, vector<32x128xbf16>
    %cst_45 = arith.constant dense<0.000000e+00> : vector<8x128xf32>
    %131 = tpu.matmul %129, %130, %cst_45 {dimension_numbers = #tpu.dot_dimension_numbers<[1], [0], [0], [1], [0, 0, 1, 1], [], []>} : vector<8x32xbf16>, vector<32x128xbf16>, vector<8x128xf32> -> vector<8x128xf32>
    %c0_46 = arith.constant 0 : index
    %c0_47 = arith.constant 0 : index
    %132 = vector.load %arg10[%c0_46, %c0_47] : memref<1x128xf32, #tpu.memory_space<vmem>>, vector<1x128xf32>
    %133 = vector.broadcast %132 : vector<1x128xf32> to vector<8x128xf32>
    %134 = arith.addf %131, %133 : vector<8x128xf32>
    %cst_48 = arith.constant 0.000000e+00 : f32
    %135 = vector.broadcast %cst_48 : f32 to vector<8x128xf32>
    %136 = arith.maximumf %134, %135 : vector<8x128xf32>
    %137 = arith.truncf %136 : vector<8x128xf32> to vector<8x128xbf16>
    %c0_49 = arith.constant 0 : index
    %c0_50 = arith.constant 0 : index
    %138 = vector.load %arg11[%c0_49, %c0_50] : memref<128x32xbf16, #tpu.memory_space<vmem>>, vector<128x32xbf16>
    %cst_51 = arith.constant dense<0.000000e+00> : vector<8x32xf32>
    %139 = tpu.matmul %137, %138, %cst_51 {dimension_numbers = #tpu.dot_dimension_numbers<[1], [0], [0], [1], [0, 0, 1, 1], [], []>} : vector<8x128xbf16>, vector<128x32xbf16>, vector<8x32xf32> -> vector<8x32xf32>
    %c0_52 = arith.constant 0 : index
    %c0_53 = arith.constant 0 : index
    %140 = vector.load %arg12[%c0_52, %c0_53] : memref<1x32xf32, #tpu.memory_space<vmem>>, vector<1x32xf32>
    %141 = vector.broadcast %140 : vector<1x32xf32> to vector<8x32xf32>
    %142 = arith.addf %139, %141 : vector<8x32xf32>
    %143 = arith.addf %128, %142 : vector<8x32xf32>
    %cst_54 = arith.constant dense<0.000000e+00> : vector<8xf32>
    %144 = vector.multi_reduction <add>, %143, %cst_54 [1] : vector<8x32xf32> to vector<8xf32>
    %145 = vector.shape_cast %144 : vector<8xf32> to vector<8x1xf32>
    %cst_55 = arith.constant 3.200000e+01 : f32
    %146 = vector.broadcast %cst_55 : f32 to vector<8x1xf32>
    %147 = arith.divf %145, %146 : vector<8x1xf32>
    %148 = vector.broadcast %147 : vector<8x1xf32> to vector<8x32xf32>
    %149 = arith.subf %143, %148 : vector<8x32xf32>
    %150 = arith.mulf %149, %149 : vector<8x32xf32>
    %cst_56 = arith.constant dense<0.000000e+00> : vector<8xf32>
    %151 = vector.multi_reduction <add>, %150, %cst_56 [1] : vector<8x32xf32> to vector<8xf32>
    %152 = vector.shape_cast %151 : vector<8xf32> to vector<8x1xf32>
    %cst_57 = arith.constant 3.200000e+01 : f32
    %153 = vector.broadcast %cst_57 : f32 to vector<8x1xf32>
    %154 = arith.divf %152, %153 : vector<8x1xf32>
    %155 = vector.broadcast %147 : vector<8x1xf32> to vector<8x32xf32>
    %156 = arith.subf %143, %155 : vector<8x32xf32>
    %cst_58 = arith.constant 9.99999974E-6 : f32
    %157 = vector.broadcast %cst_58 : f32 to vector<8x1xf32>
    %158 = arith.addf %154, %157 : vector<8x1xf32>
    %159 = math.rsqrt %158 : vector<8x1xf32>
    %160 = vector.broadcast %159 : vector<8x1xf32> to vector<8x32xf32>
    %161 = arith.mulf %156, %160 : vector<8x32xf32>
    %c0_59 = arith.constant 0 : index
    %c0_60 = arith.constant 0 : index
    %162 = vector.load %arg13[%c0_59, %c0_60] : memref<1x32xf32, #tpu.memory_space<vmem>>, vector<1x32xf32>
    %163 = vector.broadcast %162 : vector<1x32xf32> to vector<8x32xf32>
    %164 = arith.mulf %161, %163 : vector<8x32xf32>
    %c0_61 = arith.constant 0 : index
    %c0_62 = arith.constant 0 : index
    %165 = vector.load %arg14[%c0_61, %c0_62] : memref<1x32xf32, #tpu.memory_space<vmem>>, vector<1x32xf32>
    %166 = vector.broadcast %165 : vector<1x32xf32> to vector<8x32xf32>
    %167 = arith.addf %164, %166 : vector<8x32xf32>
    %168 = arith.truncf %167 : vector<8x32xf32> to vector<8x32xbf16>
    %c0_63 = arith.constant 0 : index
    %c0_64 = arith.constant 0 : index
    %169 = vector.load %arg15[%c0_63, %c0_64] : memref<32x32xbf16, #tpu.memory_space<vmem>>, vector<32x32xbf16>
    %cst_65 = arith.constant dense<0.000000e+00> : vector<8x32xf32>
    %170 = tpu.matmul %168, %169, %cst_65 {dimension_numbers = #tpu.dot_dimension_numbers<[1], [0], [0], [1], [0, 0, 1, 1], [], []>} : vector<8x32xbf16>, vector<32x32xbf16>, vector<8x32xf32> -> vector<8x32xf32>
    %c0_66 = arith.constant 0 : index
    %c0_67 = arith.constant 0 : index
    %171 = vector.load %arg16[%c0_66, %c0_67] : memref<1x32xf32, #tpu.memory_space<vmem>>, vector<1x32xf32>
    %172 = vector.broadcast %171 : vector<1x32xf32> to vector<8x32xf32>
    %173 = arith.addf %170, %172 : vector<8x32xf32>
    %174 = arith.truncf %3 : vector<49x32xf32> to vector<49x32xbf16>
    %c0_68 = arith.constant 0 : index
    %c0_69 = arith.constant 0 : index
    %175 = vector.load %arg17[%c0_68, %c0_69] : memref<32x64xbf16, #tpu.memory_space<vmem>>, vector<32x64xbf16>
    %cst_70 = arith.constant dense<0.000000e+00> : vector<49x64xf32>
    %176 = tpu.matmul %174, %175, %cst_70 {dimension_numbers = #tpu.dot_dimension_numbers<[1], [0], [0], [1], [0, 0, 1, 1], [], []>} : vector<49x32xbf16>, vector<32x64xbf16>, vector<49x64xf32> -> vector<49x64xf32>
    %c0_71 = arith.constant 0 : index
    %c0_72 = arith.constant 0 : index
    %177 = vector.load %arg18[%c0_71, %c0_72] : memref<1x64xf32, #tpu.memory_space<vmem>>, vector<1x64xf32>
    %178 = vector.broadcast %177 : vector<1x64xf32> to vector<49x64xf32>
    %179 = arith.addf %176, %178 : vector<49x64xf32>
    %180 = vector.extract_strided_slice %179 {offsets = [0, 0], sizes = [49, 32], strides = [1, 1]} : vector<49x64xf32> to vector<49x32xf32>
    %181 = vector.extract_strided_slice %179 {offsets = [0, 32], sizes = [49, 32], strides = [1, 1]} : vector<49x64xf32> to vector<49x32xf32>
    %182 = vector.extract_strided_slice %173 {offsets = [0, 0], sizes = [8, 8], strides = [1, 1]} : vector<8x32xf32> to vector<8x8xf32>
    %183 = arith.truncf %182 : vector<8x8xf32> to vector<8x8xbf16>
    %184 = vector.extract_strided_slice %180 {offsets = [0, 0], sizes = [49, 8], strides = [1, 1]} : vector<49x32xf32> to vector<49x8xf32>
    %185 = arith.truncf %184 : vector<49x8xf32> to vector<49x8xbf16>
    %186 = vector.extract_strided_slice %181 {offsets = [0, 0], sizes = [49, 8], strides = [1, 1]} : vector<49x32xf32> to vector<49x8xf32>
    %187 = arith.truncf %186 : vector<49x8xf32> to vector<49x8xbf16>
    %cst_73 = arith.constant dense<0.000000e+00> : vector<8x49xf32>
    %188 = tpu.matmul %183, %185, %cst_73 {dimension_numbers = #tpu.dot_dimension_numbers<[1], [1], [0], [0], [0, 0, 1, 0], [], []>} : vector<8x8xbf16>, vector<49x8xbf16>, vector<8x49xf32> -> vector<8x49xf32>
    %cst_74 = arith.constant 0.353553385 : f32
    %189 = vector.broadcast %cst_74 : f32 to vector<8x49xf32>
    %190 = arith.mulf %188, %189 : vector<8x49xf32>
    %cst_75 = arith.constant dense<0xFF800000> : vector<8xf32>
    %191 = vector.multi_reduction <maximumf>, %190, %cst_75 [1] : vector<8x49xf32> to vector<8xf32>
    %192 = vector.shape_cast %191 : vector<8xf32> to vector<8x1xf32>
    %193 = vector.broadcast %192 : vector<8x1xf32> to vector<8x49xf32>
    %194 = arith.subf %190, %193 : vector<8x49xf32>
    %195 = math.exp %194 : vector<8x49xf32>
    %cst_76 = arith.constant dense<0.000000e+00> : vector<8xf32>
    %196 = vector.multi_reduction <add>, %195, %cst_76 [1] : vector<8x49xf32> to vector<8xf32>
    %197 = vector.shape_cast %196 : vector<8xf32> to vector<8x1xf32>
    %198 = arith.truncf %195 : vector<8x49xf32> to vector<8x49xbf16>
    %cst_77 = arith.constant dense<0.000000e+00> : vector<8x8xf32>
    %199 = tpu.matmul %198, %187, %cst_77 {dimension_numbers = #tpu.dot_dimension_numbers<[1], [0], [0], [1], [0, 0, 1, 1], [], []>} : vector<8x49xbf16>, vector<49x8xbf16>, vector<8x8xf32> -> vector<8x8xf32>
    %200 = tpu.reciprocal %197 {approx = true} : vector<8x1xf32> -> vector<8x1xf32>
    %201 = vector.broadcast %200 : vector<8x1xf32> to vector<8x8xf32>
    %202 = arith.mulf %199, %201 : vector<8x8xf32>
    %203 = vector.extract_strided_slice %173 {offsets = [0, 8], sizes = [8, 8], strides = [1, 1]} : vector<8x32xf32> to vector<8x8xf32>
    %204 = arith.truncf %203 : vector<8x8xf32> to vector<8x8xbf16>
    %205 = vector.extract_strided_slice %180 {offsets = [0, 8], sizes = [49, 8], strides = [1, 1]} : vector<49x32xf32> to vector<49x8xf32>
    %206 = arith.truncf %205 : vector<49x8xf32> to vector<49x8xbf16>
    %207 = vector.extract_strided_slice %181 {offsets = [0, 8], sizes = [49, 8], strides = [1, 1]} : vector<49x32xf32> to vector<49x8xf32>
    %208 = arith.truncf %207 : vector<49x8xf32> to vector<49x8xbf16>
    %cst_78 = arith.constant dense<0.000000e+00> : vector<8x49xf32>
    %209 = tpu.matmul %204, %206, %cst_78 {dimension_numbers = #tpu.dot_dimension_numbers<[1], [1], [0], [0], [0, 0, 1, 0], [], []>} : vector<8x8xbf16>, vector<49x8xbf16>, vector<8x49xf32> -> vector<8x49xf32>
    %cst_79 = arith.constant 0.353553385 : f32
    %210 = vector.broadcast %cst_79 : f32 to vector<8x49xf32>
    %211 = arith.mulf %209, %210 : vector<8x49xf32>
    %cst_80 = arith.constant dense<0xFF800000> : vector<8xf32>
    %212 = vector.multi_reduction <maximumf>, %211, %cst_80 [1] : vector<8x49xf32> to vector<8xf32>
    %213 = vector.shape_cast %212 : vector<8xf32> to vector<8x1xf32>
    %214 = vector.broadcast %213 : vector<8x1xf32> to vector<8x49xf32>
    %215 = arith.subf %211, %214 : vector<8x49xf32>
    %216 = math.exp %215 : vector<8x49xf32>
    %cst_81 = arith.constant dense<0.000000e+00> : vector<8xf32>
    %217 = vector.multi_reduction <add>, %216, %cst_81 [1] : vector<8x49xf32> to vector<8xf32>
    %218 = vector.shape_cast %217 : vector<8xf32> to vector<8x1xf32>
    %219 = arith.truncf %216 : vector<8x49xf32> to vector<8x49xbf16>
    %cst_82 = arith.constant dense<0.000000e+00> : vector<8x8xf32>
    %220 = tpu.matmul %219, %208, %cst_82 {dimension_numbers = #tpu.dot_dimension_numbers<[1], [0], [0], [1], [0, 0, 1, 1], [], []>} : vector<8x49xbf16>, vector<49x8xbf16>, vector<8x8xf32> -> vector<8x8xf32>
    %221 = tpu.reciprocal %218 {approx = true} : vector<8x1xf32> -> vector<8x1xf32>
    %222 = vector.broadcast %221 : vector<8x1xf32> to vector<8x8xf32>
    %223 = arith.mulf %220, %222 : vector<8x8xf32>
    %224 = vector.extract_strided_slice %173 {offsets = [0, 16], sizes = [8, 8], strides = [1, 1]} : vector<8x32xf32> to vector<8x8xf32>
    %225 = arith.truncf %224 : vector<8x8xf32> to vector<8x8xbf16>
    %226 = vector.extract_strided_slice %180 {offsets = [0, 16], sizes = [49, 8], strides = [1, 1]} : vector<49x32xf32> to vector<49x8xf32>
    %227 = arith.truncf %226 : vector<49x8xf32> to vector<49x8xbf16>
    %228 = vector.extract_strided_slice %181 {offsets = [0, 16], sizes = [49, 8], strides = [1, 1]} : vector<49x32xf32> to vector<49x8xf32>
    %229 = arith.truncf %228 : vector<49x8xf32> to vector<49x8xbf16>
    %cst_83 = arith.constant dense<0.000000e+00> : vector<8x49xf32>
    %230 = tpu.matmul %225, %227, %cst_83 {dimension_numbers = #tpu.dot_dimension_numbers<[1], [1], [0], [0], [0, 0, 1, 0], [], []>} : vector<8x8xbf16>, vector<49x8xbf16>, vector<8x49xf32> -> vector<8x49xf32>
    %cst_84 = arith.constant 0.353553385 : f32
    %231 = vector.broadcast %cst_84 : f32 to vector<8x49xf32>
    %232 = arith.mulf %230, %231 : vector<8x49xf32>
    %cst_85 = arith.constant dense<0xFF800000> : vector<8xf32>
    %233 = vector.multi_reduction <maximumf>, %232, %cst_85 [1] : vector<8x49xf32> to vector<8xf32>
    %234 = vector.shape_cast %233 : vector<8xf32> to vector<8x1xf32>
    %235 = vector.broadcast %234 : vector<8x1xf32> to vector<8x49xf32>
    %236 = arith.subf %232, %235 : vector<8x49xf32>
    %237 = math.exp %236 : vector<8x49xf32>
    %cst_86 = arith.constant dense<0.000000e+00> : vector<8xf32>
    %238 = vector.multi_reduction <add>, %237, %cst_86 [1] : vector<8x49xf32> to vector<8xf32>
    %239 = vector.shape_cast %238 : vector<8xf32> to vector<8x1xf32>
    %240 = arith.truncf %237 : vector<8x49xf32> to vector<8x49xbf16>
    %cst_87 = arith.constant dense<0.000000e+00> : vector<8x8xf32>
    %241 = tpu.matmul %240, %229, %cst_87 {dimension_numbers = #tpu.dot_dimension_numbers<[1], [0], [0], [1], [0, 0, 1, 1], [], []>} : vector<8x49xbf16>, vector<49x8xbf16>, vector<8x8xf32> -> vector<8x8xf32>
    %242 = tpu.reciprocal %239 {approx = true} : vector<8x1xf32> -> vector<8x1xf32>
    %243 = vector.broadcast %242 : vector<8x1xf32> to vector<8x8xf32>
    %244 = arith.mulf %241, %243 : vector<8x8xf32>
    %245 = vector.extract_strided_slice %173 {offsets = [0, 24], sizes = [8, 8], strides = [1, 1]} : vector<8x32xf32> to vector<8x8xf32>
    %246 = arith.truncf %245 : vector<8x8xf32> to vector<8x8xbf16>
    %247 = vector.extract_strided_slice %180 {offsets = [0, 24], sizes = [49, 8], strides = [1, 1]} : vector<49x32xf32> to vector<49x8xf32>
    %248 = arith.truncf %247 : vector<49x8xf32> to vector<49x8xbf16>
    %249 = vector.extract_strided_slice %181 {offsets = [0, 24], sizes = [49, 8], strides = [1, 1]} : vector<49x32xf32> to vector<49x8xf32>
    %250 = arith.truncf %249 : vector<49x8xf32> to vector<49x8xbf16>
    %cst_88 = arith.constant dense<0.000000e+00> : vector<8x49xf32>
    %251 = tpu.matmul %246, %248, %cst_88 {dimension_numbers = #tpu.dot_dimension_numbers<[1], [1], [0], [0], [0, 0, 1, 0], [], []>} : vector<8x8xbf16>, vector<49x8xbf16>, vector<8x49xf32> -> vector<8x49xf32>
    %cst_89 = arith.constant 0.353553385 : f32
    %252 = vector.broadcast %cst_89 : f32 to vector<8x49xf32>
    %253 = arith.mulf %251, %252 : vector<8x49xf32>
    %cst_90 = arith.constant dense<0xFF800000> : vector<8xf32>
    %254 = vector.multi_reduction <maximumf>, %253, %cst_90 [1] : vector<8x49xf32> to vector<8xf32>
    %255 = vector.shape_cast %254 : vector<8xf32> to vector<8x1xf32>
    %256 = vector.broadcast %255 : vector<8x1xf32> to vector<8x49xf32>
    %257 = arith.subf %253, %256 : vector<8x49xf32>
    %258 = math.exp %257 : vector<8x49xf32>
    %cst_91 = arith.constant dense<0.000000e+00> : vector<8xf32>
    %259 = vector.multi_reduction <add>, %258, %cst_91 [1] : vector<8x49xf32> to vector<8xf32>
    %260 = vector.shape_cast %259 : vector<8xf32> to vector<8x1xf32>
    %261 = arith.truncf %258 : vector<8x49xf32> to vector<8x49xbf16>
    %cst_92 = arith.constant dense<0.000000e+00> : vector<8x8xf32>
    %262 = tpu.matmul %261, %250, %cst_92 {dimension_numbers = #tpu.dot_dimension_numbers<[1], [0], [0], [1], [0, 0, 1, 1], [], []>} : vector<8x49xbf16>, vector<49x8xbf16>, vector<8x8xf32> -> vector<8x8xf32>
    %263 = tpu.reciprocal %260 {approx = true} : vector<8x1xf32> -> vector<8x1xf32>
    %264 = vector.broadcast %263 : vector<8x1xf32> to vector<8x8xf32>
    %265 = arith.mulf %262, %264 : vector<8x8xf32>
    %266 = tpu.concatenate %202, %223, %244, %265 in 1 : vector<8x8xf32>, vector<8x8xf32>, vector<8x8xf32>, vector<8x8xf32> -> vector<8x32xf32>
    %267 = arith.truncf %266 : vector<8x32xf32> to vector<8x32xbf16>
    %c0_93 = arith.constant 0 : index
    %c0_94 = arith.constant 0 : index
    %268 = vector.load %arg19[%c0_93, %c0_94] : memref<32x32xbf16, #tpu.memory_space<vmem>>, vector<32x32xbf16>
    %cst_95 = arith.constant dense<0.000000e+00> : vector<8x32xf32>
    %269 = tpu.matmul %267, %268, %cst_95 {dimension_numbers = #tpu.dot_dimension_numbers<[1], [0], [0], [1], [0, 0, 1, 1], [], []>} : vector<8x32xbf16>, vector<32x32xbf16>, vector<8x32xf32> -> vector<8x32xf32>
    %c0_96 = arith.constant 0 : index
    %c0_97 = arith.constant 0 : index
    %270 = vector.load %arg20[%c0_96, %c0_97] : memref<1x32xf32, #tpu.memory_space<vmem>>, vector<1x32xf32>
    %271 = vector.broadcast %270 : vector<1x32xf32> to vector<8x32xf32>
    %272 = arith.addf %269, %271 : vector<8x32xf32>
    %273 = arith.addf %167, %272 : vector<8x32xf32>
    %c0_98 = arith.constant 0 : index
    %c0_99 = arith.constant 0 : index
    %c0_100 = arith.constant 0 : index
    %274 = vector.load %arg21[%c0_98, %c0_99, %c0_100] : memref<1x8x32xf32, #tpu.memory_space<vmem>>, vector<1x8x32xf32>
    %275 = vector.shape_cast %274 : vector<1x8x32xf32> to vector<8x32xf32>
    %276 = vector.shape_cast %273 : vector<8x32xf32> to vector<1x8x32xf32>
    tpu.vector_store %arg21[%c0_98, %c0_99, %c0_100], %276 {strides = array<i32>} : memref<1x8x32xf32, #tpu.memory_space<vmem>>, vector<1x8x32xf32>,
    return
  }
  func.func @transform_0(%arg0: i32) -> (i32, i32, i32) {
    %c0_i32 = arith.constant 0 : i32
    %c0_i32_0 = arith.constant 0 : i32
    %c0_i32_1 = arith.constant 0 : i32
    return %arg0, %c0_i32, %c0_i32_0 : i32, i32, i32
  }
  func.func @transform_1(%arg0: i32) -> (i32, i32, i32) {
    %c0_i32 = arith.constant 0 : i32
    %c0_i32_0 = arith.constant 0 : i32
    %c0_i32_1 = arith.constant 0 : i32
    return %arg0, %c0_i32, %c0_i32_0 : i32, i32, i32
  }
  func.func @transform_2(%arg0: i32) -> (i32, i32) {
    %c0_i32 = arith.constant 0 : i32
    %c0_i32_0 = arith.constant 0 : i32
    %c0_i32_1 = arith.constant 0 : i32
    return %c0_i32, %c0_i32_0 : i32, i32
  }
  func.func @transform_3(%arg0: i32) -> (i32, i32) {
    %c0_i32 = arith.constant 0 : i32
    %c0_i32_0 = arith.constant 0 : i32
    %c0_i32_1 = arith.constant 0 : i32
    return %c0_i32, %c0_i32_0 : i32, i32
  }
  func.func @transform_4(%arg0: i32) -> (i32, i32) {
    %c0_i32 = arith.constant 0 : i32
    %c0_i32_0 = arith.constant 0 : i32
    %c0_i32_1 = arith.constant 0 : i32
    return %c0_i32, %c0_i32_0 : i32, i32
  }
  func.func @transform_5(%arg0: i32) -> (i32, i32) {
    %c0_i32 = arith.constant 0 : i32
    %c0_i32_0 = arith.constant 0 : i32
    %c0_i32_1 = arith.constant 0 : i32
    return %c0_i32, %c0_i32_0 : i32, i32
  }
  func.func @transform_6(%arg0: i32) -> (i32, i32) {
    %c0_i32 = arith.constant 0 : i32
    %c0_i32_0 = arith.constant 0 : i32
    %c0_i32_1 = arith.constant 0 : i32
    return %c0_i32, %c0_i32_0 : i32, i32
  }
  func.func @transform_7(%arg0: i32) -> (i32, i32) {
    %c0_i32 = arith.constant 0 : i32
    %c0_i32_0 = arith.constant 0 : i32
    %c0_i32_1 = arith.constant 0 : i32
    return %c0_i32, %c0_i32_0 : i32, i32
  }
  func.func @transform_8(%arg0: i32) -> (i32, i32) {
    %c0_i32 = arith.constant 0 : i32
    %c0_i32_0 = arith.constant 0 : i32
    %c0_i32_1 = arith.constant 0 : i32
    return %c0_i32, %c0_i32_0 : i32, i32
  }
  func.func @transform_9(%arg0: i32) -> (i32, i32) {
    %c0_i32 = arith.constant 0 : i32
    %c0_i32_0 = arith.constant 0 : i32
    %c0_i32_1 = arith.constant 0 : i32
    return %c0_i32, %c0_i32_0 : i32, i32
  }
  func.func @transform_10(%arg0: i32) -> (i32, i32) {
    %c0_i32 = arith.constant 0 : i32
    %c0_i32_0 = arith.constant 0 : i32
    %c0_i32_1 = arith.constant 0 : i32
    return %c0_i32, %c0_i32_0 : i32, i32
  }
  func.func @transform_11(%arg0: i32) -> (i32, i32) {
    %c0_i32 = arith.constant 0 : i32
    %c0_i32_0 = arith.constant 0 : i32
    %c0_i32_1 = arith.constant 0 : i32
    return %c0_i32, %c0_i32_0 : i32, i32
  }
  func.func @transform_12(%arg0: i32) -> (i32, i32) {
    %c0_i32 = arith.constant 0 : i32
    %c0_i32_0 = arith.constant 0 : i32
    %c0_i32_1 = arith.constant 0 : i32
    return %c0_i32, %c0_i32_0 : i32, i32
  }
  func.func @transform_13(%arg0: i32) -> (i32, i32) {
    %c0_i32 = arith.constant 0 : i32
    %c0_i32_0 = arith.constant 0 : i32
    %c0_i32_1 = arith.constant 0 : i32
    return %c0_i32, %c0_i32_0 : i32, i32
  }
  func.func @transform_14(%arg0: i32) -> (i32, i32) {
    %c0_i32 = arith.constant 0 : i32
    %c0_i32_0 = arith.constant 0 : i32
    %c0_i32_1 = arith.constant 0 : i32
    return %c0_i32, %c0_i32_0 : i32, i32
  }
  func.func @transform_15(%arg0: i32) -> (i32, i32) {
    %c0_i32 = arith.constant 0 : i32
    %c0_i32_0 = arith.constant 0 : i32
    %c0_i32_1 = arith.constant 0 : i32
    return %c0_i32, %c0_i32_0 : i32, i32
  }
  func.func @transform_16(%arg0: i32) -> (i32, i32) {
    %c0_i32 = arith.constant 0 : i32
    %c0_i32_0 = arith.constant 0 : i32
    %c0_i32_1 = arith.constant 0 : i32
    return %c0_i32, %c0_i32_0 : i32, i32
  }
  func.func @transform_17(%arg0: i32) -> (i32, i32) {
    %c0_i32 = arith.constant 0 : i32
    %c0_i32_0 = arith.constant 0 : i32
    %c0_i32_1 = arith.constant 0 : i32
    return %c0_i32, %c0_i32_0 : i32, i32
  }
  func.func @transform_18(%arg0: i32) -> (i32, i32) {
    %c0_i32 = arith.constant 0 : i32
    %c0_i32_0 = arith.constant 0 : i32
    %c0_i32_1 = arith.constant 0 : i32
    return %c0_i32, %c0_i32_0 : i32, i32
  }
  func.func @transform_19(%arg0: i32) -> (i32, i32) {
    %c0_i32 = arith.constant 0 : i32
    %c0_i32_0 = arith.constant 0 : i32
    %c0_i32_1 = arith.constant 0 : i32
    return %c0_i32, %c0_i32_0 : i32, i32
  }
  func.func @transform_20(%arg0: i32) -> (i32, i32, i32) {
    %c0_i32 = arith.constant 0 : i32
    %c0_i32_0 = arith.constant 0 : i32
    %c0_i32_1 = arith.constant 0 : i32
    return %arg0, %c0_i32, %c0_i32_0 : i32, i32, i32
  }
}

module attributes {stable_mosaic.version = 11 : i64} {
  func.func @_matmul_kernel(%arg0: i32, %arg1: i32, %arg2: i32, %arg3: memref<16x32xbf16, #tpu.memory_space<vmem>>, %arg4: memref<32x128xbf16, #tpu.memory_space<vmem>>, %arg5: memref<1x128xf32, #tpu.memory_space<vmem>>, %arg6: memref<16x128xf32, #tpu.memory_space<vmem>>, %arg7: memref<16x128xf32, #tpu.memory_space<vmem>>) attributes {dimension_semantics = [#tpu.dimension_semantics<parallel>, #tpu.dimension_semantics<parallel>, #tpu.dimension_semantics<arbitrary>], iteration_bounds = array<i64: 1, 1, 1>, scalar_prefetch = 0 : i64, scratch_operands = 1 : i64, tpu.core_type = #tpu.core_type<tc>, window_params = [{transform_indices = @transform_0, window_bounds = array<i64: 16, 32>}, {transform_indices = @transform_1, window_bounds = array<i64: 32, 128>}, {transform_indices = @transform_2, window_bounds = array<i64: 1, 128>}, {transform_indices = @transform_3, window_bounds = array<i64: 16, 128>}]} {
    %c0_i32 = arith.constant 0 : i32
    %0 = arith.cmpi eq, %arg2, %c0_i32 : i32
    %1 = arith.extui %0 : i1 to i32
    %c0_i32_0 = arith.constant 0 : i32
    %2 = arith.cmpi ne, %1, %c0_i32_0 : i32
    scf.if %2 {
      %cst_10 = arith.constant 0.000000e+00 : f32
      %12 = vector.broadcast %cst_10 : f32 to vector<16x128xf32>
      %c0_11 = arith.constant 0 : index
      %c0_12 = arith.constant 0 : index
      %13 = vector.load %arg7[%c0_11, %c0_12] : memref<16x128xf32, #tpu.memory_space<vmem>>, vector<16x128xf32>
      tpu.vector_store %arg7[%c0_11, %c0_12], %12 {strides = array<i32>} : memref<16x128xf32, #tpu.memory_space<vmem>>, vector<16x128xf32>,
    } else {
    }
    %c0 = arith.constant 0 : index
    %c0_1 = arith.constant 0 : index
    %3 = vector.load %arg7[%c0, %c0_1] : memref<16x128xf32, #tpu.memory_space<vmem>>, vector<16x128xf32>
    %c0_2 = arith.constant 0 : index
    %c0_3 = arith.constant 0 : index
    %4 = vector.load %arg3[%c0_2, %c0_3] : memref<16x32xbf16, #tpu.memory_space<vmem>>, vector<16x32xbf16>
    %c0_4 = arith.constant 0 : index
    %c0_5 = arith.constant 0 : index
    %5 = vector.load %arg4[%c0_4, %c0_5] : memref<32x128xbf16, #tpu.memory_space<vmem>>, vector<32x128xbf16>
    %cst = arith.constant dense<0.000000e+00> : vector<16x128xf32>
    %6 = tpu.matmul %4, %5, %cst {dimension_numbers = #tpu.dot_dimension_numbers<[1], [0], [0], [1], [0, 0, 1, 1], [], []>} : vector<16x32xbf16>, vector<32x128xbf16>, vector<16x128xf32> -> vector<16x128xf32>
    %7 = arith.addf %3, %6 : vector<16x128xf32>
    %c0_6 = arith.constant 0 : index
    %c0_7 = arith.constant 0 : index
    %8 = vector.load %arg7[%c0_6, %c0_7] : memref<16x128xf32, #tpu.memory_space<vmem>>, vector<16x128xf32>
    tpu.vector_store %arg7[%c0_6, %c0_7], %7 {strides = array<i32>} : memref<16x128xf32, #tpu.memory_space<vmem>>, vector<16x128xf32>,
    %c0_i32_8 = arith.constant 0 : i32
    %9 = arith.cmpi eq, %arg2, %c0_i32_8 : i32
    %10 = arith.extui %9 : i1 to i32
    %c0_i32_9 = arith.constant 0 : i32
    %11 = arith.cmpi ne, %10, %c0_i32_9 : i32
    scf.if %11 {
      %c0_10 = arith.constant 0 : index
      %c0_11 = arith.constant 0 : index
      %12 = vector.load %arg7[%c0_10, %c0_11] : memref<16x128xf32, #tpu.memory_space<vmem>>, vector<16x128xf32>
      %c0_12 = arith.constant 0 : index
      %c0_13 = arith.constant 0 : index
      %13 = vector.load %arg5[%c0_12, %c0_13] : memref<1x128xf32, #tpu.memory_space<vmem>>, vector<1x128xf32>
      %14 = vector.broadcast %13 : vector<1x128xf32> to vector<16x128xf32>
      %15 = arith.addf %12, %14 : vector<16x128xf32>
      %c0_14 = arith.constant 0 : index
      %c0_15 = arith.constant 0 : index
      %16 = vector.load %arg6[%c0_14, %c0_15] : memref<16x128xf32, #tpu.memory_space<vmem>>, vector<16x128xf32>
      tpu.vector_store %arg6[%c0_14, %c0_15], %15 {strides = array<i32>} : memref<16x128xf32, #tpu.memory_space<vmem>>, vector<16x128xf32>,
    } else {
    }
    return
  }
  func.func @transform_0(%arg0: i32, %arg1: i32, %arg2: i32) -> (i32, i32) {
    %c0_i32 = arith.constant 0 : i32
    return %arg0, %arg2 : i32, i32
  }
  func.func @transform_1(%arg0: i32, %arg1: i32, %arg2: i32) -> (i32, i32) {
    %c0_i32 = arith.constant 0 : i32
    return %arg2, %arg1 : i32, i32
  }
  func.func @transform_2(%arg0: i32, %arg1: i32, %arg2: i32) -> (i32, i32) {
    %c0_i32 = arith.constant 0 : i32
    %c0_i32_0 = arith.constant 0 : i32
    return %c0_i32, %arg1 : i32, i32
  }
  func.func @transform_3(%arg0: i32, %arg1: i32, %arg2: i32) -> (i32, i32) {
    %c0_i32 = arith.constant 0 : i32
    return %arg0, %arg1 : i32, i32
  }
}

</mosaic_0001>

<bundles_post_ra>
// kernel: forward.6
= control target key start
LH: loop header
LB: loop body
LE: loop exit
PB: predicated region body
PF: predicated region fallthrough
CT: control target
= control target key end

     0   :  { %s1402_s12 = smov 0   ;;  %s1404_s13 = smov 0   ;;  %s1722_s0 = inlined_call_operand.vmem [shape: bf16[392,147], index: 0, kind: input, shape index: {}]   ;;  %s1723_s1 = inlined_call_operand.vmem [shape: bf16[147,64], index: 1, kind: input, shape index: {}]   ;;  %s1724_s2 = inlined_call_operand.vmem [shape: f32[1,64], index: 2, kind: input, shape index: {}]   ;;  %s1725_s3 = inlined_call_operand.vmem [shape: f32[392,64], index: 3, kind: output, shape index: {}]  }
   0x1   :  { %s1406_s14 = smov 0   ;;  %s1408_s15 = smov 0  }
   0x2   :  { %s1410_s16 = smov 0  }
   0x3 LB: > { %s1047_s17 = sadd.s32 4294967295, %s1345_s16   ;;  %s32_s18 = sadd.s32 1, %s1341_s15  ;;  %s1345_s16 = sphi %s1410_s16, %s13_s16   ;;  %s1341_s15 = sphi %s1408_s15, %s1733_s15   ;;  %s1337_s14 = sphi %s1406_s14, %s1732_s14   ;;  %s1333_s13 = sphi %s1404_s13, %s1731_s13   ;;  %s1329_s12 = sphi %s1402_s12, %s1730_s12  }
   0x4   : > { %p34_p0 = scmp.ge.s32.totalorder %s32_s18, 4  ;;  %s123_s19 = sadd.s32 1, %s1333_s13 }
   0x5   : > { %p133_p1 = scmp.ne.s32.totalorder %s1333_s13, %s1329_s12  ;;  %p134_p2 = scmp.eq.s32.totalorder %s1047_s17, 3 }
   0x6   : > { %s1735_s18 = smov (%p34_p0, %s32_s18), 0  ;;  %p1053_p4 = scmp.ge.s32.totalorder %s1345_s16, 1 }
   0x7   : > { %p1434_p3 = por %p134_p2, %p133_p1  ;;  %s118_s21 = ssub.s32 %s1341_s15, %s1735_s18 }
   0x8   : > { %p201_p5 = scmp.lt.s32.totalorder %s1345_s16, 5  ;;  %p121_p6 = scmp.eq.s32.totalorder %s118_s21, 0 }
   0xa   : > { %p202_p7 = pnand %p1053_p4, %p201_p5 }
   0xb   : > { %s1443_s22 = scalar_select %p121_p6, %s1333_s13, %s123_s19  }
   0xc   : > { %205 = sbr.rel (%p202_p7) target bundleno = 356 (0x164), region = 32  ;;  %v1241_v0 = vld [vmem:[%s1723_s1] sm:$0xff] (!%p202_p7)   ;;  %v1379_v1 = vmov (!%p202_p7), 0   ;;  %v1242_v2 = vld [vmem:[%s1723_s1 + $0x8] sm:$0xff] (!%p202_p7)   ;;  %v1243_v3 = vld [vmem:[%s1723_s1 + $0x10] sm:$0xff] (!%p202_p7)   ;;  %s1459_s29 = sshll.u32 (!%p202_p7), %s1337_s14, 4 }
   0xd   : > { %518 = vmatprep.subr.bf16.mxu0 (!%p202_p7), %v1379_v1  ;;  %1114 = vmatprep.subr.bf16.mxu1 (!%p202_p7), %v1379_v1  ;;  %p252_p8 = scmp.lt.s32.totalorder (!%p202_p7), %s1459_s29, 48  ;;  %v1244_v4 = vld [vmem:[%s1723_s1 + $0x18] sm:$0xff] (!%p202_p7)   ;;  %vm289_vm0 = vcmask (!%p202_p7), 523264   ;;  %v1380_v5 = vmov (!%p202_p7), 0.0   ;;  %v1245_v6 = vld [vmem:[%s1723_s1 + $0x20] sm:$0xff] (!%p202_p7)   ;;  %vm486_vm1 = vcmask (!%p202_p7), 154624  }
   0xe   : > { %519 = vmatpush1.bf16.msra.mxu0 (!%p202_p7), %v1241_v0  ;;  %1124 = vmatpush1.bf16.msra.mxu1 (!%p202_p7), %v1241_v0  ;;  %290 = vst.msk [vmem:[#allocation2] sm:$0xff] (!%p202_p7), %vm289_vm0, %v1380_v5  ;;  %291 = vst.msk [vmem:[#allocation2 + $0x8] sm:$0xff] (!%p202_p7), %vm289_vm0, %v1380_v5  ;;  %v1246_v9 = vld [vmem:[%s1723_s1 + $0x28] sm:$0xff] (!%p202_p7)   ;;  %v1247_v10 = vld [vmem:[%s1723_s1 + $0x30] sm:$0xff] (!%p202_p7)   ;;  %vm511_vm2 = vcmask (!%p202_p7), 1040384   ;;  %vm512_vm3 = vcmask (!%p202_p7), 1041408  }
   0xf   : > { %520 = vmatprep.subr.bf16.mxu0 (!%p202_p7), %v1379_v1  ;;  %1115 = vmatprep.subr.bf16.mxu1 (!%p202_p7), %v1379_v1  ;;  %292 = vst.msk [vmem:[#allocation2 + $0x10] sm:$0xff] (!%p202_p7), %vm289_vm0, %v1380_v5  ;;  %293 = vst.msk [vmem:[#allocation2 + $0x18] sm:$0xff] (!%p202_p7), %vm289_vm0, %v1380_v5  ;;  %v1248_v11 = vld [vmem:[%s1723_s1 + $0x38] sm:$0xff] (!%p202_p7)   ;;  %v1381_v12 = vmov (!%p202_p7), 65535   ;;  %v1249_v14 = vld [vmem:[%s1723_s1 + $0x40] sm:$0xff] (!%p202_p7)   ;;  %s242_s4 = sand.u32 (!%p202_p7), 1, %s1329_s12  }
  0x10   : > { %294 = vst.msk [vmem:[#allocation2 + $0x20] sm:$0xff] (!%p202_p7), %vm289_vm0, %v1380_v5  ;;  %295 = vst.msk [vmem:[#allocation2 + $0x28] sm:$0xff] (!%p202_p7), %vm289_vm0, %v1380_v5  ;;  %v513_v13 = vsel (!%p202_p7), %vm511_vm2, 4294967295, %v1381_v12  ;;  %v1250_v15 = vld [vmem:[%s1723_s1 + $0x48] ss:$0 sps:$4 sm:$0x33] (!%p202_p7)  }
  0x11   : > { %296 = vst.msk [vmem:[#allocation2 + $0x30] sm:$0xff] (!%p202_p7), %vm289_vm0, %v1380_v5  ;;  %297 = vst.msk [vmem:[#allocation2 + $0x38] sm:$0xff] (!%p202_p7), %vm289_vm0, %v1380_v5  ;;  %v514_v16 = vsel (!%p202_p7), %vm512_vm3, %v513_v13, 0  ;;  %v1553_v50 = vld [vmem:[%s1724_s2] ss:$0 sm:$0xff] (!%p202_p7)  ;;  %s1054_s7 = sshll.u32 (!%p202_p7), %s242_s4, 7 }
  0x12   : > { %521 = vmatpush1.bf16.msra.mxu0 (!%p202_p7), %v1242_v2  ;;  %1125 = vmatpush1.bf16.msra.mxu1 (!%p202_p7), %v1242_v2  ;;  %298 = vst.msk [vmem:[#allocation2 + $0x40] sm:$0xff] (!%p202_p7), %vm289_vm0, %v1380_v5  ;;  %299 = vst.msk [vmem:[#allocation2 + $0x48] sm:$0xff] (!%p202_p7), %vm289_vm0, %v1380_v5  ;;  %v516_v17 = vand.u32 (!%p202_p7), %v1250_v15, %v514_v16  ;;  %s1563_s12 = scalar_lea.vmem (!%p202_p7), [#allocation3], %s1054_s7  }
  0x13   : > { %522 = vmatprep.subr.bf16.mxu0 %v1379_v1  ;;  %1116 = vmatprep.subr.bf16.mxu1 %v1379_v1  ;;  %s253_s30 = scalar_select %p252_p8, %s1459_s29, 48  ;;  %300 = vst.msk [vmem:[#allocation2 + $0x50] sm:$0xff] %vm289_vm0, %v1380_v5  ;;  %301 = vst.msk [vmem:[#allocation2 + $0x58] sm:$0xff] %vm289_vm0, %v1380_v5 }
  0x14   : > { %302 = vst.msk [vmem:[#allocation2 + $0x60] sm:$0xff] %vm289_vm0, %v1380_v5  ;;  %303 = vst.msk [vmem:[#allocation2 + $0x68] sm:$0xff] %vm289_vm0, %v1380_v5  ;;  %s730_s8 = ssub.s32 (%p1434_p3), 49, %s1459_s29 }
  0x15   : > { %s1110_s6 = sshll.u32 %s253_s30, 3  ;;  %304 = vst.msk [vmem:[#allocation2 + $0x70] sm:$0xff] %vm289_vm0, %v1380_v5  ;;  %305 = vst.msk [vmem:[#allocation2 + $0x78] sm:$0xff] %vm289_vm0, %v1380_v5  ;;  %v306_v32 = vld [vmem:[#allocation2] sm:$0xff]  ;;  %v307_v36 = vld [vmem:[#allocation2 + $0x8] sm:$0xff]  ;;  %p731_p9 = scmp.lt.s32.totalorder (%p1434_p3), %s730_s8, 16 }
  0x16   : > { %523 = vmatpush1.bf16.msra.mxu0 %v1243_v3  ;;  %1126 = vmatpush1.bf16.msra.mxu1 %v1243_v3  ;;  %s1489_s9 = scalar_lea.vmem %s1722_s0, %s1110_s6  ;;  %v308_v48 = vld [vmem:[#allocation2 + $0x10] sm:$0xff]  ;;  %v309_v53 = vld [vmem:[#allocation2 + $0x18] sm:$0xff] }
  0x17   : > { %524 = vmatprep.subr.bf16.mxu0 %v1379_v1  ;;  %1117 = vmatprep.subr.bf16.mxu1 %v1379_v1  ;;  %v1253_v7 = vld [vmem:[%s1489_s9 + $0x4] ss:$8 sps:$4 sm:$0xff]   ;;  %v1251_v18 = vld [vmem:[%s1489_s9] ss:$8 sps:$4 sm:$0xff]   ;;  %v1257_v20 = vld [vmem:[%s1489_s9 + $0x14] ss:$8 sps:$4 sm:$0xff]  }
  0x18   : > { %v1256_v8 = vld [vmem:[%s1489_s9 + $0x44] ss:$8 sps:$4 sm:$0xff]   ;;  %1084 = vmatprep.mubr.msk.bf16.mxu0 %vm486_vm1, %v1253_v7  ;;  %v1254_v19 = vld [vmem:[%s1489_s9 + $0x40] ss:$8 sps:$4 sm:$0xff]   ;;  %v1259_v21 = vld [vmem:[%s1489_s9 + $0x54] ss:$8 sps:$4 sm:$0xff]  }
  0x19   : > { %1088 = vmatprep.mubr.msk.bf16.mxu1 %vm486_vm1, %v1256_v8  ;;  %v1261_v22 = vld [vmem:[%s1489_s9 + $0x10] ss:$8 sps:$4 sm:$0xff]   ;;  %v1263_v24 = vld [vmem:[%s1489_s9 + $0x24] ss:$8 sps:$4 sm:$0xff]   ;;  %v1267_v26 = vld [vmem:[%s1489_s9 + $0x20] ss:$8 sps:$4 sm:$0xff]  }
  0x1a   : > { %525 = vmatpush1.bf16.msra.mxu0 %v1244_v4  ;;  %1127 = vmatpush1.bf16.msra.mxu1 %v1244_v4  ;;  %v1262_v23 = vld [vmem:[%s1489_s9 + $0x50] ss:$8 sps:$4 sm:$0xff]   ;;  %v1265_v25 = vld [vmem:[%s1489_s9 + $0x64] ss:$8 sps:$4 sm:$0xff]   ;;  %v1268_v27 = vld [vmem:[%s1489_s9 + $0x60] ss:$8 sps:$4 sm:$0xff]  }
  0x1b   : > { %526 = vmatprep.subr.bf16.mxu0 %v1379_v1  ;;  %1118 = vmatprep.subr.bf16.mxu1 %v1379_v1  ;;  %v1269_v28 = vld [vmem:[%s1489_s9 + $0x34] ss:$8 sps:$4 sm:$0xff]   ;;  %v1273_v30 = vld [vmem:[%s1489_s9 + $0x30] ss:$8 sps:$4 sm:$0xff]   ;;  %v314_v33 = vld [vmem:[#allocation2 + $0x40] sm:$0xff] }
  0x1c   : > { %v1271_v29 = vld [vmem:[%s1489_s9 + $0x74] ss:$8 sps:$4 sm:$0xff]   ;;  %v1274_v31 = vld [vmem:[%s1489_s9 + $0x70] ss:$8 sps:$4 sm:$0xff]   ;;  %v315_v37 = vld [vmem:[#allocation2 + $0x48] sm:$0xff]  ;;  %s1111_s9 = sshll.u32 (%p1434_p3), %s1337_s14, 7 }
  0x1d   : > { %v316_v49 = vld [vmem:[#allocation2 + $0x50] sm:$0xff]  ;;  %v317_v54 = vld [vmem:[#allocation2 + $0x58] sm:$0xff]  ;;  %v318_v12 = vld [vmem:[#allocation2 + $0x60] sm:$0xff]  ;;  %s1624_s17 = scalar_lea.vmem (%p1434_p3), %s1725_s3, %s1111_s9  }
  0x1e   : > { %527 = vmatpush1.bf16.msra.mxu0 %v1245_v6  ;;  %1128 = vmatpush1.bf16.msra.mxu1 %v1245_v6 }
  0x1f   : > { %528 = vmatprep.subr.bf16.mxu0 %v1379_v1  ;;  %1119 = vmatprep.subr.bf16.mxu1 %v1379_v1 }
  0x22   : > { %529 = vmatpush1.bf16.msra.mxu0 %v1246_v9  ;;  %1129 = vmatpush1.bf16.msra.mxu1 %v1246_v9 }
  0x23   : > { %530 = vmatprep.subr.bf16.mxu0 %v1379_v1  ;;  %1120 = vmatprep.subr.bf16.mxu1 %v1379_v1 }
  0x26   : > { %531 = vmatpush1.bf16.msra.mxu0 %v1247_v10  ;;  %1130 = vmatpush1.bf16.msra.mxu1 %v1247_v10 }
  0x27   : > { %532 = vmatprep.subr.bf16.mxu0 %v1379_v1  ;;  %1121 = vmatprep.subr.bf16.mxu1 %v1379_v1 }
  0x2a   : > { %533 = vmatpush1.bf16.msra.mxu0 %v1248_v11  ;;  %1131 = vmatpush1.bf16.msra.mxu1 %v1248_v11  ;;  %v310_v11 = vld [vmem:[#allocation2 + $0x20] sm:$0xff] }
  0x2b   : > { %534 = vmatprep.subr.bf16.mxu0 %v1379_v1  ;;  %1122 = vmatprep.subr.bf16.mxu1 %v1379_v1 }
  0x2e   : > { %535 = vmatpush1.bf16.msra.mxu0 %v1249_v14  ;;  %1132 = vmatpush1.bf16.msra.mxu1 %v1249_v14 }
  0x2f   : > { %536 = vmatprep.subr.bf16.mxu0 %v1379_v1  ;;  %1123 = vmatprep.subr.bf16.mxu1 %v1379_v1 }
  0x32   : > { %537 = vmatpush1.bf16.msra.mxu0 %v516_v17  ;;  %1133 = vmatpush1.bf16.msra.mxu1 %v516_v17  ;;  %v311_v17 = vld [vmem:[#allocation2 + $0x28] sm:$0xff] }
  0x35   : > { %551 = vmatmul.mubr.bf16.vlgmr.msra.gmra.mrb[0].mxu0 %v1251_v18  ;;  %583 = vmatmul.mubr.bf16.vlgmr.msra.gmra.mrb[0].mxu1 %v1254_v19  ;;  %v319_v18 = vld [vmem:[#allocation2 + $0x68] sm:$0xff] }
  0x36   : > { %1085 = vmatprep.mubr.msk.bf16.mxu0 %vm486_vm1, %v1257_v20  ;;  %1089 = vmatprep.mubr.msk.bf16.mxu1 %vm486_vm1, %v1259_v21 }
  0x3d   : > { %559 = vmatmul.mubr.bf16.gmra.mrb[4].mxu0 %v1261_v22  ;;  %591 = vmatmul.mubr.bf16.gmra.mrb[4].mxu1 %v1262_v23 }
  0x3e   : > { %1086 = vmatprep.mubr.msk.bf16.mxu0 %vm486_vm1, %v1263_v24  ;;  %1090 = vmatprep.mubr.msk.bf16.mxu1 %vm486_vm1, %v1265_v25 }
  0x45   : > { %567 = vmatmul.mubr.bf16.gmra.mrb[8].mxu0 %v1267_v26  ;;  %599 = vmatmul.mubr.bf16.gmra.mrb[8].mxu1 %v1268_v27 }
  0x46   : > { %1087 = vmatprep.mubr.msk.bf16.mxu0 %vm486_vm1, %v1269_v28  ;;  %1091 = vmatprep.mubr.msk.bf16.mxu1 %vm486_vm1, %v1271_v29 }
  0x4d   : > { %575 = vmatmul.mubr.bf16.gmra.mrb[12].mxu0 %v1273_v30  ;;  %607 = vmatmul.mubr.bf16.gmra.mrb[12].mxu1 %v1274_v31 }
 0x108   : > { %v552_v34 = vpop.f32.mrb[0].mxu0  ;;  %v584_v35 = vpop.f32.mrb[0].mxu1 }
 0x109   : > { %v615_v38 = vadd.f32 %v552_v34, %v306_v32  ;;  %v623_v39 = vadd.f32 %v584_v35, %v314_v33  ;;  %v554_v40 = vpop.f32.mrb[1].mxu0  ;;  %v586_v41 = vpop.f32.mrb[1].mxu1 }
 0x10a   : > { %v555_v42 = vpop.f32.mrb[2].mxu0  ;;  %v587_v43 = vpop.f32.mrb[2].mxu1  ;;  %v320_v40 = vld [vmem:[#allocation2 + $0x70] sm:$0xff] }
 0x10b   : > { %632 = vst.msk [vmem:[#allocation2] sm:$0xff] %vm289_vm0, %v615_v38  ;;  %640 = vst.msk [vmem:[#allocation2 + $0x40] sm:$0xff] %vm289_vm0, %v623_v39  ;;  %v616_v44 = vadd.f32 %v555_v42, %v307_v36  ;;  %v624_v45 = vadd.f32 %v587_v43, %v315_v37  ;;  %v557_v46 = vpop.f32.mrb[3].mxu0  ;;  %v589_v47 = vpop.f32.mrb[3].mxu1  ;;  %v312_v39 = vld [vmem:[#allocation2 + $0x30] sm:$0xff] }
 0x10c   : > { %v321_v46 = vld [vmem:[#allocation2 + $0x78] sm:$0xff] }
 0x10d   : > { %633 = vst.msk [vmem:[#allocation2 + $0x8] sm:$0xff] %vm289_vm0, %v616_v44  ;;  %641 = vst.msk [vmem:[#allocation2 + $0x48] sm:$0xff] %vm289_vm0, %v624_v45  ;;  %v313_v45 = vld [vmem:[#allocation2 + $0x38] sm:$0xff] }
 0x110   : > { %v560_v51 = vpop.f32.mrb[4].mxu0  ;;  %v592_v52 = vpop.f32.mrb[4].mxu1 }
 0x111   : > { %v617_v55 = vadd.f32 %v560_v51, %v308_v48  ;;  %v625_v56 = vadd.f32 %v592_v52, %v316_v49  ;;  %v562_v57 = vpop.f32.mrb[5].mxu0  ;;  %v594_v58 = vpop.f32.mrb[5].mxu1 }
 0x112   : > { %v651_v59 = vld [vmem:[#allocation2] sm:$0xff]  ;;  %v563_v61 = vpop.f32.mrb[6].mxu0  ;;  %v595_v62 = vpop.f32.mrb[6].mxu1 }
 0x113   : > { %v659_v60 = vld [vmem:[#allocation2 + $0x40] sm:$0xff]  ;;  %v674_v63 = vadd.f32 %v1553_v50, %v651_v59  ;;  %634 = vst.msk [vmem:[#allocation2 + $0x10] sm:$0xff] %vm289_vm0, %v617_v55  ;;  %642 = vst.msk [vmem:[#allocation2 + $0x50] sm:$0xff] %vm289_vm0, %v625_v56  ;;  %v618_v1 = vadd.f32 %v563_v61, %v309_v53  ;;  %v626_v2 = vadd.f32 %v595_v62, %v317_v54  ;;  %v565_v3 = vpop.f32.mrb[7].mxu0  ;;  %v597_v4 = vpop.f32.mrb[7].mxu1 }
 0x114   : > { %v682_v0 = vadd.f32 %v1553_v50, %v659_v60  ;;  %v652_v5 = vld [vmem:[#allocation2 + $0x8] sm:$0xff] }
 0x115   : > { %v660_v6 = vld [vmem:[#allocation2 + $0x48] sm:$0xff]  ;;  %v690_v7 = vmax.f32 %v674_v63, 0.0  ;;  %v675_v9 = vadd.f32 %v1553_v50, %v652_v5  ;;  %635 = vst.msk [vmem:[#allocation2 + $0x18] sm:$0xff] %vm289_vm0, %v618_v1  ;;  %643 = vst.msk [vmem:[#allocation2 + $0x58] sm:$0xff] %vm289_vm0, %v626_v2 }
 0x116   : > { %v698_v8 = vmax.f32 %v682_v0, 0.0  ;;  %v683_v10 = vadd.f32 %v1553_v50, %v660_v6 }
 0x117   : > { %706 = vst.msk [vmem:[%s1563_s12] sm:$0xff] %vm289_vm0, %v690_v7  ;;  %v691_v13 = vmax.f32 %v675_v9, 0.0 }
 0x118   : > { %714 = vst.msk [vmem:[%s1563_s12 + $0x40] sm:$0xff] %vm289_vm0, %v698_v8  ;;  %v699_v14 = vmax.f32 %v683_v10, 0.0  ;;  %v568_v15 = vpop.f32.mrb[8].mxu0  ;;  %v600_v16 = vpop.f32.mrb[8].mxu1 }
 0x119   : > { %707 = vst.msk [vmem:[%s1563_s12 + $0x8] sm:$0xff] %vm289_vm0, %v691_v13  ;;  %v619_v19 = vadd.f32 %v568_v15, %v310_v11  ;;  %v627_v20 = vadd.f32 %v600_v16, %v318_v12  ;;  %v570_v21 = vpop.f32.mrb[9].mxu0  ;;  %v602_v22 = vpop.f32.mrb[9].mxu1 }
 0x11a   : > { %715 = vst.msk [vmem:[%s1563_s12 + $0x48] sm:$0xff] %vm289_vm0, %v699_v14  ;;  %v653_v23 = vld [vmem:[#allocation2 + $0x10] sm:$0xff]  ;;  %v571_v25 = vpop.f32.mrb[10].mxu0  ;;  %v603_v26 = vpop.f32.mrb[10].mxu1 }
 0x11b   : > { %v661_v24 = vld [vmem:[#allocation2 + $0x50] sm:$0xff]  ;;  %v676_v27 = vadd.f32 %v1553_v50, %v653_v23  ;;  %636 = vst.msk [vmem:[#allocation2 + $0x20] sm:$0xff] %vm289_vm0, %v619_v19  ;;  %644 = vst.msk [vmem:[#allocation2 + $0x60] sm:$0xff] %vm289_vm0, %v627_v20  ;;  %v620_v29 = vadd.f32 %v571_v25, %v311_v17  ;;  %v628_v30 = vadd.f32 %v603_v26, %v319_v18  ;;  %v573_v31 = vpop.f32.mrb[11].mxu0  ;;  %v605_v32 = vpop.f32.mrb[11].mxu1 }
 0x11c   : > { %v684_v28 = vadd.f32 %v1553_v50, %v661_v24  ;;  %v654_v33 = vld [vmem:[#allocation2 + $0x18] sm:$0xff] }
 0x11d   : > { %v662_v34 = vld [vmem:[#allocation2 + $0x58] sm:$0xff]  ;;  %v692_v35 = vmax.f32 %v676_v27, 0.0  ;;  %v677_v37 = vadd.f32 %v1553_v50, %v654_v33  ;;  %637 = vst.msk [vmem:[#allocation2 + $0x28] sm:$0xff] %vm289_vm0, %v620_v29  ;;  %645 = vst.msk [vmem:[#allocation2 + $0x68] sm:$0xff] %vm289_vm0, %v628_v30 }
 0x11e   : > { %v700_v36 = vmax.f32 %v684_v28, 0.0  ;;  %v685_v38 = vadd.f32 %v1553_v50, %v662_v34 }
 0x11f   : > { %708 = vst.msk [vmem:[%s1563_s12 + $0x10] sm:$0xff] %vm289_vm0, %v692_v35  ;;  %v693_v41 = vmax.f32 %v677_v37, 0.0 }
 0x120   : > { %716 = vst.msk [vmem:[%s1563_s12 + $0x50] sm:$0xff] %vm289_vm0, %v700_v36  ;;  %v701_v42 = vmax.f32 %v685_v38, 0.0  ;;  %v576_v43 = vpop.f32.mrb[12].mxu0  ;;  %v608_v44 = vpop.f32.mrb[12].mxu1 }
 0x121   : > { %709 = vst.msk [vmem:[%s1563_s12 + $0x18] sm:$0xff] %vm289_vm0, %v693_v41  ;;  %v621_v47 = vadd.f32 %v576_v43, %v312_v39  ;;  %v629_v48 = vadd.f32 %v608_v44, %v320_v40  ;;  %v578_v49 = vpop.f32.mrb[13].mxu0  ;;  %v610_v51 = vpop.f32.mrb[13].mxu1 }
 0x122   : > { %717 = vst.msk [vmem:[%s1563_s12 + $0x58] sm:$0xff] %vm289_vm0, %v701_v42  ;;  %v655_v52 = vld [vmem:[#allocation2 + $0x20] sm:$0xff]  ;;  %v579_v54 = vpop.f32.mrb[14].mxu0  ;;  %v611_v55 = vpop.f32.mrb[14].mxu1 }
 0x123   : > { %v663_v53 = vld [vmem:[#allocation2 + $0x60] sm:$0xff]  ;;  %v678_v56 = vadd.f32 %v1553_v50, %v655_v52  ;;  %638 = vst.msk [vmem:[#allocation2 + $0x30] sm:$0xff] %vm289_vm0, %v621_v47  ;;  %646 = vst.msk [vmem:[#allocation2 + $0x70] sm:$0xff] %vm289_vm0, %v629_v48  ;;  %v622_v58 = vadd.f32 %v579_v54, %v313_v45  ;;  %v630_v59 = vadd.f32 %v611_v55, %v321_v46  ;;  %v581_v60 = vpop.f32.mrb[15].mxu0  ;;  %v613_v61 = vpop.f32.mrb[15].mxu1 }
 0x124   : > { %v686_v57 = vadd.f32 %v1553_v50, %v663_v53  ;;  %v656_v62 = vld [vmem:[#allocation2 + $0x28] sm:$0xff] }
 0x125   : > { %v664_v63 = vld [vmem:[#allocation2 + $0x68] sm:$0xff]  ;;  %v694_v0 = vmax.f32 %v678_v56, 0.0  ;;  %v679_v2 = vadd.f32 %v1553_v50, %v656_v62  ;;  %639 = vst.msk [vmem:[#allocation2 + $0x38] sm:$0xff] %vm289_vm0, %v622_v58  ;;  %647 = vst.msk [vmem:[#allocation2 + $0x78] sm:$0xff] %vm289_vm0, %v630_v59 }
 0x126   : > { %v702_v1 = vmax.f32 %v686_v57, 0.0  ;;  %v687_v3 = vadd.f32 %v1553_v50, %v664_v63 }
 0x127   : > { %710 = vst.msk [vmem:[%s1563_s12 + $0x20] sm:$0xff] %vm289_vm0, %v694_v0  ;;  %v695_v4 = vmax.f32 %v679_v2, 0.0 }
 0x128   : > { %718 = vst.msk [vmem:[%s1563_s12 + $0x60] sm:$0xff] %vm289_vm0, %v702_v1  ;;  %v703_v5 = vmax.f32 %v687_v3, 0.0 }
 0x129   : > { %711 = vst.msk [vmem:[%s1563_s12 + $0x28] sm:$0xff] %vm289_vm0, %v695_v4 }
 0x12a   : > { %719 = vst.msk [vmem:[%s1563_s12 + $0x68] sm:$0xff] %vm289_vm0, %v703_v5  ;;  %v657_v6 = vld [vmem:[#allocation2 + $0x30] sm:$0xff] }
 0x12b   : > { %v665_v7 = vld [vmem:[#allocation2 + $0x70] sm:$0xff]  ;;  %v680_v8 = vadd.f32 %v1553_v50, %v657_v6 }
 0x12c   : > { %v688_v9 = vadd.f32 %v1553_v50, %v665_v7  ;;  %v658_v10 = vld [vmem:[#allocation2 + $0x38] sm:$0xff]  ;;  %728 = sbr.rel (!%p1434_p3) target bundleno = 356 (0x164), region = 44 }
 0x12d   : > { %v666_v11 = vld [vmem:[#allocation2 + $0x78] sm:$0xff]  ;;  %v696_v12 = vmax.f32 %v680_v8, 0.0  ;;  %v681_v14 = vadd.f32 %v1553_v50, %v658_v10 }
 0x12e   : > { %v704_v13 = vmax.f32 %v688_v9, 0.0  ;;  %v689_v15 = vadd.f32 %v1553_v50, %v666_v11 }
 0x12f   : > { %712 = vst.msk [vmem:[%s1563_s12 + $0x30] sm:$0xff] %vm289_vm0, %v696_v12  ;;  %v697_v16 = vmax.f32 %v681_v14, 0.0 }
 0x130   : > { %720 = vst.msk [vmem:[%s1563_s12 + $0x70] sm:$0xff] %vm289_vm0, %v704_v13  ;;  %v705_v17 = vmax.f32 %v689_v15, 0.0 }
 0x131   : > { %713 = vst.msk [vmem:[%s1563_s12 + $0x38] sm:$0xff] %vm289_vm0, %v697_v16 }
 0x132   : > { %721 = vst.msk [vmem:[%s1563_s12 + $0x78] sm:$0xff] %vm289_vm0, %v705_v17 }
 0x133   : > { %s1737_s8 = smov (!%p731_p9, %s730_s8), 16 }
 0x134   : > { %s1095_s19 = sshll.u32 %s1737_s8, 7 }
 0x135   : > { %p1098_p10 = scmp.eq.s32.totalorder %s1095_s19, 0 }
 0x136   : > { %s1630_s21 = sshrl.u32 (!%p1098_p10), %s1737_s8, 4 }
 0x137   : > { %740 = sbr.rel (%p1098_p10) target bundleno = 356 (0x164), region = 48  ;;  %p1099_p11 = scmp.le.s32.totalorder (!%p1098_p10), %s1630_s21, 0 }
 0x13e   : > { %974 = sbr.rel (%p1099_p11) target bundleno = 335 (0x14f), region = 130  ;;  %s1727_s14 = smov (!%p1099_p11), %s1624_s17 }
 0x13f   : > { %s1728_s20 = smov (!%p1099_p11), %s1563_s12  ;;  %s1639_s29 = smov (!%p1099_p11), 0  }
 0x140   : > { %s1641_s23 = smov (!%p1099_p11), 0  }
 0x145 LB: >> { %v832_v50 = vld [vmem:[%s1353_s20] sm:$0xff]  ;;  %v834_v18 = vld [vmem:[%s1353_s20 + $0x8] sm:$0xff]  ;;  %v836_v19 = vld [vmem:[%s1353_s20 + $0x10] sm:$0xff]  ;;  %s864_s24 = sadd.s32 1, %s1357_s29  ;;  %s826_s23 = sadd.s32 1, %s1361_s23   ;;  %s1361_s23 = sphi %s1641_s23, %s826_s23   ;;  %s1357_s29 = sphi %s1639_s29, %s1729_s29   ;;  %s1353_s20 = sphi %s1728_s20, %s869_s20   ;;  %s1349_s14 = sphi %s1727_s14, %s870_s14  }
 0x146   : >> { %833 = vst [vmem:[%s1349_s14] sm:$0xff] %v832_v50  ;;  %835 = vst [vmem:[%s1349_s14 + $0x8] sm:$0xff] %v834_v18  ;;  %v838_v20 = vld [vmem:[%s1353_s20 + $0x18] sm:$0xff]  ;;  %v840_v21 = vld [vmem:[%s1353_s20 + $0x20] sm:$0xff]  ;;  %p865_p12 = scmp.ge.s32.totalorder %s864_s24, %s1630_s21  ;;  %p825_p13 = scmp.ge.s32.totalorder %s826_s23, %s1630_s21 }
 0x147   : >> { %837 = vst [vmem:[%s1349_s14 + $0x10] sm:$0xff] %v836_v19  ;;  %v842_v22 = vld [vmem:[%s1353_s20 + $0x28] sm:$0xff]  ;;  %839 = vst [vmem:[%s1349_s14 + $0x18] sm:$0xff] %v838_v20  ;;  %v844_v23 = vld [vmem:[%s1353_s20 + $0x30] sm:$0xff] }
 0x148   : >> { %841 = vst [vmem:[%s1349_s14 + $0x20] sm:$0xff] %v840_v21  ;;  %843 = vst [vmem:[%s1349_s14 + $0x28] sm:$0xff] %v842_v22  ;;  %v846_v24 = vld [vmem:[%s1353_s20 + $0x38] sm:$0xff]  ;;  %v848_v25 = vld [vmem:[%s1353_s20 + $0x40] sm:$0xff]  ;;  %s1739_s24 = smov (%p865_p12, %s864_s24), 0  ;;  %828 = sbr.rel (!%p825_p13) target bundleno = 325 (0x145), region = 136 }
 0x149   : >> { %845 = vst [vmem:[%s1349_s14 + $0x30] sm:$0xff] %v844_v23  ;;  %847 = vst [vmem:[%s1349_s14 + $0x38] sm:$0xff] %v846_v24  ;;  %v850_v26 = vld [vmem:[%s1353_s20 + $0x48] sm:$0xff]  ;;  %v852_v27 = vld [vmem:[%s1353_s20 + $0x50] sm:$0xff]  ;;  %s1100_s25 = sshll.u32 %s1739_s24, 7  ;;  %s1729_s29 = smov %s1739_s24 }
 0x14a   : >> { %849 = vst [vmem:[%s1349_s14 + $0x40] sm:$0xff] %v848_v25  ;;  %v854_v28 = vld [vmem:[%s1353_s20 + $0x58] sm:$0xff]  ;;  %851 = vst [vmem:[%s1349_s14 + $0x48] sm:$0xff] %v850_v26  ;;  %v856_v29 = vld [vmem:[%s1353_s20 + $0x60] sm:$0xff] }
 0x14b   : >> { %853 = vst [vmem:[%s1349_s14 + $0x50] sm:$0xff] %v852_v27  ;;  %855 = vst [vmem:[%s1349_s14 + $0x58] sm:$0xff] %v854_v28  ;;  %v858_v30 = vld [vmem:[%s1353_s20 + $0x68] sm:$0xff]  ;;  %v860_v31 = vld [vmem:[%s1353_s20 + $0x70] sm:$0xff] }
 0x14c   : >> { %857 = vst [vmem:[%s1349_s14 + $0x60] sm:$0xff] %v856_v29  ;;  %859 = vst [vmem:[%s1349_s14 + $0x68] sm:$0xff] %v858_v30  ;;  %v862_v32 = vld [vmem:[%s1353_s20 + $0x78] sm:$0xff]  ;;  %s869_s20 = scalar_lea.vmem %s1563_s12, %s1100_s25 [#allocation3]  }
 0x14d   : >> { %861 = vst [vmem:[%s1349_s14 + $0x70] sm:$0xff] %v860_v31  ;;  %863 = vst [vmem:[%s1349_s14 + $0x78] sm:$0xff] %v862_v32  ;;  %s870_s14 = scalar_lea.vmem %s1624_s17, %s1100_s25  }
 0x14f PF: > { %s1699_s26 = sand.u32 15, %s1737_s8   ;;  %s1112_s27 = sshll.u32 %s1630_s21, 7 }
 0x150   : > { %s875_s28 = scalar_lea.vmem %s1563_s12, %s1112_s27 [#allocation3]   ;;  %s877_s30 = scalar_lea.vmem %s1624_s17, %s1112_s27  }
 0x151   : > { %p1105_p0 = scmp.le.s32.totalorder %s1699_s26, 0 }
 0x152   : > { %s1363_s4 = smov (!%p1105_p0), %s877_s30   ;;  %s1367_s5 = smov (!%p1105_p0), %s875_s28  }
 0x153   : > { %988 = sbr.rel (%p1105_p0) target bundleno = 356 (0x164), region = 141  ;;  %s1371_s6 = smov (!%p1105_p0), 0  }
 0x154   : > { %s1375_s7 = smov (!%p1105_p0), 0  }
 0x15a LB: >> { %v887_v33 = vld [vmem:[%s1369_s5] sm:$0xff]  ;;  %s889_s8 = sadd.s32 1, %s1373_s6  ;;  %s881_s7 = sadd.s32 1, %s1377_s7   ;;  %s1377_s7 = sphi %s1375_s7, %s881_s7   ;;  %s1373_s6 = sphi %s1371_s6, %s1372_s6   ;;  %s1369_s5 = sphi %s1367_s5, %s894_s5   ;;  %s1365_s4 = sphi %s1363_s4, %s895_s4  }
 0x15b   : >> { %888 = vst [vmem:[%s1365_s4] sm:$0xff] %v887_v33  ;;  %p890_p1 = scmp.ge.s32.totalorder %s889_s8, %s1699_s26  ;;  %p880_p2 = scmp.ge.s32.totalorder %s881_s7, %s1699_s26 }
 0x15d   : >> { %s1741_s8 = smov (%p890_p1, %s889_s8), 0  ;;  %883 = sbr.rel (!%p880_p2) target bundleno = 346 (0x15a), region = 147 }
 0x15e   : >> { %s1106_s12 = sshll.u32 %s1741_s8, 3  ;;  %s1372_s6 = smov %s1741_s8  }
 0x15f   : >> { %s894_s5 = scalar_lea.vmem %s875_s28, %s1106_s12 [#allocation3]   ;;  %s895_s4 = scalar_lea.vmem %s877_s30, %s1106_s12  }
 0x164 PF: > { %s13_s16 = sadd.s32 1, %s1345_s16   ;;  %s1730_s12 = smov %s1333_s13 }
 0x165   : > { %p10_p3 = scmp.ge.s32.totalorder %s13_s16, 6   ;;  %s1731_s13 = smov %s1443_s22 }
 0x166   : > { %s1732_s14 = smov %s1341_s15  ;;  %s1733_s15 = smov %s1735_s18 }
 0x167   :  { %12 = sbr.rel (!%p10_p3) target bundleno = 3 (0x3), region = 158 }

// kernel: forward.7
= control target key start
LH: loop header
LB: loop body
LE: loop exit
PB: predicated region body
PF: predicated region fallthrough
CT: control target
= control target key end

     0   :  { %v1252_v1 = vmov 0.0   ;;  %vm1253_vm0 = vmmov 0   ;;  %vm539_vm1 = vcmask 523264   ;;  %s1592_s1 = inlined_call_operand.vmem [shape: bf16[576,128], index: 1, kind: input, shape index: {}]   ;;  %s1593_s0 = inlined_call_operand.vmem [shape: bf16[98,576], index: 0, kind: input, shape index: {}]   ;;  %s1594_s2 = inlined_call_operand.vmem [shape: f32[1,128], index: 2, kind: input, shape index: {}]   ;;  %s1595_s3 = inlined_call_operand.vmem [shape: f32[98,128], index: 3, kind: output, shape index: {}]  }
   0x1   :  { %v1169_v0 = vld [vmem:[%s1592_s1 + $0x40] sm:$0xff]   ;;  %31 = vst [vmem:[#allocation2 + $0x60] sm:$0x3] %v1252_v1  ;;  %v1173_v5 = vld [vmem:[%s1592_s1 + $0x48] sm:$0xff]   ;;  %v1177_v9 = vld [vmem:[%s1592_s1 + $0x50] sm:$0xff]  }
   0x2   :  { %v1170_v2 = vld [vmem:[%s1592_s1 + $0xc0] sm:$0xff]   ;;  %996 = vmatprep.subr.bf16.mxu0 %v1169_v0  ;;  %v1174_v6 = vld [vmem:[%s1592_s1 + $0xc8] sm:$0xff]   ;;  %v1178_v10 = vld [vmem:[%s1592_s1 + $0xd0] sm:$0xff]  }
   0x3   :  { %v1171_v3 = vld [vmem:[%s1592_s1] sm:$0xff]   ;;  %1054 = vmatprep.subr.bf16.mxu1 %v1170_v2  ;;  %v1175_v7 = vld [vmem:[%s1592_s1 + $0x8] sm:$0xff]   ;;  %v1179_v11 = vld [vmem:[%s1592_s1 + $0x10] sm:$0xff]  }
   0x4   :  { %v1172_v4 = vld [vmem:[%s1592_s1 + $0x80] sm:$0xff]   ;;  %997 = vmatpush3.bf16.msra.mxu0 %v1171_v3  ;;  %v1176_v8 = vld [vmem:[%s1592_s1 + $0x88] sm:$0xff]   ;;  %v1180_v12 = vld [vmem:[%s1592_s1 + $0x90] sm:$0xff]  }
   0x5   :  { %1055 = vmatpush3.bf16.msra.mxu1 %v1172_v4  ;;  %998 = vmatprep.subr.bf16.mxu0 %v1173_v5  ;;  %v1181_v13 = vld [vmem:[%s1592_s1 + $0x58] sm:$0xff]   ;;  %v1185_v17 = vld [vmem:[%s1592_s1 + $0x60] sm:$0xff]   ;;  %v1189_v21 = vld [vmem:[%s1592_s1 + $0x68] sm:$0xff]  }
   0x6   :  { %1056 = vmatprep.subr.bf16.mxu1 %v1174_v6  ;;  %v1182_v14 = vld [vmem:[%s1592_s1 + $0xd8] sm:$0xff]   ;;  %v1186_v18 = vld [vmem:[%s1592_s1 + $0xe0] sm:$0xff]   ;;  %v1190_v22 = vld [vmem:[%s1592_s1 + $0xe8] sm:$0xff]  }
   0x7   :  { %v1183_v15 = vld [vmem:[%s1592_s1 + $0x18] sm:$0xff]   ;;  %v1187_v19 = vld [vmem:[%s1592_s1 + $0x20] sm:$0xff]   ;;  %v1191_v23 = vld [vmem:[%s1592_s1 + $0x28] sm:$0xff]  }
   0x8   :  { %999 = vmatpush3.bf16.msra.mxu0 %v1175_v7  ;;  %v1184_v16 = vld [vmem:[%s1592_s1 + $0x98] sm:$0xff]   ;;  %v1188_v20 = vld [vmem:[%s1592_s1 + $0xa0] sm:$0xff]   ;;  %v1192_v24 = vld [vmem:[%s1592_s1 + $0xa8] sm:$0xff]  }
   0x9   :  { %1057 = vmatpush3.bf16.msra.mxu1 %v1176_v8  ;;  %1000 = vmatprep.subr.bf16.mxu0 %v1177_v9  ;;  %v1193_v25 = vld [vmem:[%s1592_s1 + $0x70] sm:$0xff]   ;;  %v1197_v29 = vld [vmem:[%s1592_s1 + $0x78] sm:$0xff]   ;;  %v1206_v36 = vld [vmem:[%s1593_s0 + $0xc] ss:$20 sps:$4 sm:$0xff]  }
   0xa   :  { %1058 = vmatprep.subr.bf16.mxu1 %v1178_v10  ;;  %v1194_v26 = vld [vmem:[%s1592_s1 + $0xf0] sm:$0xff]   ;;  %v1198_v30 = vld [vmem:[%s1592_s1 + $0xf8] sm:$0xff]   ;;  %v1207_v37 = vld [vmem:[%s1592_s1 + $0x100] sm:$0xff]   ;;  %681 = vmatprep.mubr.bf16.mxu1 %v1206_v36 }
   0xb   :  { %v1195_v27 = vld [vmem:[%s1592_s1 + $0x30] sm:$0xff]   ;;  %v1199_v31 = vld [vmem:[%s1592_s1 + $0x38] sm:$0xff]   ;;  %v1208_v38 = vld [vmem:[%s1593_s0 + $0x2c] ss:$20 sps:$4 sm:$0xff]  }
   0xc   :  { %1001 = vmatpush3.bf16.msra.mxu0 %v1179_v11  ;;  %v1196_v28 = vld [vmem:[%s1592_s1 + $0xb0] sm:$0xff]   ;;  %v1200_v32 = vld [vmem:[%s1592_s1 + $0xb8] sm:$0xff]   ;;  %v1218_v43 = vld [vmem:[%s1592_s1 + $0x108] sm:$0xff]  }
   0xd   :  { %1059 = vmatpush3.bf16.msra.mxu1 %v1180_v12  ;;  %1002 = vmatprep.subr.bf16.mxu0 %v1181_v13  ;;  %v1201_v33 = vld [vmem:[%s1593_s0] ss:$20 sps:$4 sm:$0xff]   ;;  %v1203_v34 = vld [vmem:[%s1593_s0 + $0x4] ss:$20 sps:$4 sm:$0xff]   ;;  %v1204_v35 = vld [vmem:[%s1593_s0 + $0x8] ss:$20 sps:$4 sm:$0xff]  }
   0xe   :  { %1060 = vmatprep.subr.bf16.mxu1 %v1182_v14  ;;  %593 = vmatprep.mubr.bf16.mxu0 %v1203_v34  ;;  %v1210_v39 = vld [vmem:[%s1593_s0 + $0x34] ss:$20 sps:$4 sm:$0xff]   ;;  %v1213_v41 = vld [vmem:[%s1593_s0 + $0x30] ss:$20 sps:$4 sm:$0xff]   ;;  %v1220_v47 = vld [vmem:[%s1593_s0 + $0x58] ss:$20 sps:$4 sm:$0xff]  }
   0xf   :  { %v1212_v40 = vld [vmem:[%s1593_s0 + $0x28] ss:$20 sps:$4 sm:$0xff]   ;;  %v1227_v45 = vld [vmem:[%s1592_s1 + $0x110] sm:$0xff]   ;;  %v1223_v49 = vld [vmem:[%s1593_s0 + $0x84] ss:$20 sps:$4 sm:$0xff]  }
  0x10   :  { %1003 = vmatpush3.bf16.msra.mxu0 %v1183_v15  ;;  %v1214_v42 = vld [vmem:[%s1593_s0 + $0x54] ss:$20 sps:$4 sm:$0xff]   ;;  %v1216_v44 = vld [vmem:[%s1593_s0 + $0x5c] ss:$20 sps:$4 sm:$0xff]   ;;  %v1225_v51 = vld [vmem:[%s1593_s0 + $0x78] ss:$20 sps:$4 sm:$0xff]  }
  0x11   :  { %1061 = vmatpush3.bf16.msra.mxu1 %v1184_v16  ;;  %1004 = vmatprep.subr.bf16.mxu0 %v1185_v17  ;;  %v1219_v46 = vld [vmem:[%s1593_s0 + $0x50] ss:$20 sps:$4 sm:$0xff]   ;;  %v1240_v50 = vld [vmem:[%s1592_s1 + $0x118] sm:$0xff]   ;;  %v1226_v52 = vld [vmem:[%s1593_s0 + $0x80] ss:$20 sps:$4 sm:$0xff]  }
  0x12   :  { %1062 = vmatprep.subr.bf16.mxu1 %v1186_v18  ;;  %v1221_v48 = vld [vmem:[%s1593_s0 + $0x7c] ss:$20 sps:$4 sm:$0xff]   ;;  %v1228_v53 = vld [vmem:[%s1593_s0 + $0xa4] ss:$20 sps:$4 sm:$0xff]   ;;  %v1230_v54 = vld [vmem:[%s1593_s0 + $0xac] ss:$20 sps:$4 sm:$0xff]  }
  0x13   :  { %v1232_v55 = vld [vmem:[%s1593_s0 + $0xa0] ss:$20 sps:$4 sm:$0xff]   ;;  %v1233_v56 = vld [vmem:[%s1593_s0 + $0xa8] ss:$20 sps:$4 sm:$0xff]   ;;  %v1239_v62 = vld [vmem:[%s1593_s0 + $0xd0] ss:$20 sps:$4 sm:$0xff]  }
  0x14   :  { %1005 = vmatpush3.bf16.msra.mxu0 %v1187_v19  ;;  %v1234_v57 = vld [vmem:[%s1593_s0 + $0xcc] ss:$20 sps:$4 sm:$0xff]   ;;  %v1236_v58 = vld [vmem:[%s1593_s0 + $0xd4] ss:$20 sps:$4 sm:$0xff]   ;;  %v82_v60 = vld [vmem:[%s1593_s0 + $0xf8] sm:$0x11] }
  0x15   :  { %1063 = vmatpush3.bf16.msra.mxu1 %v1188_v20  ;;  %1006 = vmatprep.subr.bf16.mxu0 %v1189_v21  ;;  %v81_v59 = vld [vmem:[%s1593_s0 + $0xf0] sm:$0x11]  ;;  %v1238_v61 = vld [vmem:[%s1593_s0 + $0xc8] ss:$20 sps:$4 sm:$0xff]   ;;  %v950_v0 = vcombine.high %v82_v60, %v82_v60  ;;  %v949_v3 = vcombine.low %v82_v60, %v82_v60  ;;  %v1247_v6 = vld [vmem:[%s1593_s0 + $0x38] ss:$20 sps:$4 sm:$0xff]  }
  0x16   :  { %1064 = vmatprep.subr.bf16.mxu1 %v1190_v22  ;;  %v948_v63 = vcombine.high %v81_v59, %v81_v59  ;;  %v947_v2 = vcombine.low %v81_v59, %v81_v59  ;;  %v1245_v4 = vld [vmem:[%s1593_s0 + $0x10] ss:$20 sps:$4 sm:$0xff]   ;;  %v1248_v7 = vld [vmem:[%s1593_s0 + $0xd8] ss:$20 sps:$4 sm:$0xff]   ;;  %v1249_v8 = vld [vmem:[%s1593_s0 + $0x60] ss:$20 sps:$4 sm:$0xff]  }
  0x17   :  { %v1246_v5 = vld [vmem:[%s1593_s0 + $0xb0] ss:$20 sps:$4 sm:$0xff]   ;;  %v1250_v9 = vld [vmem:[%s1593_s0 + $0x100] ss:$0 sps:$4 sm:$0x11]  }
  0x18   :  { %1007 = vmatpush3.bf16.msra.mxu0 %v1191_v23  ;;  %v1251_v10 = vld [vmem:[%s1593_s0 + $0x88] ss:$20 sps:$4 sm:$0xff]  }
  0x19   :  { %1065 = vmatpush3.bf16.msra.mxu1 %v1192_v24  ;;  %1008 = vmatprep.subr.bf16.mxu0 %v1193_v25 }
  0x1a   :  { %1066 = vmatprep.subr.bf16.mxu1 %v1194_v26 }
  0x1c   :  { %1009 = vmatpush3.bf16.msra.mxu0 %v1195_v27 }
  0x1d   :  { %1067 = vmatpush3.bf16.msra.mxu1 %v1196_v28  ;;  %1010 = vmatprep.subr.bf16.mxu0 %v1197_v29 }
  0x1e   :  { %1068 = vmatprep.subr.bf16.mxu1 %v1198_v30 }
  0x20   :  { %1011 = vmatpush3.bf16.msra.mxu0 %v1199_v31 }
  0x21   :  { %1069 = vmatpush3.bf16.msra.mxu1 %v1200_v32  ;;  %1123 = vmatprep.subr.bf16.mxu0 %v1252_v1 }
  0x22   :  { %1159 = vmatprep.subr.bf16.mxu1 %v1252_v1 }
  0x23   :  { %594 = vmatmul.mubr.bf16.vlgmr.msra.gmra.mrb[0].mxu0 %v1201_v33 }
  0x24   :  { %682 = vmatmul.mubr.bf16.vlgmr.msra.gmra.mrb[0].mxu1 %v1204_v35  ;;  %1124 = vmatpush3.bf16.msra.mxu0 %v1207_v37 }
  0x25   :  { %601 = vmatprep.mubr.bf16.mxu0 %v1208_v38  ;;  %1163 = vmatpush3.bf16.msra.mxu1 %v1207_v37 }
  0x26   :  { %689 = vmatprep.mubr.bf16.mxu1 %v1210_v39  ;;  %1125 = vmatprep.subr.bf16.mxu0 %v1252_v1 }
  0x27   :  { %1160 = vmatprep.subr.bf16.mxu1 %v1252_v1 }
  0x28   :  { %1126 = vmatpush3.bf16.msra.mxu0 %v1218_v43 }
  0x29   :  { %1164 = vmatpush3.bf16.msra.mxu1 %v1218_v43  ;;  %1127 = vmatprep.subr.bf16.mxu0 %v1252_v1 }
  0x2a   :  { %1161 = vmatprep.subr.bf16.mxu1 %v1252_v1 }
  0x2b   :  { %602 = vmatmul.mubr.bf16.gmra.mrb[4].mxu0 %v1212_v40 }
  0x2c   :  { %690 = vmatmul.mubr.bf16.gmra.mrb[4].mxu1 %v1213_v41  ;;  %609 = vmatprep.mubr.bf16.mxu0 %v1214_v42 }
  0x2d   :  { %697 = vmatprep.mubr.bf16.mxu1 %v1216_v44  ;;  %1128 = vmatpush3.bf16.msra.mxu0 %v1227_v45 }
  0x2e   :  { %1165 = vmatpush3.bf16.msra.mxu1 %v1227_v45  ;;  %1129 = vmatprep.subr.bf16.mxu0 %v1252_v1 }
  0x2f   :  { %1162 = vmatprep.subr.bf16.mxu1 %v1252_v1 }
  0x31   :  { %1130 = vmatpush3.bf16.msra.mxu0 %v1240_v50 }
  0x32   :  { %1166 = vmatpush3.bf16.msra.mxu1 %v1240_v50 }
  0x33   :  { %610 = vmatmul.mubr.bf16.gmra.mrb[8].mxu0 %v1219_v46 }
  0x34   :  { %698 = vmatmul.mubr.bf16.gmra.mrb[8].mxu1 %v1220_v47  ;;  %617 = vmatprep.mubr.bf16.mxu0 %v1221_v48 }
  0x35   :  { %705 = vmatprep.mubr.bf16.mxu1 %v1223_v49 }
  0x3b   :  { %618 = vmatmul.mubr.bf16.gmra.mrb[12].mxu0 %v1225_v51 }
  0x3c   :  { %706 = vmatmul.mubr.bf16.gmra.mrb[12].mxu1 %v1226_v52  ;;  %625 = vmatprep.mubr.bf16.mxu0 %v1228_v53 }
  0x3d   :  { %713 = vmatprep.mubr.bf16.mxu1 %v1230_v54 }
  0x43   :  { %626 = vmatmul.mubr.bf16.gmra.mrb[16].mxu0 %v1232_v55 }
  0x44   :  { %714 = vmatmul.mubr.bf16.gmra.mrb[16].mxu1 %v1233_v56  ;;  %633 = vmatprep.mubr.bf16.mxu0 %v1234_v57 }
  0x45   :  { %721 = vmatprep.mubr.bf16.mxu1 %v1236_v58 }
  0x4b   :  { %634 = vmatmul.mubr.bf16.gmra.mrb[20].mxu0 %v1238_v61 }
  0x4c   :  { %722 = vmatmul.mubr.bf16.gmra.mrb[20].mxu1 %v1239_v62  ;;  %641 = vmatprep.mubr.bf16.mxu0 %v948_v63 }
  0x4d   :  { %729 = vmatprep.mubr.bf16.mxu1 %v950_v0 }
  0x53   :  { %642 = vmatmul.mubr.bf16.gmra.mrb[24].mxu0 %v947_v2 }
  0x54   :  { %730 = vmatmul.mubr.bf16.gmra.mrb[24].mxu1 %v949_v3  ;;  %1131 = vmatprep.mubr.msk.bf16.mxu0 %vm1253_vm0, %v1252_v1 }
  0x55   :  { %1147 = vmatprep.mubr.msk.bf16.mxu1 %vm1253_vm0, %v1252_v1 }
  0x5b   :  { %1132 = vmatmul.mubr.msk.bf16.vlgmr.msra.gmra.mrb[28].mxu0 %vm539_vm1, %v1245_v4 }
  0x5c   :  { %1148 = vmatmul.mubr.msk.bf16.vlgmr.msra.gmra.mrb[28].mxu1 %vm539_vm1, %v1246_v5  ;;  %1135 = vmatprep.mubr.msk.bf16.mxu0 %vm1253_vm0, %v1252_v1 }
  0x5d   :  { %1151 = vmatprep.mubr.msk.bf16.mxu1 %vm1253_vm0, %v1252_v1 }
  0x63   :  { %1136 = vmatmul.mubr.msk.bf16.gmra.mrb[32].mxu0 %vm539_vm1, %v1247_v6 }
  0x64   :  { %1152 = vmatmul.mubr.msk.bf16.gmra.mrb[32].mxu1 %vm539_vm1, %v1248_v7  ;;  %1139 = vmatprep.mubr.msk.bf16.mxu0 %vm1253_vm0, %v1252_v1 }
  0x65   :  { %1155 = vmatprep.mubr.msk.bf16.mxu1 %vm1253_vm0, %v1252_v1 }
  0x6b   :  { %1140 = vmatmul.mubr.msk.bf16.gmra.mrb[36].mxu0 %vm539_vm1, %v1249_v8 }
  0x6c   :  { %1156 = vmatmul.mubr.msk.bf16.gmra.mrb[36].mxu1 %vm539_vm1, %v1250_v9  ;;  %1143 = vmatprep.mubr.msk.bf16.mxu0 %vm1253_vm0, %v1252_v1 }
  0x73   :  { %1144 = vmatmul.mubr.msk.bf16.gmra.mrb[40].mxu0 %vm539_vm1, %v1251_v10 }
  0xf6   :  { %v1012_v11 = vpop.f32.mrb[0].mxu0 }
  0xf7   :  { %v1070_v12 = vpop.f32.mrb[0].mxu1  ;;  %v1013_v13 = vpop.f32.mrb[1].mxu0 }
  0xf8   :  { %v1014_v14 = vadd.f32 %v1013_v13, %v1012_v11  ;;  %v1071_v15 = vpop.f32.mrb[1].mxu1  ;;  %v1015_v16 = vpop.f32.mrb[2].mxu0 }
  0xf9   :  { %v1072_v17 = vadd.f32 %v1071_v15, %v1070_v12  ;;  %v1073_v18 = vpop.f32.mrb[2].mxu1  ;;  %v1016_v19 = vpop.f32.mrb[3].mxu0 }
  0xfa   :  { %v1017_v20 = vadd.f32 %v1016_v19, %v1015_v16  ;;  %v1074_v21 = vpop.f32.mrb[3].mxu1 }
  0xfb   :  { %v1075_v22 = vadd.f32 %v1074_v21, %v1073_v18  ;;  %v1511_v23 = vadd.f32 %v1072_v17, %v1014_v14 }
  0xfd   :  { %v1513_v1 = vadd.f32 %v1075_v22, %v1017_v20 }
  0xfe   :  { %v1018_v24 = vpop.f32.mrb[4].mxu0 }
  0xff   :  { %v1076_v25 = vpop.f32.mrb[4].mxu1  ;;  %v1019_v26 = vpop.f32.mrb[5].mxu0 }
 0x100   :  { %v1020_v27 = vadd.f32 %v1019_v26, %v1018_v24  ;;  %v1077_v28 = vpop.f32.mrb[5].mxu1  ;;  %v1021_v29 = vpop.f32.mrb[6].mxu0 }
 0x101   :  { %v1078_v30 = vadd.f32 %v1077_v28, %v1076_v25  ;;  %v1079_v31 = vpop.f32.mrb[6].mxu1  ;;  %v1022_v32 = vpop.f32.mrb[7].mxu0 }
 0x102   :  { %v1023_v33 = vadd.f32 %v1022_v32, %v1021_v29  ;;  %v1080_v34 = vpop.f32.mrb[7].mxu1 }
 0x103   :  { %v1081_v35 = vadd.f32 %v1080_v34, %v1079_v31  ;;  %v1515_v36 = vadd.f32 %v1078_v30, %v1020_v27 }
 0x105   :  { %v1517_v37 = vadd.f32 %v1081_v35, %v1023_v33 }
 0x106   :  { %v1024_v38 = vpop.f32.mrb[8].mxu0 }
 0x107   :  { %v1082_v39 = vpop.f32.mrb[8].mxu1  ;;  %v1025_v40 = vpop.f32.mrb[9].mxu0 }
 0x108   :  { %v1026_v41 = vadd.f32 %v1025_v40, %v1024_v38  ;;  %v1083_v42 = vpop.f32.mrb[9].mxu1  ;;  %v1027_v43 = vpop.f32.mrb[10].mxu0 }
 0x109   :  { %v1084_v44 = vadd.f32 %v1083_v42, %v1082_v39  ;;  %v1085_v45 = vpop.f32.mrb[10].mxu1  ;;  %v1028_v46 = vpop.f32.mrb[11].mxu0 }
 0x10a   :  { %v1029_v47 = vadd.f32 %v1028_v46, %v1027_v43  ;;  %v1086_v48 = vpop.f32.mrb[11].mxu1 }
 0x10b   :  { %v1087_v49 = vadd.f32 %v1086_v48, %v1085_v45  ;;  %v1519_v50 = vadd.f32 %v1084_v44, %v1026_v41 }
 0x10d   :  { %v1521_v51 = vadd.f32 %v1087_v49, %v1029_v47  ;;  %v1531_v49 = vld [vmem:[%s1594_s2] ss:$0 sm:$0xff] }
 0x10e   :  { %v1030_v52 = vpop.f32.mrb[12].mxu0 }
 0x10f   :  { %v1088_v53 = vpop.f32.mrb[12].mxu1  ;;  %v1031_v54 = vpop.f32.mrb[13].mxu0 }
 0x110   :  { %v1032_v55 = vadd.f32 %v1031_v54, %v1030_v52  ;;  %v1089_v56 = vpop.f32.mrb[13].mxu1  ;;  %v1033_v57 = vpop.f32.mrb[14].mxu0 }
 0x111   :  { %v1090_v58 = vadd.f32 %v1089_v56, %v1088_v53  ;;  %v1091_v59 = vpop.f32.mrb[14].mxu1  ;;  %v1034_v60 = vpop.f32.mrb[15].mxu0 }
 0x112   :  { %v1035_v61 = vadd.f32 %v1034_v60, %v1033_v57  ;;  %v1092_v62 = vpop.f32.mrb[15].mxu1 }
 0x113   :  { %v1093_v63 = vadd.f32 %v1092_v62, %v1091_v59  ;;  %v1523_v0 = vadd.f32 %v1090_v58, %v1032_v55 }
 0x115   :  { %v1525_v2 = vadd.f32 %v1093_v63, %v1035_v61 }
 0x116   :  { %v1036_v3 = vpop.f32.mrb[16].mxu0 }
 0x117   :  { %v1094_v4 = vpop.f32.mrb[16].mxu1  ;;  %v1037_v5 = vpop.f32.mrb[17].mxu0 }
 0x118   :  { %v1038_v6 = vadd.f32 %v1037_v5, %v1036_v3  ;;  %v1095_v7 = vpop.f32.mrb[17].mxu1  ;;  %v1039_v8 = vpop.f32.mrb[18].mxu0 }
 0x119   :  { %v1096_v9 = vadd.f32 %v1095_v7, %v1094_v4  ;;  %v1097_v10 = vpop.f32.mrb[18].mxu1  ;;  %v1040_v11 = vpop.f32.mrb[19].mxu0 }
 0x11a   :  { %v1041_v12 = vadd.f32 %v1040_v11, %v1039_v8  ;;  %v1098_v13 = vpop.f32.mrb[19].mxu1 }
 0x11b   :  { %v1099_v14 = vadd.f32 %v1098_v13, %v1097_v10  ;;  %v716_v15 = vadd.f32 %v1096_v9, %v1038_v6 }
 0x11d   :  { %v719_v16 = vadd.f32 %v1099_v14, %v1041_v12 }
 0x11e   :  { %v1042_v17 = vpop.f32.mrb[20].mxu0 }
 0x11f   :  { %v1100_v18 = vpop.f32.mrb[20].mxu1  ;;  %v1043_v19 = vpop.f32.mrb[21].mxu0 }
 0x120   :  { %v1044_v20 = vadd.f32 %v1043_v19, %v1042_v17  ;;  %v1101_v21 = vpop.f32.mrb[21].mxu1  ;;  %v1045_v22 = vpop.f32.mrb[22].mxu0 }
 0x121   :  { %v1102_v24 = vadd.f32 %v1101_v21, %v1100_v18  ;;  %v1103_v25 = vpop.f32.mrb[22].mxu1  ;;  %v1046_v26 = vpop.f32.mrb[23].mxu0 }
 0x122   :  { %v1047_v27 = vadd.f32 %v1046_v26, %v1045_v22  ;;  %v1104_v28 = vpop.f32.mrb[23].mxu1 }
 0x123   :  { %v1105_v29 = vadd.f32 %v1104_v28, %v1103_v25  ;;  %v724_v30 = vadd.f32 %v1102_v24, %v1044_v20  ;;  %v44_v25 = vld [vmem:[#allocation2 + $0x60] sm:$0x3] }
 0x125   :  { %v727_v31 = vadd.f32 %v1105_v29, %v1047_v27 }
 0x126   :  { %v1048_v32 = vpop.f32.mrb[24].mxu0 }
 0x127   :  { %v1106_v33 = vpop.f32.mrb[24].mxu1  ;;  %v1049_v34 = vpop.f32.mrb[25].mxu0 }
 0x128   :  { %v1050_v35 = vadd.f32 %v1049_v34, %v1048_v32  ;;  %v1107_v38 = vpop.f32.mrb[25].mxu1  ;;  %v1051_v39 = vpop.f32.mrb[26].mxu0 }
 0x129   :  { %v1108_v40 = vadd.f32 %v1107_v38, %v1106_v33  ;;  %v1052_v41 = vpop.f32.mrb[27].mxu0  ;;  %v1109_v42 = vpop.f32.mrb[26].mxu1 }
 0x12a   :  { %v1110_v43 = vpop.f32.mrb[27].mxu1 }
 0x12b   :  { %v732_v44 = vadd.f32 %v1108_v40, %v1050_v35 }
 0x12e   :  { %v771_v45 = vpop.f32.mrb[28].mxu0 }
 0x12f   :  { %v772_v46 = vadd.f32 %v771_v45, %v1511_v23  ;;  %v803_v47 = vpop.f32.mrb[28].mxu1  ;;  %v1133_v48 = vpop.f32.mrb[29].mxu0 }
 0x130   :  { %v804_v52 = vadd.f32 %v803_v47, %v716_v15  ;;  %v1149_v53 = vpop.f32.mrb[29].mxu1  ;;  %v774_v54 = vpop.f32.mrb[30].mxu0 }
 0x131   :  { %v775_v55 = vadd.f32 %v774_v54, %v1513_v1  ;;  %v806_v56 = vpop.f32.mrb[30].mxu1  ;;  %v1134_v57 = vpop.f32.mrb[31].mxu0  ;;  %v874_v60 = vadd.f32 %v1531_v49, %v772_v46 }
 0x132   :  { %v807_v58 = vadd.f32 %v806_v56, %v719_v16  ;;  %v1150_v59 = vpop.f32.mrb[31].mxu1  ;;  %v882_v23 = vadd.f32 %v1531_v49, %v804_v52 }
 0x133   :  { %v887_v61 = vmax.f32 %v874_v60, 0.0  ;;  %v875_v62 = vadd.f32 %v1531_v49, %v775_v55 }
 0x134   :  { %v895_v63 = vmax.f32 %v882_v23, 0.0  ;;  %v883_v3 = vadd.f32 %v1531_v49, %v807_v58 }
 0x135   :  { %900 = vst [vmem:[%s1595_s3] sm:$0xff] %v887_v61  ;;  %v888_v1 = vmax.f32 %v875_v62, 0.0 }
 0x136   :  { %v779_v4 = vpop.f32.mrb[32].mxu0  ;;  %908 = vst [vmem:[%s1595_s3 + $0x40] sm:$0xff] %v895_v63  ;;  %v896_v8 = vmax.f32 %v883_v3, 0.0 }
 0x137   :  { %v780_v5 = vadd.f32 %v779_v4, %v1515_v36  ;;  %v811_v6 = vpop.f32.mrb[32].mxu1  ;;  %v1137_v7 = vpop.f32.mrb[33].mxu0  ;;  %901 = vst [vmem:[%s1595_s3 + $0x8] sm:$0xff] %v888_v1 }
 0x138   :  { %v812_v9 = vadd.f32 %v811_v6, %v724_v30  ;;  %v1153_v10 = vpop.f32.mrb[33].mxu1  ;;  %v782_v11 = vpop.f32.mrb[34].mxu0  ;;  %909 = vst [vmem:[%s1595_s3 + $0x48] sm:$0xff] %v896_v8 }
 0x139   :  { %v783_v12 = vadd.f32 %v782_v11, %v1517_v37  ;;  %v814_v13 = vpop.f32.mrb[34].mxu1  ;;  %v1138_v14 = vpop.f32.mrb[35].mxu0  ;;  %v876_v16 = vadd.f32 %v1531_v49, %v780_v5 }
 0x13a   :  { %v815_v36 = vadd.f32 %v814_v13, %v727_v31  ;;  %v1154_v15 = vpop.f32.mrb[35].mxu1  ;;  %v884_v17 = vadd.f32 %v1531_v49, %v812_v9 }
 0x13b   :  { %v889_v18 = vmax.f32 %v876_v16, 0.0  ;;  %v877_v19 = vadd.f32 %v1531_v49, %v783_v12 }
 0x13c   :  { %v897_v20 = vmax.f32 %v884_v17, 0.0  ;;  %v885_v21 = vadd.f32 %v1531_v49, %v815_v36 }
 0x13d   :  { %902 = vst [vmem:[%s1595_s3 + $0x10] sm:$0xff] %v889_v18  ;;  %v890_v37 = vmax.f32 %v877_v19, 0.0 }
 0x13e   :  { %v787_v22 = vpop.f32.mrb[36].mxu0  ;;  %910 = vst [vmem:[%s1595_s3 + $0x50] sm:$0xff] %v897_v20  ;;  %v898_v28 = vmax.f32 %v885_v21, 0.0 }
 0x13f   :  { %v788_v24 = vadd.f32 %v787_v22, %v1519_v50  ;;  %v819_v26 = vpop.f32.mrb[36].mxu1  ;;  %v1141_v27 = vpop.f32.mrb[37].mxu0  ;;  %903 = vst [vmem:[%s1595_s3 + $0x18] sm:$0xff] %v890_v37 }
 0x140   :  { %v820_v29 = vadd.f32 %v819_v26, %v732_v44  ;;  %v790_v30 = vpop.f32.mrb[38].mxu0  ;;  %v1157_v31 = vpop.f32.mrb[37].mxu1  ;;  %911 = vst [vmem:[%s1595_s3 + $0x58] sm:$0xff] %v898_v28 }
 0x141   :  { %v791_v32 = vadd.f32 %v790_v30, %v1521_v51  ;;  %v1142_v33 = vpop.f32.mrb[39].mxu0  ;;  %v822_v34 = vpop.f32.mrb[38].mxu1  ;;  %v878_v38 = vadd.f32 %v1531_v49, %v788_v24 }
 0x142   :  { %v837_v50 = vadd.f32 %v820_v29, %v44_v25  ;;  %v1158_v35 = vpop.f32.mrb[39].mxu1 }
 0x143   :  { %v891_v39 = vmax.f32 %v878_v38, 0.0  ;;  %v879_v40 = vadd.f32 %v1531_v49, %v791_v32 }
 0x144   :  { %850 = vst [vmem:[#allocation2 + $0x60] sm:$0x3] %v837_v50 }
 0x145   :  { %904 = vst [vmem:[%s1595_s3 + $0x20] sm:$0xff] %v891_v39  ;;  %v892_v51 = vmax.f32 %v879_v40, 0.0 }
 0x146   :  { %v795_v41 = vpop.f32.mrb[40].mxu0 }
 0x147   :  { %v796_v42 = vadd.f32 %v795_v41, %v1523_v0  ;;  %v1145_v43 = vpop.f32.mrb[41].mxu0  ;;  %905 = vst [vmem:[%s1595_s3 + $0x28] sm:$0xff] %v892_v51 }
 0x148   :  { %v798_v44 = vpop.f32.mrb[42].mxu0 }
 0x149   :  { %v799_v45 = vadd.f32 %v798_v44, %v1525_v2  ;;  %v1146_v46 = vpop.f32.mrb[43].mxu0  ;;  %v880_v48 = vadd.f32 %v1531_v49, %v796_v42 }
 0x14b   :  { %v866_v47 = vld [vmem:[#allocation2 + $0x60] sm:$0x3]  ;;  %v893_v53 = vmax.f32 %v880_v48, 0.0  ;;  %v881_v54 = vadd.f32 %v1531_v49, %v799_v45 }
 0x14c   :  { %v886_v52 = vadd.f32 %v1531_v49, %v866_v47 }
 0x14d   :  { %906 = vst [vmem:[%s1595_s3 + $0x30] sm:$0xff] %v893_v53  ;;  %v894_v0 = vmax.f32 %v881_v54, 0.0 }
 0x14e   :  { %v899_v55 = vmax.f32 %v886_v52, 0.0 }
 0x14f   :  { %907 = vst [vmem:[%s1595_s3 + $0x38] sm:$0xff] %v894_v0 }
 0x150   :  { %912 = vst [vmem:[%s1595_s3 + $0x60] sm:$0x3] %v899_v55 }

// kernel: forward.8
= control target key start
LH: loop header
LB: loop body
LE: loop exit
PB: predicated region body
PF: predicated region fallthrough
CT: control target
= control target key end

     0   :  { %s1519_s12 = smov 0   ;;  %s1521_s13 = smov 0   ;;  %s1772_s0 = inlined_call_operand.vmem [shape: bf16[98,1536], index: 0, kind: input, shape index: {}]   ;;  %s1773_s1 = inlined_call_operand.vmem [shape: bf16[1536,32], index: 1, kind: input, shape index: {}]   ;;  %s1774_s2 = inlined_call_operand.vmem [shape: f32[1,32], index: 2, kind: input, shape index: {}]   ;;  %s1775_s3 = inlined_call_operand.vmem [shape: f32[98,32], index: 3, kind: output, shape index: {}]  }
   0x1   :  { %s1523_s14 = smov 0   ;;  %s1525_s15 = smov 0  }
   0x2   :  { %s1527_s16 = smov 0  }
   0x3 LB: > { %s25_s17 = sadd.s32 1, %s1492_s15  ;;  %p48_p1 = scmp.ne.s32.totalorder %s1484_s13, %s1480_s12  ;;  %s1496_s16 = sphi %s1527_s16, %s13_s16   ;;  %s1492_s15 = sphi %s1525_s15, %s1779_s15   ;;  %s1488_s14 = sphi %s1523_s14, %s1778_s14   ;;  %s1484_s13 = sphi %s1521_s13, %s1777_s13   ;;  %s1480_s12 = sphi %s1519_s12, %s1776_s12  }
   0x4   : > { %p26_p0 = scmp.ge.s32.totalorder %s25_s17, 3  ;;  %p49_p2 = scmp.eq.s32.totalorder %s1496_s16, 0 }
   0x5   : > { %s41_s19 = sadd.s32 1, %s1484_s13  ;;  %p1153_p5 = scmp.ge.s32.totalorder %s1496_s16, 3 }
   0x6   : > { %s1781_s17 = smov (%p26_p0, %s25_s17), 0  ;;  %p50_p3 = por %p49_p2, %p48_p1 }
   0x7   : > { %s37_s18 = ssub.s32 %s1492_s15, %s1781_s17  ;;  %162 = sbr.rel (%p1153_p5) target bundleno = 32 (0x20), region = 20 }
   0x8   : > { %p39_p4 = scmp.eq.s32.totalorder %s37_s18, 0 }
   0xa   : > { %s1554_s20 = scalar_select %p39_p4, %s1484_s13, %s41_s19  }
   0xe   : > { %165 = sbr.rel (!%p50_p3) target bundleno = 32 (0x20), region = 24  ;;  %s167_s21 = sand.u32 (%p50_p3), 1, %s1484_s13  }
   0xf   : > { %s1226_s22 = sshll.u32 (%p50_p3), %s1492_s15, 4  ;;  %s1343_s23 = smul.u32 (%p50_p3), 208, %s167_s21 }
  0x10   : > { %s1562_s26 = scalar_lea.vmem (%p50_p3), %s1772_s0, %s1226_s22 }
  0x11   : > { %v188_v0 = vld [vmem:[%s1562_s26] sm:$0xff] (%p50_p3)  ;;  %v190_v1 = vld [vmem:[%s1562_s26 + $0x8] sm:$0xff] (%p50_p3)  ;;  %v192_v2 = vld [vmem:[%s1562_s26 + $0x30] sm:$0xff] (%p50_p3)  ;;  %s1570_s27 = scalar_lea.vmem (%p50_p3), [#allocation3], %s1343_s23 }
  0x12   : > { %v194_v3 = vld [vmem:[%s1562_s26 + $0x38] sm:$0xff] (%p50_p3)  ;;  %v196_v4 = vld [vmem:[%s1562_s26 + $0x60] sm:$0xff] (%p50_p3)  ;;  %v198_v5 = vld [vmem:[%s1562_s26 + $0x68] sm:$0xff] (%p50_p3)  ;;  %189 = vst [vmem:[%s1570_s27] sm:$0xff] (%p50_p3), %v188_v0 }
  0x13   : > { %191 = vst [vmem:[%s1570_s27 + $0x8] sm:$0xff] (%p50_p3), %v190_v1  ;;  %193 = vst [vmem:[%s1570_s27 + $0x10] sm:$0xff] (%p50_p3), %v192_v2  ;;  %v200_v6 = vld [vmem:[%s1562_s26 + $0x90] sm:$0xff] (%p50_p3)  ;;  %v202_v7 = vld [vmem:[%s1562_s26 + $0x98] sm:$0xff] (%p50_p3) }
  0x14   : > { %195 = vst [vmem:[%s1570_s27 + $0x18] sm:$0xff] (%p50_p3), %v194_v3  ;;  %197 = vst [vmem:[%s1570_s27 + $0x20] sm:$0xff] (%p50_p3), %v196_v4  ;;  %v204_v8 = vld [vmem:[%s1562_s26 + $0xc0] sm:$0xff] (%p50_p3)  ;;  %v206_v9 = vld [vmem:[%s1562_s26 + $0xc8] sm:$0xff] (%p50_p3) }
  0x15   : > { %199 = vst [vmem:[%s1570_s27 + $0x28] sm:$0xff] %v198_v5  ;;  %201 = vst [vmem:[%s1570_s27 + $0x30] sm:$0xff] %v200_v6  ;;  %v208_v10 = vld [vmem:[%s1562_s26 + $0xf0] sm:$0xff]  ;;  %v210_v11 = vld [vmem:[%s1562_s26 + $0xf8] sm:$0xff] }
  0x16   : > { %203 = vst [vmem:[%s1570_s27 + $0x38] sm:$0xff] %v202_v7  ;;  %205 = vst [vmem:[%s1570_s27 + $0x40] sm:$0xff] %v204_v8  ;;  %v212_v12 = vld [vmem:[%s1562_s26 + $0x120] sm:$0xff]  ;;  %v214_v13 = vld [vmem:[%s1562_s26 + $0x128] sm:$0xff] }
  0x17   : > { %207 = vst [vmem:[%s1570_s27 + $0x48] sm:$0xff] %v206_v9  ;;  %209 = vst [vmem:[%s1570_s27 + $0x50] sm:$0xff] %v208_v10  ;;  %v216_v14 = vld [vmem:[%s1562_s26 + $0x150] sm:$0xff]  ;;  %v218_v15 = vld [vmem:[%s1562_s26 + $0x158] sm:$0xff] }
  0x18   : > { %211 = vst [vmem:[%s1570_s27 + $0x58] sm:$0xff] %v210_v11  ;;  %213 = vst [vmem:[%s1570_s27 + $0x60] sm:$0xff] %v212_v12  ;;  %v220_v16 = vld [vmem:[%s1562_s26 + $0x180] sm:$0xff]  ;;  %v222_v17 = vld [vmem:[%s1562_s26 + $0x188] sm:$0xff] }
  0x19   : > { %215 = vst [vmem:[%s1570_s27 + $0x68] sm:$0xff] %v214_v13  ;;  %217 = vst [vmem:[%s1570_s27 + $0x70] sm:$0xff] %v216_v14  ;;  %v224_v18 = vld [vmem:[%s1562_s26 + $0x1b0] sm:$0xff]  ;;  %v226_v19 = vld [vmem:[%s1562_s26 + $0x1b8] sm:$0xff] }
  0x1a   : > { %219 = vst [vmem:[%s1570_s27 + $0x78] sm:$0xff] %v218_v15  ;;  %221 = vst [vmem:[%s1570_s27 + $0x80] sm:$0xff] %v220_v16  ;;  %v228_v20 = vld [vmem:[%s1562_s26 + $0x1e0] sm:$0xff]  ;;  %v230_v21 = vld [vmem:[%s1562_s26 + $0x1e8] sm:$0xff] }
  0x1b   : > { %223 = vst [vmem:[%s1570_s27 + $0x88] sm:$0xff] %v222_v17  ;;  %225 = vst [vmem:[%s1570_s27 + $0x90] sm:$0xff] %v224_v18  ;;  %v232_v22 = vld [vmem:[%s1562_s26 + $0x210] sm:$0xff]  ;;  %v234_v23 = vld [vmem:[%s1562_s26 + $0x218] sm:$0xff] }
  0x1c   : > { %227 = vst [vmem:[%s1570_s27 + $0x98] sm:$0xff] %v226_v19  ;;  %229 = vst [vmem:[%s1570_s27 + $0xa0] sm:$0xff] %v228_v20  ;;  %v236_v24 = vld [vmem:[%s1562_s26 + $0x240] sm:$0xff]  ;;  %v238_v25 = vld [vmem:[%s1562_s26 + $0x248] sm:$0xff] }
  0x1d   : > { %231 = vst [vmem:[%s1570_s27 + $0xa8] sm:$0xff] %v230_v21  ;;  %233 = vst [vmem:[%s1570_s27 + $0xb0] sm:$0xff] %v232_v22 }
  0x1e   : > { %235 = vst [vmem:[%s1570_s27 + $0xb8] sm:$0xff] %v234_v23  ;;  %237 = vst [vmem:[%s1570_s27 + $0xc0] sm:$0xff] %v236_v24 }
  0x1f   : > { %239 = vst [vmem:[%s1570_s27 + $0xc8] sm:$0xff] %v238_v25 }
  0x20 PF: > { %p1156_p6 = scmp.ge.s32.totalorder %s1496_s16, 1  ;;  %p256_p7 = scmp.lt.s32.totalorder %s1496_s16, 4 }
  0x22   : > { %p257_p8 = pnand %p1156_p6, %p256_p7 }
  0x23   : > { %s263_s28 = sand.u32 (!%p257_p8), 1, %s1480_s12   ;;  %s1157_s29 = sshll.u32 (!%p257_p8), %s1488_s14, 6 }
  0x24   : > { %260 = sbr.rel (%p257_p8) target bundleno = 367 (0x16f), region = 51  ;;  %p303_p9 = scmp.lt.s32.totalorder (!%p257_p8), %s1157_s29, 191 }
  0x25   : > { %s1344_s30 = smul.u32 (!%p257_p8), 208, %s263_s28  ;;  %p1159_p10 = scmp.ne.s32.totalorder (!%p257_p8), %s1488_s14, 0 }
  0x27   : > { %s1627_s8 = scalar_lea.vmem (!%p257_p8), [#allocation3], %s1344_s30 }
  0x2b   : > { %s1783_s29 = smov (!%p303_p9, %s1157_s29), 191  ;;  %327 = sbr.rel (%p1159_p10) target bundleno = 52 (0x34), region = 59 }
  0x2c   : > { %s1158_s4 = sshll.u32 %s1783_s29, 2  ;;  %vm328_vm0 = vcmask (!%p1159_p10), 261120   ;;  %vm341_vm1 = vcmask (!%p1159_p10), 254976   ;;  %v1498_v26 = vmov (!%p1159_p10), 0.0  }
  0x2d   : > { %s1625_s7 = scalar_lea.vmem %s1773_s1, %s1158_s4  ;;  %329 = vst.msk [vmem:[#allocation2] sm:$0xff] (!%p1159_p10), %vm328_vm0, %v1498_v26  ;;  %330 = vst.msk [vmem:[#allocation2 + $0x8] sm:$0xff] (!%p1159_p10), %vm328_vm0, %v1498_v26 }
  0x2e   : > { %331 = vst.msk [vmem:[#allocation2 + $0x10] sm:$0xff] (!%p1159_p10), %vm328_vm0, %v1498_v26  ;;  %332 = vst.msk [vmem:[#allocation2 + $0x18] sm:$0xff] (!%p1159_p10), %vm328_vm0, %v1498_v26 }
  0x2f   : > { %333 = vst.msk [vmem:[#allocation2 + $0x20] sm:$0xff] (!%p1159_p10), %vm328_vm0, %v1498_v26  ;;  %334 = vst.msk [vmem:[#allocation2 + $0x28] sm:$0xff] (!%p1159_p10), %vm328_vm0, %v1498_v26 }
  0x30   : > { %335 = vst.msk [vmem:[#allocation2 + $0x30] sm:$0xff] (!%p1159_p10), %vm328_vm0, %v1498_v26  ;;  %336 = vst.msk [vmem:[#allocation2 + $0x38] sm:$0xff] (!%p1159_p10), %vm328_vm0, %v1498_v26 }
  0x31   : > { %337 = vst.msk [vmem:[#allocation2 + $0x40] sm:$0xff] (!%p1159_p10), %vm328_vm0, %v1498_v26  ;;  %338 = vst.msk [vmem:[#allocation2 + $0x48] sm:$0xff] (!%p1159_p10), %vm328_vm0, %v1498_v26 }
  0x32   : > { %339 = vst.msk [vmem:[#allocation2 + $0x50] sm:$0xff] %vm328_vm0, %v1498_v26  ;;  %340 = vst.msk [vmem:[#allocation2 + $0x58] sm:$0xff] %vm328_vm0, %v1498_v26 }
  0x33   : > { %342 = vst.msk [vmem:[#allocation2 + $0x60] sm:$0x3] %vm341_vm1, %v1498_v26 }
  0x34 PF: > { %v1386_v27 = vld [vmem:[%s1625_s7 + $0x40] sm:$0xff]   ;;  %v1390_v31 = vld [vmem:[%s1625_s7 + $0x48] sm:$0xff]   ;;  %v1394_v35 = vld [vmem:[%s1625_s7 + $0x50] sm:$0xff]   ;;  %vm961_vm2 = vcmask 261120   ;;  %vm974_vm3 = vcmask 254976   ;;  %p1220_p11 = scmp.ne.s32.totalorder %s1488_s14, 2 }
  0x35   : > { %v1387_v28 = vld [vmem:[%s1625_s7 + $0xc0] sm:$0xff]   ;;  %1227 = vmatprep.subr.bf16.mxu0 %v1386_v27  ;;  %v1391_v32 = vld [vmem:[%s1625_s7 + $0xc8] sm:$0xff]   ;;  %v1395_v36 = vld [vmem:[%s1625_s7 + $0xd0] sm:$0xff]  }
  0x36   : > { %v1388_v29 = vld [vmem:[%s1625_s7] sm:$0xff]   ;;  %1285 = vmatprep.subr.bf16.mxu1 %v1387_v28  ;;  %v1392_v33 = vld [vmem:[%s1625_s7 + $0x8] sm:$0xff]   ;;  %v1396_v37 = vld [vmem:[%s1625_s7 + $0x10] sm:$0xff]  }
  0x37   : > { %v1389_v30 = vld [vmem:[%s1625_s7 + $0x80] sm:$0xff]   ;;  %1228 = vmatpush3.bf16.msra.mxu0 %v1388_v29  ;;  %v1393_v34 = vld [vmem:[%s1625_s7 + $0x88] sm:$0xff]   ;;  %v1397_v38 = vld [vmem:[%s1625_s7 + $0x90] sm:$0xff]  }
  0x38   : > { %1286 = vmatpush3.bf16.msra.mxu1 %v1389_v30  ;;  %1229 = vmatprep.subr.bf16.mxu0 %v1390_v31  ;;  %v1398_v39 = vld [vmem:[%s1625_s7 + $0x58] sm:$0xff]   ;;  %v1402_v43 = vld [vmem:[%s1625_s7 + $0x60] sm:$0xff]   ;;  %v1406_v47 = vld [vmem:[%s1625_s7 + $0x68] sm:$0xff]  }
  0x39   : > { %1287 = vmatprep.subr.bf16.mxu1 %v1391_v32  ;;  %v1399_v40 = vld [vmem:[%s1625_s7 + $0xd8] sm:$0xff]   ;;  %v1403_v44 = vld [vmem:[%s1625_s7 + $0xe0] sm:$0xff]   ;;  %v1407_v48 = vld [vmem:[%s1625_s7 + $0xe8] sm:$0xff]  }
  0x3a   : > { %v1400_v41 = vld [vmem:[%s1625_s7 + $0x18] sm:$0xff]   ;;  %v1404_v45 = vld [vmem:[%s1625_s7 + $0x20] sm:$0xff]   ;;  %v1408_v49 = vld [vmem:[%s1625_s7 + $0x28] sm:$0xff]  }
  0x3b   : > { %1230 = vmatpush3.bf16.msra.mxu0 %v1392_v33  ;;  %v1401_v42 = vld [vmem:[%s1625_s7 + $0x98] sm:$0xff]   ;;  %v1405_v46 = vld [vmem:[%s1625_s7 + $0xa0] sm:$0xff]   ;;  %v1409_v50 = vld [vmem:[%s1625_s7 + $0xa8] sm:$0xff]  }
  0x3c   : > { %1288 = vmatpush3.bf16.msra.mxu1 %v1393_v34  ;;  %1231 = vmatprep.subr.bf16.mxu0 %v1394_v35  ;;  %v1410_v51 = vld [vmem:[%s1625_s7 + $0x70] sm:$0xff]   ;;  %v1414_v55 = vld [vmem:[%s1625_s7 + $0x78] sm:$0xff]   ;;  %v343_v34 = vld [vmem:[#allocation2] sm:$0xff] }
  0x3d   : > { %1289 = vmatprep.subr.bf16.mxu1 %v1395_v36  ;;  %v1411_v52 = vld [vmem:[%s1625_s7 + $0xf0] sm:$0xff]   ;;  %v1415_v56 = vld [vmem:[%s1625_s7 + $0xf8] sm:$0xff]  }
  0x3e   : > { %v1412_v53 = vld [vmem:[%s1625_s7 + $0x30] sm:$0xff]   ;;  %v1416_v57 = vld [vmem:[%s1625_s7 + $0x38] sm:$0xff]  }
  0x3f   : > { %1232 = vmatpush3.bf16.msra.mxu0 %v1396_v37  ;;  %v1413_v54 = vld [vmem:[%s1625_s7 + $0xb0] sm:$0xff]   ;;  %v1417_v58 = vld [vmem:[%s1625_s7 + $0xb8] sm:$0xff]  }
  0x40   : > { %1290 = vmatpush3.bf16.msra.mxu1 %v1397_v38  ;;  %1233 = vmatprep.subr.bf16.mxu0 %v1398_v39  ;;  %v1418_v59 = vld [vmem:[%s1627_s8] ss:$16 sps:$4 sm:$0xff]   ;;  %v1420_v60 = vld [vmem:[%s1627_s8 + $0x4] ss:$16 sps:$4 sm:$0xff]   ;;  %v1421_v61 = vld [vmem:[%s1627_s8 + $0x8] ss:$16 sps:$4 sm:$0xff]  }
  0x41   : > { %1291 = vmatprep.subr.bf16.mxu1 %v1399_v40  ;;  %v1423_v62 = vld [vmem:[%s1627_s8 + $0xc] ss:$16 sps:$4 sm:$0xff]   ;;  %804 = vmatprep.mubr.bf16.mxu0 %v1420_v60  ;;  %v1424_v63 = vld [vmem:[%s1627_s8 + $0x24] ss:$16 sps:$4 sm:$0xff]   ;;  %v1428_v1 = vld [vmem:[%s1627_s8 + $0x20] ss:$16 sps:$4 sm:$0xff]  }
  0x42   : > { %892 = vmatprep.mubr.bf16.mxu1 %v1423_v62  ;;  %v1426_v0 = vld [vmem:[%s1627_s8 + $0x2c] ss:$16 sps:$4 sm:$0xff]   ;;  %v1429_v2 = vld [vmem:[%s1627_s8 + $0x28] ss:$16 sps:$4 sm:$0xff]   ;;  %v1430_v3 = vld [vmem:[%s1627_s8 + $0x44] ss:$16 sps:$4 sm:$0xff]  }
  0x43   : > { %1234 = vmatpush3.bf16.msra.mxu0 %v1400_v41  ;;  %v1432_v4 = vld [vmem:[%s1627_s8 + $0x4c] ss:$16 sps:$4 sm:$0xff]   ;;  %v1434_v5 = vld [vmem:[%s1627_s8 + $0x40] ss:$16 sps:$4 sm:$0xff]   ;;  %v1435_v6 = vld [vmem:[%s1627_s8 + $0x48] ss:$16 sps:$4 sm:$0xff]  }
  0x44   : > { %1292 = vmatpush3.bf16.msra.mxu1 %v1401_v42  ;;  %1235 = vmatprep.subr.bf16.mxu0 %v1402_v43  ;;  %v1436_v7 = vld [vmem:[%s1627_s8 + $0x64] ss:$16 sps:$4 sm:$0xff]   ;;  %v1438_v8 = vld [vmem:[%s1627_s8 + $0x6c] ss:$16 sps:$4 sm:$0xff]   ;;  %v1440_v9 = vld [vmem:[%s1627_s8 + $0x60] ss:$16 sps:$4 sm:$0xff]  }
  0x45   : > { %1293 = vmatprep.subr.bf16.mxu1 %v1403_v44  ;;  %v1441_v10 = vld [vmem:[%s1627_s8 + $0x68] ss:$16 sps:$4 sm:$0xff]   ;;  %v1442_v11 = vld [vmem:[%s1627_s8 + $0x84] ss:$16 sps:$4 sm:$0xff]   ;;  %v1444_v12 = vld [vmem:[%s1627_s8 + $0x8c] ss:$16 sps:$4 sm:$0xff]  }
  0x46   : > { %v1446_v13 = vld [vmem:[%s1627_s8 + $0x80] ss:$16 sps:$4 sm:$0xff]   ;;  %v1447_v14 = vld [vmem:[%s1627_s8 + $0x88] ss:$16 sps:$4 sm:$0xff]   ;;  %v1448_v15 = vld [vmem:[%s1627_s8 + $0xa4] ss:$16 sps:$4 sm:$0xff]  }
  0x47   : > { %1236 = vmatpush3.bf16.msra.mxu0 %v1404_v45  ;;  %v1450_v16 = vld [vmem:[%s1627_s8 + $0xac] ss:$16 sps:$4 sm:$0xff]   ;;  %v380_v17 = vld [vmem:[%s1627_s8 + $0xc0] sm:$0x11]  ;;  %v1453_v20 = vld [vmem:[%s1627_s8 + $0xa8] ss:$16 sps:$4 sm:$0xff]  }
  0x48   : > { %1294 = vmatpush3.bf16.msra.mxu1 %v1405_v46  ;;  %1237 = vmatprep.subr.bf16.mxu0 %v1406_v47  ;;  %v381_v18 = vld [vmem:[%s1627_s8 + $0xc8] sm:$0x11]  ;;  %v1452_v19 = vld [vmem:[%s1627_s8 + $0xa0] ss:$16 sps:$4 sm:$0xff]   ;;  %v1185_v21 = vcombine.high %v380_v17, %v380_v17  ;;  %v1184_v23 = vcombine.low %v380_v17, %v380_v17 }
  0x49   : > { %1295 = vmatprep.subr.bf16.mxu1 %v1407_v48  ;;  %v1187_v22 = vcombine.high %v381_v18, %v381_v18  ;;  %v1186_v24 = vcombine.low %v381_v18, %v381_v18  ;;  %v344_v39 = vld [vmem:[#allocation2 + $0x8] sm:$0xff] }
  0x4b   : > { %1238 = vmatpush3.bf16.msra.mxu0 %v1408_v49 }
  0x4c   : > { %1296 = vmatpush3.bf16.msra.mxu1 %v1409_v50  ;;  %1239 = vmatprep.subr.bf16.mxu0 %v1410_v51 }
  0x4d   : > { %1297 = vmatprep.subr.bf16.mxu1 %v1411_v52  ;;  %v345_v52 = vld [vmem:[#allocation2 + $0x10] sm:$0xff] }
  0x4f   : > { %1240 = vmatpush3.bf16.msra.mxu0 %v1412_v53 }
  0x50   : > { %1298 = vmatpush3.bf16.msra.mxu1 %v1413_v54  ;;  %1241 = vmatprep.subr.bf16.mxu0 %v1414_v55 }
  0x51   : > { %1299 = vmatprep.subr.bf16.mxu1 %v1415_v56 }
  0x53   : > { %1242 = vmatpush3.bf16.msra.mxu0 %v1416_v57  ;;  %v346_v57 = vld [vmem:[#allocation2 + $0x18] sm:$0xff] }
  0x54   : > { %1300 = vmatpush3.bf16.msra.mxu1 %v1417_v58 }
  0x56   : > { %805 = vmatmul.mubr.bf16.vlgmr.msra.gmra.mrb[0].mxu0 %v1418_v59 }
  0x57   : > { %893 = vmatmul.mubr.bf16.vlgmr.msra.gmra.mrb[0].mxu1 %v1421_v61  ;;  %812 = vmatprep.mubr.bf16.mxu0 %v1424_v63 }
  0x58   : > { %900 = vmatprep.mubr.bf16.mxu1 %v1426_v0 }
  0x5e   : > { %813 = vmatmul.mubr.bf16.gmra.mrb[4].mxu0 %v1428_v1 }
  0x5f   : > { %901 = vmatmul.mubr.bf16.gmra.mrb[4].mxu1 %v1429_v2  ;;  %820 = vmatprep.mubr.bf16.mxu0 %v1430_v3 }
  0x60   : > { %908 = vmatprep.mubr.bf16.mxu1 %v1432_v4 }
  0x66   : > { %821 = vmatmul.mubr.bf16.gmra.mrb[8].mxu0 %v1434_v5 }
  0x67   : > { %909 = vmatmul.mubr.bf16.gmra.mrb[8].mxu1 %v1435_v6  ;;  %828 = vmatprep.mubr.bf16.mxu0 %v1436_v7  ;;  %v347_v6 = vld [vmem:[#allocation2 + $0x20] sm:$0xff] }
  0x68   : > { %916 = vmatprep.mubr.bf16.mxu1 %v1438_v8 }
  0x6e   : > { %829 = vmatmul.mubr.bf16.gmra.mrb[12].mxu0 %v1440_v9 }
  0x6f   : > { %917 = vmatmul.mubr.bf16.gmra.mrb[12].mxu1 %v1441_v10  ;;  %836 = vmatprep.mubr.bf16.mxu0 %v1442_v11  ;;  %v348_v11 = vld [vmem:[#allocation2 + $0x28] sm:$0xff] }
  0x70   : > { %924 = vmatprep.mubr.bf16.mxu1 %v1444_v12 }
  0x76   : > { %837 = vmatmul.mubr.bf16.gmra.mrb[16].mxu0 %v1446_v13 }
  0x77   : > { %925 = vmatmul.mubr.bf16.gmra.mrb[16].mxu1 %v1447_v14  ;;  %844 = vmatprep.mubr.bf16.mxu0 %v1448_v15 }
  0x78   : > { %932 = vmatprep.mubr.bf16.mxu1 %v1450_v16 }
  0x7e   : > { %845 = vmatmul.mubr.bf16.gmra.mrb[20].mxu0 %v1452_v19 }
  0x7f   : > { %933 = vmatmul.mubr.bf16.gmra.mrb[20].mxu1 %v1453_v20  ;;  %852 = vmatprep.mubr.bf16.mxu0 %v1185_v21 }
  0x80   : > { %940 = vmatprep.mubr.bf16.mxu1 %v1187_v22 }
  0x86   : > { %853 = vmatmul.mubr.bf16.gmra.mrb[24].mxu0 %v1184_v23 }
  0x87   : > { %941 = vmatmul.mubr.bf16.gmra.mrb[24].mxu1 %v1186_v24  ;;  %v349_v24 = vld [vmem:[#allocation2 + $0x30] sm:$0xff] }
 0x129   : > { %v1243_v25 = vpop.f32.mrb[0].mxu0 }
 0x12a   : > { %v1301_v26 = vpop.f32.mrb[0].mxu1  ;;  %v1244_v27 = vpop.f32.mrb[1].mxu0 }
 0x12b   : > { %v1245_v28 = vadd.f32 %v1244_v27, %v1243_v25  ;;  %v1302_v29 = vpop.f32.mrb[1].mxu1  ;;  %v1246_v30 = vpop.f32.mrb[2].mxu0 }
 0x12c   : > { %v1303_v31 = vadd.f32 %v1302_v29, %v1301_v26  ;;  %v1304_v32 = vpop.f32.mrb[2].mxu1  ;;  %v1247_v33 = vpop.f32.mrb[3].mxu0  ;;  %v350_v29 = vld [vmem:[#allocation2 + $0x38] sm:$0xff] }
 0x12d   : > { %v1248_v35 = vadd.f32 %v1247_v33, %v1246_v30  ;;  %v1305_v36 = vpop.f32.mrb[3].mxu1 }
 0x12e   : > { %v895_v37 = vadd.f32 %v1303_v31, %v1245_v28  ;;  %v1306_v38 = vadd.f32 %v1305_v36, %v1304_v32 }
 0x130   : > { %v948_v40 = vadd.f32 %v895_v37, %v343_v34  ;;  %v898_v41 = vadd.f32 %v1306_v38, %v1248_v35 }
 0x131   : > { %v1249_v42 = vpop.f32.mrb[4].mxu0 }
 0x132   : > { %962 = vst.msk [vmem:[#allocation2] sm:$0xff] %vm961_vm2, %v948_v40  ;;  %v949_v43 = vadd.f32 %v898_v41, %v344_v39  ;;  %v1307_v44 = vpop.f32.mrb[4].mxu1  ;;  %v1250_v45 = vpop.f32.mrb[5].mxu0 }
 0x133   : > { %v1251_v46 = vadd.f32 %v1250_v45, %v1249_v42  ;;  %v1308_v47 = vpop.f32.mrb[5].mxu1  ;;  %v1252_v48 = vpop.f32.mrb[6].mxu0  ;;  %v351_v42 = vld [vmem:[#allocation2 + $0x40] sm:$0xff] }
 0x134   : > { %963 = vst.msk [vmem:[#allocation2 + $0x8] sm:$0xff] %vm961_vm2, %v949_v43  ;;  %v1309_v49 = vadd.f32 %v1308_v47, %v1307_v44  ;;  %v1310_v50 = vpop.f32.mrb[6].mxu1  ;;  %v1253_v51 = vpop.f32.mrb[7].mxu0  ;;  %v352_v47 = vld [vmem:[#allocation2 + $0x48] sm:$0xff] }
 0x135   : > { %v1254_v53 = vadd.f32 %v1253_v51, %v1252_v48  ;;  %v1311_v54 = vpop.f32.mrb[7].mxu1 }
 0x136   : > { %v903_v55 = vadd.f32 %v1309_v49, %v1251_v46  ;;  %v1312_v56 = vadd.f32 %v1311_v54, %v1310_v50 }
 0x138   : > { %v950_v58 = vadd.f32 %v903_v55, %v345_v52  ;;  %v906_v59 = vadd.f32 %v1312_v56, %v1254_v53 }
 0x139   : > { %v1255_v60 = vpop.f32.mrb[8].mxu0 }
 0x13a   : > { %964 = vst.msk [vmem:[#allocation2 + $0x10] sm:$0xff] %vm961_vm2, %v950_v58  ;;  %v951_v61 = vadd.f32 %v906_v59, %v346_v57  ;;  %v1313_v62 = vpop.f32.mrb[8].mxu1  ;;  %v1256_v63 = vpop.f32.mrb[9].mxu0 }
 0x13b   : > { %v1257_v0 = vadd.f32 %v1256_v63, %v1255_v60  ;;  %v1314_v1 = vpop.f32.mrb[9].mxu1  ;;  %v1258_v2 = vpop.f32.mrb[10].mxu0  ;;  %v353_v60 = vld [vmem:[#allocation2 + $0x50] sm:$0xff] }
 0x13c   : > { %965 = vst.msk [vmem:[#allocation2 + $0x18] sm:$0xff] %vm961_vm2, %v951_v61  ;;  %v1315_v3 = vadd.f32 %v1314_v1, %v1313_v62  ;;  %v1316_v4 = vpop.f32.mrb[10].mxu1  ;;  %v1259_v5 = vpop.f32.mrb[11].mxu0  ;;  %v354_v1 = vld [vmem:[#allocation2 + $0x58] sm:$0xff] }
 0x13d   : > { %v1260_v7 = vadd.f32 %v1259_v5, %v1258_v2  ;;  %v1317_v8 = vpop.f32.mrb[11].mxu1 }
 0x13e   : > { %v911_v9 = vadd.f32 %v1315_v3, %v1257_v0  ;;  %v1318_v10 = vadd.f32 %v1317_v8, %v1316_v4 }
 0x140   : > { %v952_v12 = vadd.f32 %v911_v9, %v347_v6  ;;  %v914_v13 = vadd.f32 %v1318_v10, %v1260_v7 }
 0x141   : > { %v1261_v14 = vpop.f32.mrb[12].mxu0 }
 0x142   : > { %966 = vst.msk [vmem:[#allocation2 + $0x20] sm:$0xff] %vm961_vm2, %v952_v12  ;;  %v953_v15 = vadd.f32 %v914_v13, %v348_v11  ;;  %v1319_v16 = vpop.f32.mrb[12].mxu1  ;;  %v1262_v17 = vpop.f32.mrb[13].mxu0 }
 0x143   : > { %v1263_v18 = vadd.f32 %v1262_v17, %v1261_v14  ;;  %v1320_v19 = vpop.f32.mrb[13].mxu1  ;;  %v1264_v20 = vpop.f32.mrb[14].mxu0  ;;  %v355_v14 = vld [vmem:[#allocation2 + $0x60] sm:$0x3] }
 0x144   : > { %967 = vst.msk [vmem:[#allocation2 + $0x28] sm:$0xff] %vm961_vm2, %v953_v15  ;;  %v1321_v21 = vadd.f32 %v1320_v19, %v1319_v16  ;;  %v1322_v22 = vpop.f32.mrb[14].mxu1  ;;  %v1265_v23 = vpop.f32.mrb[15].mxu0  ;;  %v1221_v19 = vld [vmem:[%s1774_s2] ss:$0 sm:$0xff] (!%p1220_p11) }
 0x145   : > { %v1266_v25 = vadd.f32 %v1265_v23, %v1264_v20  ;;  %v1323_v26 = vpop.f32.mrb[15].mxu1  ;;  %v981_v20 = vld [vmem:[#allocation2 + $0x8] sm:$0xff] (!%p1220_p11)  ;;  %v982_v23 = vld [vmem:[#allocation2 + $0x10] sm:$0xff] (!%p1220_p11) }
 0x146   : > { %v919_v27 = vadd.f32 %v1321_v21, %v1263_v18  ;;  %v1324_v28 = vadd.f32 %v1323_v26, %v1322_v22  ;;  %v980_v18 = vld [vmem:[#allocation2] sm:$0xff] (!%p1220_p11)  ;;  %v1001_v22 = vadd.f32 (!%p1220_p11), %v1221_v19, %v981_v20  ;;  %v1002_v26 = vadd.f32 (!%p1220_p11), %v1221_v19, %v982_v23 }
 0x147   : > { %v1000_v21 = vadd.f32 (!%p1220_p11), %v1221_v19, %v980_v18 }
 0x148   : > { %v954_v30 = vadd.f32 %v919_v27, %v349_v24  ;;  %v922_v31 = vadd.f32 %v1324_v28, %v1266_v25  ;;  %v983_v24 = vld [vmem:[#allocation2 + $0x18] sm:$0xff] (!%p1220_p11) }
 0x149   : > { %v1267_v32 = vpop.f32.mrb[16].mxu0  ;;  %v984_v25 = vld [vmem:[#allocation2 + $0x20] sm:$0xff] (!%p1220_p11)  ;;  %v1003_v27 = vadd.f32 (!%p1220_p11), %v1221_v19, %v983_v24 }
 0x14a   : > { %968 = vst.msk [vmem:[#allocation2 + $0x30] sm:$0xff] %vm961_vm2, %v954_v30  ;;  %v955_v33 = vadd.f32 %v922_v31, %v350_v29  ;;  %v1325_v34 = vpop.f32.mrb[16].mxu1  ;;  %v1268_v35 = vpop.f32.mrb[17].mxu0  ;;  %v1004_v28 = vadd.f32 (!%p1220_p11), %v1221_v19, %v984_v25 }
 0x14b   : > { %v1269_v36 = vadd.f32 %v1268_v35, %v1267_v32  ;;  %v1326_v37 = vpop.f32.mrb[17].mxu1  ;;  %v1270_v38 = vpop.f32.mrb[18].mxu0  ;;  %v985_v29 = vld [vmem:[#allocation2 + $0x28] sm:$0xff] (!%p1220_p11)  ;;  %v1013_v32 = vmax.f32 (!%p1220_p11), %v1000_v21, 0.0 }
 0x14c   : > { %969 = vst.msk [vmem:[#allocation2 + $0x38] sm:$0xff] %vm961_vm2, %v955_v33  ;;  %v1327_v39 = vadd.f32 %v1326_v37, %v1325_v34  ;;  %v1328_v40 = vpop.f32.mrb[18].mxu1  ;;  %v1271_v41 = vpop.f32.mrb[19].mxu0  ;;  %v1014_v33 = vmax.f32 (!%p1220_p11), %v1001_v22, 0.0  ;;  %v1005_v34 = vadd.f32 (!%p1220_p11), %v1221_v19, %v985_v29 }
 0x14d   : > { %v1272_v43 = vadd.f32 %v1271_v41, %v1270_v38  ;;  %v1329_v44 = vpop.f32.mrb[19].mxu1  ;;  %v1017_v41 = vmax.f32 (!%p1220_p11), %v1004_v28, 0.0  ;;  %1026 = vst.msk [vmem:[%s1775_s3] sm:$0xff] (!%p1220_p11), %vm961_vm2, %v1013_v32 }
 0x14e   : > { %v927_v45 = vadd.f32 %v1327_v39, %v1269_v36  ;;  %v1330_v46 = vadd.f32 %v1329_v44, %v1328_v40  ;;  %v1015_v39 = vmax.f32 (!%p1220_p11), %v1002_v26, 0.0  ;;  %v1016_v40 = vmax.f32 (!%p1220_p11), %v1003_v27, 0.0  ;;  %1027 = vst.msk [vmem:[%s1775_s3 + $0x8] sm:$0xff] (!%p1220_p11), %vm961_vm2, %v1014_v33 }
 0x14f   : > { %1030 = vst.msk [vmem:[%s1775_s3 + $0x20] sm:$0xff] (!%p1220_p11), %vm961_vm2, %v1017_v41 }
 0x150   : > { %v956_v48 = vadd.f32 %v927_v45, %v351_v42  ;;  %v930_v49 = vadd.f32 %v1330_v46, %v1272_v43  ;;  %v1018_v45 = vmax.f32 (!%p1220_p11), %v1005_v34, 0.0  ;;  %1028 = vst.msk [vmem:[%s1775_s3 + $0x10] sm:$0xff] (!%p1220_p11), %vm961_vm2, %v1015_v39  ;;  %1029 = vst.msk [vmem:[%s1775_s3 + $0x18] sm:$0xff] (!%p1220_p11), %vm961_vm2, %v1016_v40 }
 0x151   : > { %v1273_v50 = vpop.f32.mrb[20].mxu0  ;;  %v986_v30 = vld [vmem:[#allocation2 + $0x30] sm:$0xff] (!%p1220_p11) }
 0x152   : > { %970 = vst.msk [vmem:[#allocation2 + $0x40] sm:$0xff] %vm961_vm2, %v956_v48  ;;  %v957_v51 = vadd.f32 %v930_v49, %v352_v47  ;;  %v1331_v52 = vpop.f32.mrb[20].mxu1  ;;  %v1274_v53 = vpop.f32.mrb[21].mxu0  ;;  %v1006_v35 = vadd.f32 (!%p1220_p11), %v1221_v19, %v986_v30  ;;  %1031 = vst.msk [vmem:[%s1775_s3 + $0x28] sm:$0xff] (!%p1220_p11), %vm961_vm2, %v1018_v45 }
 0x153   : > { %v1275_v54 = vadd.f32 %v1274_v53, %v1273_v50  ;;  %v1332_v55 = vpop.f32.mrb[21].mxu1  ;;  %v1276_v56 = vpop.f32.mrb[22].mxu0  ;;  %v987_v31 = vld [vmem:[#allocation2 + $0x38] sm:$0xff] (!%p1220_p11) }
 0x154   : > { %971 = vst.msk [vmem:[#allocation2 + $0x48] sm:$0xff] %vm961_vm2, %v957_v51  ;;  %v1333_v57 = vadd.f32 %v1332_v55, %v1331_v52  ;;  %v1334_v58 = vpop.f32.mrb[22].mxu1  ;;  %v1277_v59 = vpop.f32.mrb[23].mxu0  ;;  %v1007_v42 = vadd.f32 (!%p1220_p11), %v1221_v19, %v987_v31  ;;  %v1019_v46 = vmax.f32 (!%p1220_p11), %v1006_v35, 0.0 }
 0x155   : > { %v1278_v61 = vadd.f32 %v1277_v59, %v1276_v56  ;;  %v1335_v62 = vpop.f32.mrb[23].mxu1 }
 0x156   : > { %v935_v63 = vadd.f32 %v1333_v57, %v1275_v54  ;;  %v1336_v0 = vadd.f32 %v1335_v62, %v1334_v58  ;;  %v1020_v49 = vmax.f32 (!%p1220_p11), %v1007_v42, 0.0  ;;  %1032 = vst.msk [vmem:[%s1775_s3 + $0x30] sm:$0xff] (!%p1220_p11), %vm961_vm2, %v1019_v46 }
 0x158   : > { %v958_v2 = vadd.f32 %v935_v63, %v353_v60  ;;  %v938_v3 = vadd.f32 %v1336_v0, %v1278_v61  ;;  %1033 = vst.msk [vmem:[%s1775_s3 + $0x38] sm:$0xff] (!%p1220_p11), %vm961_vm2, %v1020_v49 }
 0x159   : > { %v1279_v4 = vpop.f32.mrb[24].mxu0  ;;  %v988_v36 = vld [vmem:[#allocation2 + $0x40] sm:$0xff] (!%p1220_p11) }
 0x15a   : > { %972 = vst.msk [vmem:[#allocation2 + $0x50] sm:$0xff] %vm961_vm2, %v958_v2  ;;  %v959_v5 = vadd.f32 %v938_v3, %v354_v1  ;;  %v1337_v6 = vpop.f32.mrb[24].mxu1  ;;  %v1280_v7 = vpop.f32.mrb[25].mxu0  ;;  %v1008_v47 = vadd.f32 (!%p1220_p11), %v1221_v19, %v988_v36 }
 0x15b   : > { %v1281_v8 = vadd.f32 %v1280_v7, %v1279_v4  ;;  %v1338_v9 = vpop.f32.mrb[25].mxu1  ;;  %v1282_v10 = vpop.f32.mrb[26].mxu0  ;;  %v989_v37 = vld [vmem:[#allocation2 + $0x48] sm:$0xff] (!%p1220_p11) }
 0x15c   : > { %973 = vst.msk [vmem:[#allocation2 + $0x58] sm:$0xff] %vm961_vm2, %v959_v5  ;;  %v1339_v11 = vadd.f32 %v1338_v9, %v1337_v6  ;;  %v1340_v12 = vpop.f32.mrb[26].mxu1  ;;  %v1283_v13 = vpop.f32.mrb[27].mxu0  ;;  %979 = sbr.rel (%p1220_p11) target bundleno = 367 (0x16f), region = 63  ;;  %v1009_v48 = vadd.f32 (!%p1220_p11), %v1221_v19, %v989_v37  ;;  %v1021_v53 = vmax.f32 (!%p1220_p11), %v1008_v47, 0.0 }
 0x15d   : > { %v1341_v15 = vpop.f32.mrb[27].mxu1 }
 0x15e   : > { %v943_v16 = vadd.f32 %v1339_v11, %v1281_v8  ;;  %v1022_v54 = vmax.f32 (!%p1220_p11), %v1009_v48, 0.0  ;;  %1034 = vst.msk [vmem:[%s1775_s3 + $0x40] sm:$0xff] (!%p1220_p11), %vm961_vm2, %v1021_v53 }
 0x160   : > { %v960_v17 = vadd.f32 %v943_v16, %v355_v14  ;;  %1035 = vst.msk [vmem:[%s1775_s3 + $0x48] sm:$0xff] (!%p1220_p11), %vm961_vm2, %v1022_v54 }
 0x161   : > { %v990_v38 = vld [vmem:[#allocation2 + $0x50] sm:$0xff] (!%p1220_p11) }
 0x162   : > { %975 = vst.msk [vmem:[#allocation2 + $0x60] sm:$0x3] %vm974_vm3, %v960_v17  ;;  %v1010_v50 = vadd.f32 (!%p1220_p11), %v1221_v19, %v990_v38 }
 0x163   : > { %v991_v43 = vld [vmem:[#allocation2 + $0x58] sm:$0xff] }
 0x164   : > { %v1011_v51 = vadd.f32 %v1221_v19, %v991_v43  ;;  %v1023_v55 = vmax.f32 %v1010_v50, 0.0 }
 0x166   : > { %v1024_v56 = vmax.f32 %v1011_v51, 0.0  ;;  %1036 = vst.msk [vmem:[%s1775_s3 + $0x50] sm:$0xff] %vm961_vm2, %v1023_v55 }
 0x168   : > { %1037 = vst.msk [vmem:[%s1775_s3 + $0x58] sm:$0xff] %vm961_vm2, %v1024_v56 }
 0x169   : > { %v992_v44 = vld [vmem:[#allocation2 + $0x60] sm:$0x3] }
 0x16a   : > { %v1012_v52 = vadd.f32 %v1221_v19, %v992_v44 }
 0x16c   : > { %v1025_v57 = vmax.f32 %v1012_v52, 0.0 }
 0x16e   : > { %1038 = vst.msk [vmem:[%s1775_s3 + $0x60] sm:$0x3] %vm974_vm3, %v1025_v57 }
 0x16f PF: > { %s13_s16 = sadd.s32 1, %s1496_s16   ;;  %s1776_s12 = smov %s1484_s13 }
 0x170   : > { %p10_p12 = scmp.ge.s32.totalorder %s13_s16, 5   ;;  %s1777_s13 = smov %s1554_s20 }
 0x171   : > { %s1778_s14 = smov %s1492_s15  ;;  %s1779_s15 = smov %s1781_s17 }
 0x172   :  { %12 = sbr.rel (!%p10_p12) target bundleno = 3 (0x3), region = 104 }

// kernel: forward.11
= control target key start
LH: loop header
LB: loop body
LE: loop exit
PB: predicated region body
PF: predicated region fallthrough
CT: control target
= control target key end

     0   :  { %v136_v0 = vmov 0.0   ;;  %vm137_vm0 = vmmov 0   ;;  %vm46_vm1 = vcmask 261120   ;;  %s176_s1 = inlined_call_operand.vmem [shape: bf16[32,128], index: 1, kind: input, shape index: {}]   ;;  %s177_s0 = inlined_call_operand.vmem [shape: bf16[16,32], index: 0, kind: input, shape index: {}]   ;;  %s178_s2 = inlined_call_operand.vmem [shape: f32[1,128], index: 2, kind: input, shape index: {}]   ;;  %s179_s3 = inlined_call_operand.vmem [shape: f32[16,128], index: 3, kind: output, shape index: {}]  }
   0x1   :  { %123 = vmatprep.subr.bf16.mxu0 %v136_v0  ;;  %v133_v1 = vld [vmem:[%s176_s1] sm:$0xff]   ;;  %127 = vmatprep.mubr.msk.bf16.mxu0 %vm137_vm0, %v136_v0  ;;  %v134_v2 = vld [vmem:[%s176_s1 + $0x8] sm:$0xff]  }
   0x2   :  { %124 = vmatpush3.bf16.msra.mxu0 %v133_v1  ;;  %v135_v3 = vld [vmem:[%s177_s0] sm:$0xff]  }
   0x3   :  { %125 = vmatprep.subr.bf16.mxu0 %v136_v0  ;;  %v119_v4 = vld [vmem:[%s178_s2] ss:$0 sm:$0xff] }
   0x6   :  { %126 = vmatpush3.bf16.msra.mxu0 %v134_v2 }
   0x9   :  { %128 = vmatmul.mubr.msk.bf16.vlgmr.msra.gmra.mrb[0].mxu0 %vm46_vm1, %v135_v3 }
  0xdc   :  { %v84_v5 = vpop.f32.mrb[0].mxu0 }
  0xdd   :  { %v107_v6 = vadd.f32 %v119_v4, %v84_v5  ;;  %v129_v7 = vpop.f32.mrb[1].mxu0 }
  0xde   :  { %v87_v8 = vpop.f32.mrb[2].mxu0 }
  0xdf   :  { %109 = vst [vmem:[%s179_s3] sm:$0xff] %v107_v6  ;;  %v108_v9 = vadd.f32 %v119_v4, %v87_v8  ;;  %v130_v10 = vpop.f32.mrb[3].mxu0 }
  0xe1   :  { %110 = vst [vmem:[%s179_s3 + $0x8] sm:$0xff] %v108_v9 }

// kernel: forward.9
= control target key start
LH: loop header
LB: loop body
LE: loop exit
PB: predicated region body
PF: predicated region fallthrough
CT: control target
= control target key end

     0   :  { %s3366_s0 = inlined_call_operand.vmem [shape: f32[2,8,32], index: 0, kind: input, shape index: {}]   ;;  %s3367_s1 = inlined_call_operand.vmem [shape: f32[2,49,32], index: 1, kind: input, shape index: {}]   ;;  %s3368_s2 = inlined_call_operand.vmem [shape: bf16[32,96], index: 2, kind: input, shape index: {}]   ;;  %s3369_s3 = inlined_call_operand.vmem [shape: f32[1,96], index: 3, kind: input, shape index: {}]   ;;  %s3370_s4 = inlined_call_operand.vmem [shape: bf16[32,32], index: 4, kind: input, shape index: {}]   ;;  %s3371_s5 = inlined_call_operand.vmem [shape: f32[1,32], index: 5, kind: input, shape index: {}]   ;;  %s3372_s6 = inlined_call_operand.vmem [shape: f32[1,32], index: 6, kind: input, shape index: {}]   ;;  %s3373_s7 = inlined_call_operand.vmem [shape: f32[1,32], index: 7, kind: input, shape index: {}]   ;;  %s3374_s8 = inlined_call_operand.vmem [shape: bf16[32,128], index: 8, kind: input, shape index: {}]   ;;  %s3375_s9 = inlined_call_operand.vmem [shape: f32[1,128], index: 9, kind: input, shape index: {}]   ;;  %s3376_s10 = inlined_call_operand.vmem [shape: bf16[128,32], index: 10, kind: input, shape index: {}]   ;;  %s3377_s11 = inlined_call_operand.vmem [shape: f32[1,32], index: 11, kind: input, shape index: {}]   ;;  %s3378_s12 = inlined_call_operand.vmem [shape: f32[1,32], index: 12, kind: input, shape index: {}]   ;;  %s3379_s13 = inlined_call_operand.vmem [shape: f32[1,32], index: 13, kind: input, shape index: {}]   ;;  %s3380_s14 = inlined_call_operand.vmem [shape: bf16[32,32], index: 14, kind: input, shape index: {}]   ;;  %s3381_s15 = inlined_call_operand.vmem [shape: f32[1,32], index: 15, kind: input, shape index: {}]   ;;  %s3382_s16 = inlined_call_operand.vmem [shape: bf16[32,64], index: 16, kind: input, shape index: {}]   ;;  %s3383_s17 = inlined_call_operand.vmem [shape: f32[1,64], index: 17, kind: input, shape index: {}]   ;;  %s3384_s18 = inlined_call_operand.vmem [shape: bf16[32,32], index: 18, kind: input, shape index: {}]   ;;  %s3385_s19 = inlined_call_operand.vmem [shape: f32[1,32], index: 19, kind: input, shape index: {}]   ;;  %s3386_s20 = inlined_call_operand.vmem [shape: f32[2,8,32], index: 20, kind: output, shape index: {}]  }
   0x1   :  { %3407 = sst [smem:[#allocation2_spill]] %s3366_s0 }
   0x2   :  { %3408 = sst [smem:[#allocation3_spill]] %s3367_s1  ;;  %s2936_s1 = smov 0  }
   0x3   :  { %3409 = sst [smem:[#allocation4_spill]] %s3368_s2 }
   0x4   :  { %3410 = sst [smem:[#allocation5_spill]] %s3369_s3 }
   0x5   :  { %3411 = sst [smem:[#allocation6_spill]] %s3370_s4 }
   0x6 LB: > { %s2356_s22 = sadd.s32 4294967295, %s2812_s1   ;;  %p2360_p0 = scmp.ge.s32.totalorder %s2812_s1, 1  ;;  %s2812_s1 = sphi %s2936_s1, %s30_s1  }
   0x7   : > { %p571_p1 = scmp.lt.s32.totalorder %s2812_s1, 3 }
   0x9   : > { %p572_p2 = pnand %p2360_p0, %p571_p1 }
   0xa   : > { %s3412_s2 = sld [smem:[#allocation4_spill]] (!%p572_p2)  ;;  %v2814_v1 = vmov (!%p572_p2), 0.0   ;;  %vm2815_vm0 = vmmov (!%p572_p2), 0   ;;  %p632_p3 = scmp.lt.s32.totalorder (!%p572_p2), %s2356_s22, 1  ;;  %vm678_vm1 = vcmask (!%p572_p2), 261120   ;;  %vm726_vm2 = vcmask (!%p572_p2), 64512  }
   0xb   : > { %575 = sbr.rel (%p572_p2) target bundleno = 4802 (0x12c2), region = 100  ;;  %2508 = vmatprep.subr.bf16.mxu0 (!%p572_p2), %v2814_v1  ;;  %2516 = vmatprep.subr.bf16.mxu1 (!%p572_p2), %v2814_v1  ;;  %s3413_s4 = sld [smem:[#allocation2_spill]] (!%p572_p2)  ;;  %vm789_vm3 = vcmask (!%p572_p2), 1043456   ;;  %vm1181_vm4 = vcmask (!%p572_p2), 130048   ;;  %vm1183_vm5 = vcmask (!%p572_p2), 195584   ;;  %vm1753_vm6 = vcmask (!%p572_p2), 1040384  }
   0xc   : > { %2512 = vmatprep.mubr.msk.bf16.mxu0 (!%p572_p2), %vm2815_vm0, %v2814_v1  ;;  %2518 = vmatprep.mubr.msk.bf16.mxu1 (!%p572_p2), %vm2815_vm0, %v2814_v1  ;;  %s3414_s21 = sld [smem:[#allocation5_spill]] (!%p572_p2)  ;;  %s3403_s23 = smov (!%p572_p2), 120   ;;  %vm1724_vm7 = vcmask (!%p572_p2), 400384  }
   0xd   : > { %s3405_s24 = smov (!%p572_p2), 96   ;;  %s3397_s25 = smov (!%p572_p2), 80  }
   0xe   : > { %s3401_s3 = smov (!%p572_p2), 88   ;;  %s3390_s27 = smov (!%p572_p2), 72  }
   0xf   : > { %s3399_s28 = smov (!%p572_p2), 112   ;;  %s2824_s30 = smov (!%p572_p2), 64  }
  0x10   : > { %v2750_v0 = vld [vmem:[%s3412_s2] sm:$0xff] (!%p572_p2)   ;;  %v2751_v2 = vld [vmem:[%s3412_s2 + $0x8] sm:$0xff] (!%p572_p2)   ;;  %s2825_s0 = smov (!%p572_p2), 40  }
  0x11   : > { %2509 = vmatpush3.bf16.msra.mxu0 (!%p572_p2), %v2750_v0 }
  0x12   : > { %2510 = vmatprep.subr.bf16.mxu0 %v2814_v1  ;;  %s3429_s22 = smov (!%p632_p3, %s2356_s22), 1  ;;  %v2364_v5 = vld [vmem:[%s3414_s21] ss:$0 sm:$0xff]  ;;  %s2826_s21 = smov 48  }
  0x13   : > { %s3389_s26 = sshll.u32 %s3429_s22, 3 }
  0x14   : > { %s635_s29 = scalar_lea.vmem %s3413_s4, %s3389_s26  ;;  %s3395_s4 = smov 104  }
  0x15   : > { %2511 = vmatpush3.bf16.msra.mxu0 %v2751_v2  ;;  %v2966_v3 = vld [vmem:[%s635_s29] sm:$0xff]  ;;  %s2823_s29 = smov 56   ;;  %s3393_s26 = smov 24  }
  0x16   : > { %2522 = vmatprep.subr.bf16.mxu0 %v2814_v1  ;;  %v654_v4 = vpack.c.bf16 %v2966_v3, %v2966_v3 }
  0x18   : > { %2513 = vmatmul.mubr.msk.bf16.vlgmr.msra.gmra.mrb[0].mxu0 %vm678_vm1, %v654_v4 }
  0x19   : > { %2524 = vmatprep.mubr.msk.bf16.mxu0 %vm2815_vm0, %v2814_v1 }
  0xeb   : > { %v716_v6 = vpop.f32.mrb[0].mxu0 }
  0xec   : > { %v717_v7 = vadd.f32 %v2364_v5, %v716_v6  ;;  %v2514_v8 = vpop.f32.mrb[1].mxu0 }
  0xed   : > { %v719_v9 = vpop.f32.mrb[2].mxu0 }
  0xee   : > { %v2976_v10 = vpack.c.bf16 %v717_v7, %v717_v7  ;;  %v2515_v11 = vpop.f32.mrb[3].mxu0 }
  0xf0   : > { %835 = vrot.lane.b32.xlu1 %v2976_v10, %s3403_s23  ;;  %724 = vrot.lane.b32.xlu0 %v2976_v10, %s3405_s24  ;;  %s3424_s23 = smov 16   ;;  %s3425_s24 = smov 8  }
  0xf4   : > { %948 = vrot.lane.b32.xlu1 %v2976_v10, %s3397_s25  ;;  %837 = vrot.lane.b32.xlu0 %v2976_v10, %s3401_s3  ;;  %s3416_s25 = sld [smem:[#allocation3_spill]] }
  0xf8   : > { %1059 = vrot.lane.b32.xlu1 %v2976_v10, %s3390_s27  ;;  %946 = vrot.lane.b32.xlu0 %v2976_v10, %s3399_s28  ;;  %s3420_s28 = smov 112   ;;  %s3423_s27 = smov 72  }
  0xfc   : > { %1057 = vrot.lane.b32.xlu0 %v2976_v10, %s3395_s4 }
 0x162   : > { %v725_v12 = vpop.permute.xlu0 %724  ;;  %v836_v15 = vpop.permute.xlu1 %835 }
 0x163   : > { %v731_v13 = vsel %vm726_vm2, %v725_v12, 0 }
 0x164   : > { %2517 = vmatpush3.bf16.xpose.msra.mxu1 %v731_v13 }
 0x165   : > { %2528 = vmatprep.subr.bf16.mxu1 %v2814_v1 }
 0x166   : > { %v838_v14 = vpop.permute.xlu0 %837  ;;  %v949_v17 = vpop.permute.xlu1 %948 }
 0x167   : > { %v843_v16 = vsel %vm726_vm2, %v838_v14, 0  ;;  %v954_v18 = vsel %vm726_vm2, %v949_v17, 0 }
 0x16a   : > { %v1060_v19 = vpop.permute.xlu1 %1059  ;;  %v947_v20 = vpop.permute.xlu0 %946 }
 0x16b   : > { %2519 = vmatmul.mubr.msk.bf16.vlgmr.msra.gmra.mrb[0].mxu1 %vm726_vm2, %v2976_v10  ;;  %v1065_v21 = vsel %vm726_vm2, %v1060_v19, 0 }
 0x16c   : > { %2529 = vmatpush3.bf16.xpose.msra.mxu1 %v843_v16  ;;  %2530 = vmatprep.mubr.msk.bf16.mxu1 %vm2815_vm0, %v2814_v1 }
 0x16d   : > { %2540 = vmatprep.subr.bf16.mxu1 %v2814_v1 }
 0x16e   : > { %v1058_v22 = vpop.permute.xlu0 %1057 }
 0x173   : > { %2531 = vmatmul.mubr.msk.bf16.vlgmr.msra.gmra.mrb[4].mxu1 %vm726_vm2, %v836_v15 }
 0x174   : > { %2541 = vmatpush3.bf16.xpose.msra.mxu1 %v954_v18  ;;  %2542 = vmatprep.mubr.msk.bf16.mxu1 %vm2815_vm0, %v2814_v1 }
 0x175   : > { %2552 = vmatprep.subr.bf16.mxu1 %v2814_v1 }
 0x17b   : > { %2543 = vmatmul.mubr.msk.bf16.vlgmr.msra.gmra.mrb[8].mxu1 %vm726_vm2, %v947_v20 }
 0x17c   : > { %2553 = vmatpush3.bf16.xpose.msra.mxu1 %v1065_v21  ;;  %2554 = vmatprep.mubr.msk.bf16.mxu1 %vm2815_vm0, %v2814_v1 }
 0x17d   : > { %2564 = vmatprep.subr.bf16.mxu1 %v2814_v1 }
 0x183   : > { %2555 = vmatmul.mubr.msk.bf16.vlgmr.msra.gmra.mrb[12].mxu1 %vm726_vm2, %v1058_v22 }
 0x184   : > { %2568 = vmatprep.mubr.msk.bf16.mxu1 %vm2815_vm0, %v2814_v1 }
 0x23e   : > { %v767_v23 = vpop.f32.mrb[0].mxu1 }
 0x23f   : > { %v773_v24 = vmul.f32 0.35355338, %v767_v23  ;;  %v2520_v25 = vpop.f32.mrb[1].mxu1 }
 0x240   : > { %v770_v26 = vpop.f32.mrb[2].mxu1 }
 0x241   : > { %v2521_v27 = vpop.f32.mrb[3].mxu1  ;;  %v774_v28 = vsel %vm726_vm2, %v773_v24, -inf }
 0x242   : > { %775 = vmax.xlane.f32.xlu1 %v774_v28 }
 0x246   : > { %v879_v29 = vpop.f32.mrb[4].mxu1 }
 0x247   : > { %v885_v30 = vmul.f32 0.35355338, %v879_v29  ;;  %v2532_v31 = vpop.f32.mrb[5].mxu1 }
 0x248   : > { %v882_v32 = vpop.f32.mrb[6].mxu1 }
 0x249   : > { %v2533_v33 = vpop.f32.mrb[7].mxu1  ;;  %v886_v34 = vsel %vm726_vm2, %v885_v30, -inf }
 0x24a   : > { %887 = vmax.xlane.f32.xlu0 %v886_v34 }
 0x24e   : > { %v990_v35 = vpop.f32.mrb[8].mxu1 }
 0x24f   : > { %v996_v36 = vmul.f32 0.35355338, %v990_v35  ;;  %v2544_v37 = vpop.f32.mrb[9].mxu1 }
 0x250   : > { %v993_v38 = vpop.f32.mrb[10].mxu1 }
 0x251   : > { %v2545_v39 = vpop.f32.mrb[11].mxu1  ;;  %v997_v40 = vsel %vm726_vm2, %v996_v36, -inf }
 0x252   : > { %998 = vmax.xlane.f32.xlu0 %v997_v40 }
 0x253   : > { %896 = vrot.lane.b32.xlu1 %v2976_v10, %s2823_s29  ;;  %s3392_s29 = smov 8  }
 0x256   : > { %v1101_v41 = vpop.f32.mrb[12].mxu1 }
 0x257   : > { %v2556_v42 = vpop.f32.mrb[13].mxu1  ;;  %v1107_v45 = vmul.f32 0.35355338, %v1101_v41 }
 0x258   : > { %v1104_v43 = vpop.f32.mrb[14].mxu1 }
 0x259   : > { %v2557_v44 = vpop.f32.mrb[15].mxu1  ;;  %v1108_v46 = vsel %vm726_vm2, %v1107_v45, -inf }
 0x268   : > { %784 = vrot.lane.b32.xlu0 %v2976_v10, %s2824_s30 }
 0x26c   : > { %1118 = vrot.lane.b32.xlu0 %v2976_v10, %s2825_s0  ;;  %s3422_s0 = smov 104  }
 0x277   : > { %1109 = vmax.xlane.f32.xlu1 %v1108_v46 }
 0x288   : > { %1007 = vrot.lane.b32.xlu1 %v2976_v10, %s2826_s21  ;;  %s3415_s21 = sld [smem:[#allocation6_spill]] }
 0x28e   : > { %v2752_v29 = vld [vmem:[%s3415_s21] sm:$0xff]   ;;  %v2753_v31 = vld [vmem:[%s3415_s21 + $0x8] sm:$0xff]  }
 0x28f   : > { %2565 = vmatpush3.bf16.msra.mxu1 %v2752_v29 }
 0x290   : > { %2566 = vmatprep.subr.bf16.mxu1 %v2814_v1 }
 0x293   : > { %2567 = vmatpush3.bf16.msra.mxu1 %v2753_v31 }
 0x294   : > { %2580 = vmatprep.subr.bf16.mxu1 %v2814_v1 }
 0x2cf   : > { %v776_v47 = vpop.xlane.xlu1 %775 }
 0x2d0   : > { %v777_v48 = vsub.f32 %v773_v24, %v776_v47 }
 0x2d2   : > { %v778_v49 = vmul.f32 1.442695, %v777_v48 }
 0x2d3   : > { %v897_v59 = vpop.permute.xlu1 %896 }
 0x2d4   : > { %2770 = vpow2.f32 %v778_v49  ;;  %v902_v63 = vsel %vm789_vm3, %v897_v59, 0 }
 0x2d7   : > { %v888_v50 = vpop.xlane.xlu0 %887 }
 0x2d8   : > { %v889_v51 = vsub.f32 %v885_v30, %v888_v50 }
 0x2da   : > { %v890_v52 = vmul.f32 1.442695, %v889_v51 }
 0x2dc   : > { %2772 = vpow2.f32 %v890_v52 }
 0x2de   : > { %v2771_v56 = vpop.eup %2770 }
 0x2df   : > { %v999_v53 = vpop.xlane.xlu0 %998  ;;  %v783_v61 = vpack.c.bf16 %v2771_v56, %v2771_v56  ;;  %v780_v0 = vsel %vm726_vm2, %v2771_v56, 0.0 }
 0x2e0   : > { %v1000_v54 = vsub.f32 %v996_v36, %v999_v53 }
 0x2e2   : > { %v1001_v55 = vmul.f32 1.442695, %v1000_v54  ;;  %v2376_v54 = vld [vmem:[%s3371_s5] ss:$0 sm:$0xff] }
 0x2e3   : > { %v785_v57 = vpop.permute.xlu0 %784 }
 0x2e4   : > { %2774 = vpow2.f32 %v1001_v55  ;;  %v791_v58 = vsel %vm789_vm3, %v785_v57, 0 }
 0x2e5   : > { %2523 = vmatpush3.bf16.msra.mxu0 %v791_v58 }
 0x2e6   : > { %v2773_v60 = vpop.eup %2772  ;;  %2534 = vmatprep.subr.bf16.mxu0 %v2814_v1 }
 0x2e7   : > { %v892_v62 = vsel %vm726_vm2, %v2773_v60, 0.0  ;;  %v895_v4 = vpack.c.bf16 %v2773_v60, %v2773_v60  ;;  %v1119_v11 = vpop.permute.xlu0 %1118 }
 0x2e8   : > { %893 = vadd.xlane.f32.xlu1 %v892_v62  ;;  %2525 = vmatmul.mubr.msk.bf16.vlgmr.msra.gmra.mrb[4].mxu0 %vm726_vm2, %v783_v61  ;;  %v1124_v13 = vsel %vm789_vm3, %v1119_v11, 0  ;;  %v2761_v11 = vld [vmem:[%s3376_s10 + $0x28] sm:$0xff]  }
 0x2e9   : > { %2535 = vmatpush3.bf16.msra.mxu0 %v902_v63  ;;  %2536 = vmatprep.mubr.msk.bf16.mxu0 %vm2815_vm0, %v2814_v1 }
 0x2ea   : > { %2546 = vmatprep.subr.bf16.mxu0 %v2814_v1 }
 0x2ec   : > { %781 = vadd.xlane.f32.xlu1 %v780_v0 }
 0x2ee   : > { %v2775_v2 = vpop.eup %2774 }
 0x2ef   : > { %v1003_v5 = vsel %vm726_vm2, %v2775_v2, 0.0  ;;  %v1006_v12 = vpack.c.bf16 %v2775_v2, %v2775_v2 }
 0x2f0   : > { %1004 = vadd.xlane.f32.xlu0 %v1003_v5  ;;  %2537 = vmatmul.mubr.msk.bf16.vlgmr.msra.gmra.mrb[8].mxu0 %vm726_vm2, %v895_v4  ;;  %v2754_v5 = vld [vmem:[%s3374_s8] sm:$0xff]  }
 0x2f1   : > { %2548 = vmatprep.mubr.msk.bf16.mxu0 %vm2815_vm0, %v2814_v1 }
 0x304   : > { %v1110_v6 = vpop.xlane.xlu1 %1109 }
 0x305   : > { %v1111_v7 = vsub.f32 %v1107_v45, %v1110_v6  ;;  %v2756_v6 = vld [vmem:[%s3376_s10] sm:$0xff]  }
 0x307   : > { %v1112_v8 = vmul.f32 1.442695, %v1111_v7  ;;  %v2757_v7 = vld [vmem:[%s3376_s10 + $0x8] sm:$0xff]  }
 0x308   : > { %v1008_v9 = vpop.permute.xlu1 %1007 }
 0x309   : > { %2776 = vpow2.f32 %v1112_v8  ;;  %v1013_v10 = vsel %vm789_vm3, %v1008_v9, 0  ;;  %v2758_v8 = vld [vmem:[%s3376_s10 + $0x10] sm:$0xff]   ;;  %v2759_v9 = vld [vmem:[%s3376_s10 + $0x18] sm:$0xff]  }
 0x30a   : > { %2547 = vmatpush3.bf16.msra.mxu0 %v1013_v10  ;;  %v2760_v10 = vld [vmem:[%s3376_s10 + $0x20] sm:$0xff]  }
 0x30b   : > { %2558 = vmatprep.subr.bf16.mxu0 %v2814_v1 }
 0x30d   : > { %2549 = vmatmul.mubr.msk.bf16.vlgmr.msra.gmra.mrb[12].mxu0 %vm726_vm2, %v1006_v12 }
 0x30e   : > { %2559 = vmatpush3.bf16.msra.mxu0 %v1124_v13  ;;  %2560 = vmatprep.mubr.msk.bf16.mxu0 %vm2815_vm0, %v2814_v1 }
 0x30f   : > { %2572 = vmatprep.subr.bf16.mxu0 %v2814_v1 }
 0x313   : > { %v2777_v14 = vpop.eup %2776 }
 0x314   : > { %v1114_v15 = vsel %vm726_vm2, %v2777_v14, 0.0  ;;  %v1117_v16 = vpack.c.bf16 %v2777_v14, %v2777_v14 }
 0x315   : > { %1115 = vadd.xlane.f32.xlu0 %v1114_v15 }
 0x316   : > { %2561 = vmatmul.mubr.msk.bf16.vlgmr.msra.gmra.mrb[16].mxu0 %vm726_vm2, %v1117_v16  ;;  %v2380_v16 = vld [vmem:[%s3372_s6] ss:$0 sm:$0xff] }
 0x317   : > { %2576 = vmatprep.mubr.msk.bf16.mxu0 %vm2815_vm0, %v2814_v1  ;;  %2573 = vmatpush3.bf16.msra.mxu0 %v2754_v5 }
 0x318   : > { %2574 = vmatprep.subr.bf16.mxu0 %v2814_v1 }
 0x375   : > { %v894_v17 = vpop.xlane.xlu1 %893 }
 0x376   : > { %2778 = vrcp.f32 %v894_v17 }
 0x379   : > { %v782_v44 = vpop.xlane.xlu1 %781 }
 0x37d   : > { %v1005_v28 = vpop.xlane.xlu0 %1004 }
 0x37e   : > { %2780 = vrcp.f32 %v1005_v28 }
 0x380   : > { %v2779_v22 = vpop.eup %2778 }
 0x388   : > { %v2781_v32 = vpop.eup %2780 }
 0x3a2   : > { %v1116_v30 = vpop.xlane.xlu0 %1115 }
 0x3a3   : > { %2782 = vrcp.f32 %v1116_v30 }
 0x3a4   : > { %2784 = vrcp.f32 %v782_v44 }
 0x3ad   : > { %v2783_v38 = vpop.eup %2782 }
 0x3ae   : > { %v2785_v45 = vpop.eup %2784 }
 0x3bb   : > { %v827_v18 = vpop.f32.mrb[4].mxu0 }
 0x3bc   : > { %v2526_v19 = vpop.f32.mrb[5].mxu0  ;;  %v834_v48 = vmul.f32 %v2785_v45, %v827_v18  ;;  %v2381_v18 = vld [vmem:[%s3373_s7] ss:$0 sm:$0xff] }
 0x3bd   : > { %v830_v20 = vpop.f32.mrb[6].mxu0  ;;  %v2764_v45 = vld [vmem:[%s3380_s14] sm:$0xff]  }
 0x3be   : > { %v2527_v21 = vpop.f32.mrb[7].mxu0 }
 0x3c3   : > { %v938_v23 = vpop.f32.mrb[8].mxu0 }
 0x3c4   : > { %v945_v24 = vmul.f32 %v2779_v22, %v938_v23  ;;  %v2538_v25 = vpop.f32.mrb[9].mxu0  ;;  %v2762_v22 = vld [vmem:[%s3376_s10 + $0x30] sm:$0xff]   ;;  %v2763_v23 = vld [vmem:[%s3376_s10 + $0x38] sm:$0xff]  }
 0x3c5   : > { %v941_v26 = vpop.f32.mrb[10].mxu0 }
 0x3c6   : > { %1169 = vrot.lane.b32.xlu0 %v945_v24, %s3392_s29  ;;  %v2539_v27 = vpop.f32.mrb[11].mxu0  ;;  %s3394_s29 = smov 16   ;;  %v2382_v24 = vld [vmem:[%s3375_s9] ss:$0 sm:$0xff] }
 0x3e0   : > { %v1049_v33 = vpop.f32.mrb[12].mxu0 }
 0x3e1   : > { %v1056_v34 = vmul.f32 %v2781_v32, %v1049_v33  ;;  %v2550_v35 = vpop.f32.mrb[13].mxu0  ;;  %v2386_v32 = vld [vmem:[%s3377_s11] ss:$0 sm:$0xff] }
 0x3e2   : > { %v1052_v36 = vpop.f32.mrb[14].mxu0 }
 0x3e3   : > { %1173 = vrot.lane.b32.xlu1 %v1056_v34, %s3394_s29  ;;  %v2551_v37 = vpop.f32.mrb[15].mxu0  ;;  %s3421_s29 = smov 80  }
 0x3e9   : > { %v1160_v39 = vpop.f32.mrb[16].mxu0 }
 0x3ea   : > { %v1167_v40 = vmul.f32 %v2783_v38, %v1160_v39  ;;  %v2562_v41 = vpop.f32.mrb[17].mxu0 }
 0x3eb   : > { %v1163_v42 = vpop.f32.mrb[18].mxu0 }
 0x3ec   : > { %1177 = vrot.lane.b32.xlu1 %v1167_v40, %s3393_s26  ;;  %v2563_v43 = vpop.f32.mrb[19].mxu0  ;;  %s2724_s26 = smul.u32 56, %s3429_s22 }
 0x3ee   : > { %s640_s3 = scalar_lea.vmem %s3416_s25, %s2724_s26  ;;  %s3418_s26 = smov 120  }
 0x3ef   : > { %s3419_s25 = smov 88  }
 0x438   : > { %v1170_v46 = vpop.permute.xlu0 %1169 }
 0x439   : > { %v1180_v49 = vsel %vm726_vm2, %v834_v48, %v1170_v46  ;;  %v2765_v46 = vld [vmem:[%s3380_s14 + $0x8] sm:$0xff]  }
 0x455   : > { %v1174_v47 = vpop.permute.xlu1 %1173 }
 0x456   : > { %v1182_v50 = vsel %vm1181_vm4, %v1180_v49, %v1174_v47  ;;  %v2766_v47 = vld [vmem:[%s3382_s16] sm:$0xff]  }
 0x45e   : > { %v1178_v51 = vpop.permute.xlu1 %1177 }
 0x45f   : > { %v1184_v52 = vsel %vm1183_vm5, %v1182_v50, %v1178_v51 }
 0x460   : > { %v1185_v53 = vpack.c.bf16 %v1184_v52, %v1184_v52  ;;  %v2395_v52 = vld [vmem:[%s3378_s12] ss:$0 sm:$0xff] }
 0x462   : > { %2569 = vmatmul.mubr.msk.bf16.vlgmr.msra.gmra.mrb[16].mxu1 %vm678_vm1, %v1185_v53 }
 0x463   : > { %2596 = vmatprep.mubr.msk.bf16.mxu1 %vm2815_vm0, %v2814_v1  ;;  %2581 = vmatpush3.bf16.msra.mxu1 %v2756_v6 }
 0x464   : > { %2582 = vmatprep.subr.bf16.mxu1 %v2814_v1 }
 0x467   : > { %2583 = vmatpush3.bf16.msra.mxu1 %v2757_v7 }
 0x468   : > { %2584 = vmatprep.subr.bf16.mxu1 %v2814_v1 }
 0x46b   : > { %2585 = vmatpush3.bf16.msra.mxu1 %v2758_v8 }
 0x46c   : > { %2586 = vmatprep.subr.bf16.mxu1 %v2814_v1 }
 0x46f   : > { %2587 = vmatpush3.bf16.msra.mxu1 %v2759_v9 }
 0x470   : > { %2588 = vmatprep.subr.bf16.mxu1 %v2814_v1 }
 0x473   : > { %2589 = vmatpush3.bf16.msra.mxu1 %v2760_v10 }
 0x474   : > { %2590 = vmatprep.subr.bf16.mxu1 %v2814_v1 }
 0x477   : > { %2591 = vmatpush3.bf16.msra.mxu1 %v2761_v11 }
 0x478   : > { %2592 = vmatprep.subr.bf16.mxu1 %v2814_v1 }
 0x47b   : > { %2593 = vmatpush3.bf16.msra.mxu1 %v2762_v22 }
 0x47c   : > { %2594 = vmatprep.subr.bf16.mxu1 %v2814_v1 }
 0x47f   : > { %2595 = vmatpush3.bf16.msra.mxu1 %v2763_v23 }
 0x480   : > { %2632 = vmatprep.subr.bf16.mxu1 %v2814_v1 }
 0x535   : > { %v1246_v55 = vpop.f32.mrb[16].mxu1 }
 0x536   : > { %v1247_v56 = vadd.f32 %v2376_v54, %v1246_v55  ;;  %v2570_v57 = vpop.f32.mrb[17].mxu1  ;;  %v2396_v54 = vld [vmem:[%s3379_s13] ss:$0 sm:$0xff] }
 0x537   : > { %v1249_v58 = vpop.f32.mrb[18].mxu1  ;;  %v648_v57 = vld [vmem:[%s640_s3 + $0x8] sm:$0xff] }
 0x538   : > { %v2571_v59 = vpop.f32.mrb[19].mxu1  ;;  %v1252_v60 = vadd.f32 %v1247_v56, %v2966_v3  ;;  %v2755_v3 = vld [vmem:[%s3374_s8 + $0x8] sm:$0xff]   ;;  %v647_v56 = vld [vmem:[%s640_s3] sm:$0xff] }
 0x539   : > { %2575 = vmatpush3.bf16.msra.mxu0 %v2755_v3  ;;  %v1560_v59 = vpack.c.bf16 %v648_v57, %v647_v56  ;;  %v653_v3 = vld [vmem:[%s640_s3 + $0x30] sm:$0x1] }
 0x53a   : > { %v1253_v61 = vsel %vm678_vm1, %v1252_v60, 0.0  ;;  %2600 = vmatprep.subr.bf16.mxu0 %v2814_v1  ;;  %v1563_v6 = vpack.c.bf16 %v653_v3, %v653_v3 }
 0x53b   : > { %1254 = vadd.xlane.f32.xlu0 %v1253_v61  ;;  %v2767_v61 = vld [vmem:[%s3382_s16 + $0x8] sm:$0xff]  }
 0x5c8   : > { %v1255_v62 = vpop.xlane.xlu0 %1254 }
 0x5c9   : > { %v1257_v63 = vmul.f32 0.03125, %v1255_v62  ;;  %v649_v62 = vld [vmem:[%s640_s3 + $0x10] sm:$0xff] }
 0x5cb   : > { %v1258_v0 = vsub.f32 %v1252_v60, %v1257_v63  ;;  %v650_v63 = vld [vmem:[%s640_s3 + $0x18] sm:$0xff] }
 0x5cd   : > { %v1259_v2 = vmul.f32 %v1258_v0, %v1258_v0 }
 0x5cf   : > { %v1260_v4 = vsel %vm678_vm1, %v1259_v2, 0.0  ;;  %v652_v2 = vld [vmem:[%s640_s3 + $0x28] sm:$0xff] }
 0x5d0   : > { %1261 = vadd.xlane.f32.xlu1 %v1260_v4  ;;  %v1561_v4 = vpack.c.bf16 %v650_v63, %v649_v62 }
 0x65d   : > { %v1262_v12 = vpop.xlane.xlu1 %1261 }
 0x65e   : > { %v1263_v13 = vmul.f32 0.03125, %v1262_v12  ;;  %v2401_v12 = vld [vmem:[%s3383_s17] ss:$0 sm:$0xff] }
 0x660   : > { %v1264_v14 = vadd.f32 1e-05, %v1263_v13 }
 0x662   : > { %2786 = vrsqrt.f32 %v1264_v14 }
 0x66c   : > { %v2787_v15 = vpop.eup %2786 }
 0x66d   : > { %v1266_v17 = vmul.f32 %v2787_v15, %v1258_v0  ;;  %v651_v0 = vld [vmem:[%s640_s3 + $0x20] sm:$0xff]  ;;  %s3417_s3 = smov 96  }
 0x66e   : > { %v1562_v5 = vpack.c.bf16 %v652_v2, %v651_v0 }
 0x66f   : > { %v1274_v19 = vmul.f32 %v2380_v16, %v1266_v17 }
 0x671   : > { %v1282_v20 = vadd.f32 %v2381_v18, %v1274_v19 }
 0x673   : > { %v1283_v21 = vpack.c.bf16 %v1282_v20, %v1282_v20 }
 0x675   : > { %2577 = vmatmul.mubr.msk.bf16.vlgmr.msra.gmra.mrb[20].mxu0 %vm678_vm1, %v1283_v21 }
 0x676   : > { %2604 = vmatprep.mubr.msk.bf16.mxu0 %vm2815_vm0, %v2814_v1  ;;  %2601 = vmatpush3.bf16.msra.mxu0 %v2764_v45 }
 0x677   : > { %2602 = vmatprep.subr.bf16.mxu0 %v2814_v1 }
 0x67a   : > { %2603 = vmatpush3.bf16.msra.mxu0 %v2765_v46 }
 0x67b   : > { %2608 = vmatprep.subr.bf16.mxu0 %v2766_v47 }
 0x748   : > { %v1344_v25 = vpop.f32.mrb[20].mxu0 }
 0x749   : > { %v1345_v26 = vadd.f32 %v2382_v24, %v1344_v25  ;;  %v2578_v27 = vpop.f32.mrb[21].mxu0 }
 0x74a   : > { %v1347_v28 = vpop.f32.mrb[22].mxu0 }
 0x74b   : > { %v1350_v29 = vmax.f32 %v1345_v26, 0.0  ;;  %v2579_v30 = vpop.f32.mrb[23].mxu0 }
 0x74d   : > { %v1351_v31 = vpack.c.bf16 %v1350_v29, %v1350_v29 }
 0x74f   : > { %2597 = vmatmul.mubr.bf16.vlgmr.msra.gmra.mrb[20].mxu1 %v1351_v31 }
 0x750   : > { %2640 = vmatprep.mubr.msk.bf16.mxu1 %vm2815_vm0, %v2814_v1 }
 0x822   : > { %v1457_v33 = vpop.f32.mrb[20].mxu1 }
 0x823   : > { %v1458_v34 = vadd.f32 %v2386_v32, %v1457_v33  ;;  %v2598_v35 = vpop.f32.mrb[21].mxu1 }
 0x824   : > { %v1460_v36 = vpop.f32.mrb[22].mxu1 }
 0x825   : > { %v2599_v37 = vpop.f32.mrb[23].mxu1  ;;  %v1463_v38 = vadd.f32 %v1458_v34, %v1282_v20  ;;  %v2397_v34 = vld [vmem:[%s3381_s15] ss:$0 sm:$0xff] }
 0x827   : > { %v1464_v39 = vsel %vm678_vm1, %v1463_v38, 0.0 }
 0x828   : > { %1465 = vadd.xlane.f32.xlu0 %v1464_v39 }
 0x8b5   : > { %v1466_v40 = vpop.xlane.xlu0 %1465 }
 0x8b6   : > { %v1467_v41 = vmul.f32 0.03125, %v1466_v40  ;;  %v2830_v40 = vmov 0  }
 0x8b8   : > { %v1468_v42 = vsub.f32 %v1463_v38, %v1467_v41  ;;  %v3207_v41 = vsel %vm1753_vm6, 65535, %v2830_v40 }
 0x8ba   : > { %v1469_v43 = vmul.f32 %v1468_v42, %v1468_v42 }
 0x8bc   : > { %v1470_v44 = vsel %vm678_vm1, %v1469_v43, 0.0 }
 0x8bd   : > { %1471 = vadd.xlane.f32.xlu0 %v1470_v44 }
 0x94a   : > { %v1472_v48 = vpop.xlane.xlu0 %1471 }
 0x94b   : > { %v1473_v49 = vmul.f32 0.03125, %v1472_v48 }
 0x94d   : > { %v1474_v50 = vadd.f32 1e-05, %v1473_v49 }
 0x94f   : > { %2788 = vrsqrt.f32 %v1474_v50 }
 0x959   : > { %v2789_v51 = vpop.eup %2788 }
 0x95a   : > { %v1476_v53 = vmul.f32 %v2789_v51, %v1468_v42 }
 0x95c   : > { %v1484_v55 = vmul.f32 %v2395_v52, %v1476_v53 }
 0x95e   : > { %v3147_v58 = vadd.f32 %v2396_v54, %v1484_v55 }
 0x960   : > { %v1493_v60 = vpack.c.bf16 %v3147_v58, %v3147_v58 }
 0x962   : > { %2605 = vmatmul.mubr.msk.bf16.vlgmr.msra.gmra.mrb[24].mxu0 %vm678_vm1, %v1493_v60 }
 0x963   : > { %2609 = vmatpush3.bf16.msra.mxu0 %v2766_v47  ;;  %2612 = vmatprep.mubr.msk.bf16.mxu0 %vm678_vm1, %v1560_v59 }
 0x964   : > { %2610 = vmatprep.subr.bf16.mxu0 %v2767_v61 }
 0x967   : > { %2611 = vmatpush3.bf16.msra.mxu0 %v2767_v61 }
 0x968   : > { %2620 = vmatprep.subr.bf16.mxu0 %v2814_v1 }
 0x96a   : > { %2613 = vmatmul.mubr.msk.bf16.vlgmr.msra.gmra.mrb[28].mxu0 %vm678_vm1, %v1561_v4 }
 0x96b   : > { %2616 = vmatprep.mubr.msk.bf16.mxu0 %vm678_vm1, %v1562_v5 }
 0x972   : > { %2617 = vmatmul.mubr.msk.bf16.gmra.mrb[32].mxu0 %vm678_vm1, %v1563_v6 }
 0x973   : > { %2628 = vmatprep.mubr.msk.bf16.mxu0 %vm2815_vm0, %v2814_v1 }
 0xa35   : > { %v1554_v7 = vpop.f32.mrb[24].mxu0 }
 0xa36   : > { %v2606_v8 = vpop.f32.mrb[25].mxu0  ;;  %v1555_v36 = vadd.f32 %v2397_v34, %v1554_v7 }
 0xa37   : > { %v1557_v9 = vpop.f32.mrb[26].mxu0 }
 0xa38   : > { %v2607_v10 = vpop.f32.mrb[27].mxu0  ;;  %v3200_v37 = vpack.c.bf16 %v1555_v36, %v1555_v36 }
 0xa3d   : > { %v2614_v11 = vpop.f32.mrb[28].mxu0 }
 0xa3e   : > { %v1633_v13 = vpop.f32.mrb[29].mxu0  ;;  %v1642_v15 = vadd.f32 %v2614_v11, %v2401_v12 }
 0xa3f   : > { %v2615_v14 = vpop.f32.mrb[30].mxu0  ;;  %v1634_v18 = vadd.f32 %v2401_v12, %v1633_v13 }
 0xa40   : > { %v1645_v16 = vadd.f32 %v2615_v14, %v2401_v12  ;;  %v1636_v17 = vpop.f32.mrb[31].mxu0 }
 0xa41   : > { %v1637_v19 = vadd.f32 %v2401_v12, %v1636_v17 }
 0xa42   : > { %v3165_v20 = vpack.c.bf16 %v1645_v16, %v1642_v15 }
 0xa43   : > { %v3167_v21 = vpack.c.bf16 %v1637_v19, %v1634_v18 }
 0xa44   : > { %1741 = vrot.lane.b32.xlu1 %v3165_v20, %s3417_s3  ;;  %v1675_v32 = vsel %vm726_vm2, %v3165_v20, 0 }
 0xa45   : > { %v2618_v22 = vpop.f32.mrb[32].mxu0  ;;  %1739 = vrot.lane.b32.xlu0 %v3167_v21, %s3417_s3  ;;  %v1672_v23 = vsel %vm726_vm2, %v3167_v21, 0 }
 0xa46   : > { %v1658_v24 = vadd.f32 %v2618_v22, %v2401_v12  ;;  %2621 = vmatpush3.bf16.xpose.msra.mxu0 %v1672_v23  ;;  %v1649_v25 = vpop.f32.mrb[33].mxu0 }
 0xa47   : > { %v1650_v26 = vadd.f32 %v2401_v12, %v1649_v25  ;;  %2622 = vmatprep.subr.bf16.mxu0 %v2814_v1  ;;  %v2619_v27 = vpop.f32.mrb[34].mxu0 }
 0xa48   : > { %v3176_v28 = vpack.c.bf16 %v1658_v24, %v1658_v24  ;;  %v1652_v29 = vpop.f32.mrb[35].mxu0 }
 0xa49   : > { %v1653_v30 = vadd.f32 %v2401_v12, %v1652_v29 }
 0xa4a   : > { %1745 = vrot.lane.b32.xlu0 %v3176_v28, %s3417_s3  ;;  %v1681_v35 = vsel %vm726_vm2, %v3176_v28, 0 }
 0xa4b   : > { %v3180_v31 = vpack.c.bf16 %v1653_v30, %v1650_v26 }
 0xa4d   : > { %1743 = vrot.lane.b32.xlu1 %v3180_v31, %s3417_s3  ;;  %v1678_v33 = vsel %vm726_vm2, %v3180_v31, 0 }
 0xa4e   : > { %1806 = vrot.lane.b32.xlu0 %v3165_v20, %s3418_s26  ;;  %2623 = vmatpush3.bf16.xpose.msra.mxu0 %v1675_v32 }
 0xa4f   : > { %2624 = vmatprep.subr.bf16.mxu0 %v2814_v1 }
 0xa52   : > { %1810 = vrot.lane.b32.xlu0 %v3176_v28, %s3418_s26 }
 0xa56   : > { %2625 = vmatpush3.bf16.xpose.msra.mxu0 %v1678_v33 }
 0xa57   : > { %2626 = vmatprep.subr.bf16.mxu0 %v2814_v1 }
 0xa5e   : > { %2627 = vmatpush3.bf16.xpose.msra.mxu0 %v1681_v35 }
 0xa5f   : > { %2656 = vmatprep.subr.bf16.mxu0 %v2814_v1 }
 0xa65   : > { %2629 = vmatmul.mubr.msk.bf16.vlgmr.msra.gmra.mrb[36].mxu0 %vm726_vm2, %v3200_v37 }
 0xa66   : > { %2664 = vmatprep.mubr.msk.bf16.mxu0 %vm2815_vm0, %v2814_v1 }
 0xab6   : > { %v1742_v39 = vpop.permute.xlu1 %1741 }
 0xab7   : > { %v1740_v38 = vpop.permute.xlu0 %1739 }
 0xab8   : > { %2633 = vmatpush3.bf16.msra.mxu1 %v1740_v38 }
 0xab9   : > { %2634 = vmatprep.subr.bf16.mxu1 %v2814_v1 }
 0xabc   : > { %2635 = vmatpush3.bf16.msra.mxu1 %v1742_v39  ;;  %v1746_v42 = vpop.permute.xlu0 %1745 }
 0xabd   : > { %2636 = vmatprep.subr.bf16.mxu1 %v2814_v1  ;;  %v1757_v44 = vand.u32 %v3207_v41, %v1746_v42 }
 0xabf   : > { %v1744_v43 = vpop.permute.xlu1 %1743 }
 0xac0   : > { %2637 = vmatpush3.bf16.msra.mxu1 %v1744_v43  ;;  %v1807_v63 = vpop.permute.xlu0 %1806 }
 0xac1   : > { %2638 = vmatprep.subr.bf16.mxu1 %v2814_v1  ;;  %v1819_v2 = vsel %vm726_vm2, %v1807_v63, 0 }
 0xac4   : > { %2639 = vmatpush3.bf16.msra.mxu1 %v1757_v44  ;;  %v1811_v6 = vpop.permute.xlu0 %1810 }
 0xac5   : > { %2644 = vmatprep.subr.bf16.mxu1 %v2814_v1  ;;  %v1825_v7 = vsel %vm726_vm2, %v1811_v6, 0 }
 0xb38   : > { %v1717_v45 = vpop.f32.mrb[36].mxu0 }
 0xb39   : > { %v1723_v46 = vmul.f32 0.35355338, %v1717_v45  ;;  %v2630_v47 = vpop.f32.mrb[37].mxu0 }
 0xb3a   : > { %v1720_v48 = vpop.f32.mrb[38].mxu0 }
 0xb3b   : > { %v2631_v49 = vpop.f32.mrb[39].mxu0  ;;  %v1725_v50 = vsel %vm1724_vm7, %v1723_v46, -inf }
 0xb3c   : > { %1726 = vmax.xlane.f32.xlu1 %v1725_v50 }
 0xb4d   : > { %1804 = vrot.lane.b32.xlu1 %v3167_v21, %s3418_s26 }
 0xb51   : > { %1808 = vrot.lane.b32.xlu1 %v3180_v31, %s3418_s26 }
 0xb55   : > { %1802 = vrot.lane.b32.xlu1 %v3200_v37, %s3418_s26 }
 0xb59   : > { %1878 = vrot.lane.b32.xlu1 %v3167_v21, %s3419_s25 }
 0xb5d   : > { %1880 = vrot.lane.b32.xlu1 %v3165_v20, %s3419_s25 }
 0xb61   : > { %1882 = vrot.lane.b32.xlu1 %v3180_v31, %s3419_s25 }
 0xb65   : > { %1884 = vrot.lane.b32.xlu1 %v3176_v28, %s3419_s25  ;;  %s3426_s25 = smov 24  }
 0xb69   : > { %1939 = vrot.lane.b32.xlu1 %v3167_v21, %s3420_s28 }
 0xb6d   : > { %1941 = vrot.lane.b32.xlu1 %v3165_v20, %s3420_s28 }
 0xb71   : > { %1943 = vrot.lane.b32.xlu1 %v3180_v31, %s3420_s28 }
 0xb75   : > { %1945 = vrot.lane.b32.xlu1 %v3176_v28, %s3420_s28 }
 0xbc9   : > { %v1727_v51 = vpop.xlane.xlu1 %1726 }
 0xbca   : > { %v1728_v52 = vsub.f32 %v1723_v46, %v1727_v51 }
 0xbcc   : > { %v1729_v53 = vmul.f32 1.442695, %v1728_v52 }
 0xbcd   : > { %v1805_v54 = vpop.permute.xlu1 %1804 }
 0xbce   : > { %2790 = vpow2.f32 %v1729_v53  ;;  %v1816_v61 = vsel %vm726_vm2, %v1805_v54, 0 }
 0xbd1   : > { %v1809_v55 = vpop.permute.xlu1 %1808 }
 0xbd2   : > { %v1822_v3 = vsel %vm726_vm2, %v1809_v55, 0 }
 0xbd5   : > { %v1803_v56 = vpop.permute.xlu1 %1802 }
 0xbd8   : > { %v3236_v57 = vpop.eup %2790 }
 0xbd9   : > { %v1879_v59 = vpop.permute.xlu1 %1878  ;;  %v1734_v60 = vpack.c.bf16 %v3236_v57, %v3236_v57 }
 0xbda   : > { %2657 = vmatpush3.bf16.msra.mxu0 %v1879_v59 }
 0xbdb   : > { %2641 = vmatmul.mubr.msk.bf16.vlgmr.msra.gmra.mrb[24].mxu1 %vm1724_vm7, %v1734_v60  ;;  %2658 = vmatprep.subr.bf16.mxu0 %v2814_v1 }
 0xbdc   : > { %2645 = vmatpush3.bf16.xpose.msra.mxu1 %v1816_v61  ;;  %2652 = vmatprep.mubr.msk.bf16.mxu1 %vm2815_vm0, %v2814_v1 }
 0xbdd   : > { %v1881_v62 = vpop.permute.xlu1 %1880  ;;  %2646 = vmatprep.subr.bf16.mxu1 %v2814_v1 }
 0xbde   : > { %2659 = vmatpush3.bf16.msra.mxu0 %v1881_v62 }
 0xbdf   : > { %2660 = vmatprep.subr.bf16.mxu0 %v2814_v1 }
 0xbe1   : > { %v1883_v0 = vpop.permute.xlu1 %1882 }
 0xbe2   : > { %2661 = vmatpush3.bf16.msra.mxu0 %v1883_v0 }
 0xbe3   : > { %2662 = vmatprep.subr.bf16.mxu0 %v2814_v1 }
 0xbe4   : > { %2647 = vmatpush3.bf16.xpose.msra.mxu1 %v1819_v2 }
 0xbe5   : > { %v1885_v4 = vpop.permute.xlu1 %1884  ;;  %2648 = vmatprep.subr.bf16.mxu1 %v2814_v1 }
 0xbe6   : > { %v1893_v5 = vand.u32 %v1885_v4, %v3207_v41 }
 0xbe8   : > { %2663 = vmatpush3.bf16.msra.mxu0 %v1893_v5 }
 0xbe9   : > { %2668 = vmatprep.subr.bf16.mxu0 %v2814_v1  ;;  %v1940_v27 = vpop.permute.xlu1 %1939 }
 0xbea   : > { %v1951_v32 = vsel %vm726_vm2, %v1940_v27, 0 }
 0xbec   : > { %2649 = vmatpush3.bf16.xpose.msra.mxu1 %v1822_v3 }
 0xbed   : > { %2650 = vmatprep.subr.bf16.mxu1 %v2814_v1  ;;  %v1942_v35 = vpop.permute.xlu1 %1941 }
 0xbee   : > { %v1954_v36 = vsel %vm726_vm2, %v1942_v35, 0  ;;  %v2768_v35 = vld [vmem:[%s3384_s18] sm:$0xff]  }
 0xbf4   : > { %2651 = vmatpush3.bf16.xpose.msra.mxu1 %v1825_v7 }
 0xbf5   : > { %2680 = vmatprep.subr.bf16.mxu1 %v2814_v1 }
 0xbfb   : > { %2653 = vmatmul.mubr.msk.bf16.vlgmr.msra.gmra.mrb[28].mxu1 %vm726_vm2, %v1803_v56 }
 0xbfc   : > { %2688 = vmatprep.mubr.msk.bf16.mxu1 %vm2815_vm0, %v2814_v1 }
 0xcae   : > { %v3259_v8 = vpop.f32.mrb[24].mxu1 }
 0xcaf   : > { %v2642_v9 = vpop.f32.mrb[25].mxu1 }
 0xcb0   : > { %v1796_v10 = vpop.f32.mrb[26].mxu1 }
 0xcb1   : > { %v2643_v11 = vpop.f32.mrb[27].mxu1 }
 0xcce   : > { %v1861_v12 = vpop.f32.mrb[28].mxu1 }
 0xccf   : > { %v1867_v13 = vmul.f32 0.35355338, %v1861_v12  ;;  %v2654_v14 = vpop.f32.mrb[29].mxu1 }
 0xcd0   : > { %v1864_v15 = vpop.f32.mrb[30].mxu1 }
 0xcd1   : > { %v2655_v16 = vpop.f32.mrb[31].mxu1  ;;  %v1868_v17 = vsel %vm1724_vm7, %v1867_v13, -inf }
 0xcd2   : > { %1869 = vmax.xlane.f32.xlu0 %v1868_v17 }
 0xce8   : > { %1937 = vrot.lane.b32.xlu0 %v3200_v37, %s3420_s28 }
 0xcec   : > { %2013 = vrot.lane.b32.xlu0 %v3167_v21, %s3421_s29 }
 0xcf0   : > { %2015 = vrot.lane.b32.xlu0 %v3165_v20, %s3421_s29 }
 0xcf4   : > { %2017 = vrot.lane.b32.xlu0 %v3180_v31, %s3421_s29 }
 0xcf8   : > { %2019 = vrot.lane.b32.xlu0 %v3176_v28, %s3421_s29 }
 0xcfc   : > { %2076 = vrot.lane.b32.xlu0 %v3165_v20, %s3422_s0 }
 0xd00   : > { %2078 = vrot.lane.b32.xlu0 %v3180_v31, %s3422_s0 }
 0xd04   : > { %2080 = vrot.lane.b32.xlu0 %v3176_v28, %s3422_s0 }
 0xd08   : > { %2072 = vrot.lane.b32.xlu0 %v3200_v37, %s3422_s0  ;;  %v1944_v37 = vpop.permute.xlu1 %1943 }
 0xd09   : > { %v1957_v38 = vsel %vm726_vm2, %v1944_v37, 0 }
 0xd0c   : > { %v1946_v39 = vpop.permute.xlu1 %1945 }
 0xd0d   : > { %v1960_v40 = vsel %vm726_vm2, %v1946_v39, 0 }
 0xd5f   : > { %v1870_v18 = vpop.xlane.xlu0 %1869 }
 0xd60   : > { %v1871_v19 = vsub.f32 %v1867_v13, %v1870_v18 }
 0xd62   : > { %v1872_v22 = vmul.f32 1.442695, %v1871_v19 }
 0xd63   : > { %v1938_v23 = vpop.permute.xlu0 %1937 }
 0xd64   : > { %2792 = vpow2.f32 %v1872_v22 }
 0xd67   : > { %v2014_v24 = vpop.permute.xlu0 %2013 }
 0xd68   : > { %2681 = vmatpush3.bf16.msra.mxu1 %v2014_v24 }
 0xd69   : > { %2682 = vmatprep.subr.bf16.mxu1 %v2814_v1 }
 0xd6b   : > { %v2016_v25 = vpop.permute.xlu0 %2015 }
 0xd6c   : > { %2683 = vmatpush3.bf16.msra.mxu1 %v2016_v25 }
 0xd6d   : > { %2684 = vmatprep.subr.bf16.mxu1 %v2814_v1 }
 0xd6e   : > { %v2793_v26 = vpop.eup %2792 }
 0xd6f   : > { %v2018_v29 = vpop.permute.xlu0 %2017  ;;  %v1877_v30 = vpack.c.bf16 %v2793_v26, %v2793_v26  ;;  %v1874_v52 = vsel %vm1724_vm7, %v2793_v26, 0.0 }
 0xd70   : > { %2685 = vmatpush3.bf16.msra.mxu1 %v2018_v29 }
 0xd71   : > { %2665 = vmatmul.mubr.msk.bf16.vlgmr.msra.gmra.mrb[40].mxu0 %vm1724_vm7, %v1877_v30  ;;  %2686 = vmatprep.subr.bf16.mxu1 %v2814_v1  ;;  %v1731_v30 = vsel %vm1724_vm7, %v3236_v57, 0.0  ;;  %v2769_v57 = vld [vmem:[%s3384_s18 + $0x8] sm:$0xff]  }
 0xd72   : > { %2669 = vmatpush3.bf16.xpose.msra.mxu0 %v1951_v32  ;;  %2676 = vmatprep.mubr.msk.bf16.mxu0 %vm2815_vm0, %v2814_v1 }
 0xd73   : > { %v2020_v33 = vpop.permute.xlu0 %2019  ;;  %2670 = vmatprep.subr.bf16.mxu0 %v2814_v1 }
 0xd74   : > { %v2028_v34 = vand.u32 %v2020_v33, %v3207_v41 }
 0xd76   : > { %2687 = vmatpush3.bf16.msra.mxu1 %v2028_v34 }
 0xd77   : > { %2692 = vmatprep.subr.bf16.mxu1 %v2814_v1  ;;  %v2077_v63 = vpop.permute.xlu0 %2076 }
 0xd78   : > { %v2089_v0 = vsel %vm726_vm2, %v2077_v63, 0 }
 0xd7a   : > { %2671 = vmatpush3.bf16.xpose.msra.mxu0 %v1954_v36 }
 0xd7b   : > { %2672 = vmatprep.subr.bf16.mxu0 %v2814_v1  ;;  %v2079_v2 = vpop.permute.xlu0 %2078 }
 0xd7c   : > { %v2092_v4 = vsel %vm726_vm2, %v2079_v2, 0 }
 0xd7f   : > { %v2081_v5 = vpop.permute.xlu0 %2080 }
 0xd80   : > { %v2095_v3 = vsel %vm726_vm2, %v2081_v5, 0 }
 0xd82   : > { %2673 = vmatpush3.bf16.xpose.msra.mxu0 %v1957_v38 }
 0xd83   : > { %2674 = vmatprep.subr.bf16.mxu0 %v2814_v1 }
 0xd8a   : > { %2675 = vmatpush3.bf16.xpose.msra.mxu0 %v1960_v40 }
 0xd8b   : > { %2704 = vmatprep.subr.bf16.mxu0 %v2814_v1 }
 0xd91   : > { %2677 = vmatmul.mubr.msk.bf16.vlgmr.msra.gmra.mrb[44].mxu0 %vm726_vm2, %v1938_v23 }
 0xd92   : > { %2712 = vmatprep.mubr.msk.bf16.mxu0 %vm2815_vm0, %v2814_v1 }
 0xe44   : > { %v3299_v42 = vpop.f32.mrb[40].mxu0 }
 0xe45   : > { %v2666_v43 = vpop.f32.mrb[41].mxu0 }
 0xe46   : > { %v1932_v44 = vpop.f32.mrb[42].mxu0 }
 0xe47   : > { %v2667_v45 = vpop.f32.mrb[43].mxu0 }
 0xe64   : > { %v1996_v46 = vpop.f32.mrb[44].mxu0 }
 0xe65   : > { %v2002_v47 = vmul.f32 0.35355338, %v1996_v46  ;;  %v2678_v48 = vpop.f32.mrb[45].mxu0 }
 0xe66   : > { %v1999_v49 = vpop.f32.mrb[46].mxu0 }
 0xe67   : > { %v2679_v50 = vpop.f32.mrb[47].mxu0  ;;  %v2003_v51 = vsel %vm1724_vm7, %v2002_v47, -inf }
 0xe68   : > { %2004 = vmax.xlane.f32.xlu1 %v2003_v51 }
 0xe79   : > { %2074 = vrot.lane.b32.xlu1 %v3167_v21, %s3422_s0  ;;  %s3427_s0 = sshll.u32 %s3429_s22, 3 }
 0xe7d   : > { %2148 = vrot.lane.b32.xlu1 %v3167_v21, %s3423_s27 }
 0xe81   : > { %2150 = vrot.lane.b32.xlu1 %v3165_v20, %s3423_s27 }
 0xe85   : > { %2152 = vrot.lane.b32.xlu1 %v3180_v31, %s3423_s27 }
 0xe89   : > { %2154 = vrot.lane.b32.xlu1 %v3176_v28, %s3423_s27 }
 0xead   : > { %1875 = vadd.xlane.f32.xlu1 %v1874_v52 }
 0xef5   : > { %v2005_v53 = vpop.xlane.xlu1 %2004 }
 0xef6   : > { %v2006_v54 = vsub.f32 %v2002_v47, %v2005_v53  ;;  %v2416_v53 = vld [vmem:[%s3385_s19] ss:$0 sm:$0xff] }
 0xef8   : > { %v2007_v55 = vmul.f32 1.442695, %v2006_v54 }
 0xef9   : > { %v2075_v56 = vpop.permute.xlu1 %2074 }
 0xefa   : > { %2794 = vpow2.f32 %v2007_v55  ;;  %v2086_v28 = vsel %vm726_vm2, %v2075_v56, 0 }
 0xefd   : > { %v2149_v59 = vpop.permute.xlu1 %2148 }
 0xefe   : > { %2705 = vmatpush3.bf16.msra.mxu0 %v2149_v59 }
 0xeff   : > { %2706 = vmatprep.subr.bf16.mxu0 %v2814_v1 }
 0xf01   : > { %v2151_v21 = vpop.permute.xlu1 %2150 }
 0xf02   : > { %2707 = vmatpush3.bf16.msra.mxu0 %v2151_v21 }
 0xf03   : > { %2708 = vmatprep.subr.bf16.mxu0 %v2814_v1 }
 0xf04   : > { %v2795_v20 = vpop.eup %2794 }
 0xf05   : > { %v2153_v31 = vpop.permute.xlu1 %2152  ;;  %v2012_v60 = vpack.c.bf16 %v2795_v20, %v2795_v20  ;;  %v2009_v17 = vsel %vm1724_vm7, %v2795_v20, 0.0 }
 0xf06   : > { %2709 = vmatpush3.bf16.msra.mxu0 %v2153_v31 }
 0xf07   : > { %2689 = vmatmul.mubr.msk.bf16.vlgmr.msra.gmra.mrb[32].mxu1 %vm1724_vm7, %v2012_v60  ;;  %2710 = vmatprep.subr.bf16.mxu0 %v2814_v1 }
 0xf08   : > { %2693 = vmatpush3.bf16.xpose.msra.mxu1 %v2086_v28  ;;  %2700 = vmatprep.mubr.msk.bf16.mxu1 %vm2815_vm0, %v2814_v1 }
 0xf09   : > { %v2155_v61 = vpop.permute.xlu1 %2154  ;;  %2694 = vmatprep.subr.bf16.mxu1 %v2814_v1 }
 0xf0a   : > { %v2163_v62 = vand.u32 %v2155_v61, %v3207_v41  ;;  %v2073_v41 = vpop.permute.xlu0 %2072 }
 0xf0c   : > { %2711 = vmatpush3.bf16.msra.mxu0 %v2163_v62 }
 0xf0d   : > { %2716 = vmatprep.subr.bf16.mxu0 %v2814_v1 }
 0xf10   : > { %2695 = vmatpush3.bf16.xpose.msra.mxu1 %v2089_v0 }
 0xf11   : > { %2696 = vmatprep.subr.bf16.mxu1 %v2814_v1 }
 0xf18   : > { %2697 = vmatpush3.bf16.xpose.msra.mxu1 %v2092_v4 }
 0xf19   : > { %2698 = vmatprep.subr.bf16.mxu1 %v2814_v1 }
 0xf20   : > { %2699 = vmatpush3.bf16.xpose.msra.mxu1 %v2095_v3 }
 0xf27   : > { %2701 = vmatmul.mubr.msk.bf16.vlgmr.msra.gmra.mrb[36].mxu1 %vm726_vm2, %v2073_v41 }
 0xf3a   : > { %v1876_v32 = vpop.xlane.xlu1 %1875 }
 0xfda   : > { %v2064_v6 = vpop.f32.mrb[32].mxu1 }
 0xfdb   : > { %v2690_v7 = vpop.f32.mrb[33].mxu1 }
 0xfdc   : > { %v2067_v9 = vpop.f32.mrb[34].mxu1 }
 0xfdd   : > { %v2691_v10 = vpop.f32.mrb[35].mxu1 }
 0xffa   : > { %v2131_v11 = vpop.f32.mrb[36].mxu1 }
 0xffb   : > { %v2137_v12 = vmul.f32 0.35355338, %v2131_v11  ;;  %v2702_v13 = vpop.f32.mrb[37].mxu1 }
 0xffc   : > { %v2134_v14 = vpop.f32.mrb[38].mxu1 }
 0xffd   : > { %v2703_v15 = vpop.f32.mrb[39].mxu1  ;;  %v2138_v16 = vsel %vm1724_vm7, %v2137_v12, -inf }
 0xffe   : > { %2139 = vmax.xlane.f32.xlu0 %v2138_v16 }
0x1002   : > { %2010 = vadd.xlane.f32.xlu0 %v2009_v17 }
0x108b   : > { %v2140_v18 = vpop.xlane.xlu0 %2139 }
0x108c   : > { %v2141_v19 = vsub.f32 %v2137_v12, %v2140_v18 }
0x108e   : > { %v2142_v22 = vmul.f32 1.442695, %v2141_v19 }
0x108f   : > { %v2011_v23 = vpop.xlane.xlu0 %2010 }
0x1090   : > { %2796 = vpow2.f32 %v2142_v22 }
0x1091   : > { %2798 = vrcp.f32 %v2011_v23 }
0x1092   : > { %2800 = vrcp.f32 %v1876_v32 }
0x109a   : > { %v2797_v24 = vpop.eup %2796 }
0x109b   : > { %v2799_v25 = vpop.eup %2798  ;;  %v2144_v26 = vsel %vm1724_vm7, %v2797_v24, 0.0  ;;  %v2147_v27 = vpack.c.bf16 %v2797_v24, %v2797_v24 }
0x109c   : > { %2145 = vadd.xlane.f32.xlu0 %v2144_v26  ;;  %v2071_v29 = vmul.f32 %v2799_v25, %v2064_v6  ;;  %v2801_v33 = vpop.eup %2800 }
0x109d   : > { %2713 = vmatmul.mubr.msk.bf16.vlgmr.msra.gmra.mrb[48].mxu0 %vm1724_vm7, %v2147_v27  ;;  %v1936_v34 = vmul.f32 %v2801_v33, %v3299_v42 }
0x109e   : > { %2212 = vrot.lane.b32.xlu1 %v2071_v29, %s3424_s23  ;;  %2720 = vmatprep.mubr.msk.bf16.mxu0 %vm2815_vm0, %v2814_v1 }
0x109f   : > { %2717 = vmatpush3.bf16.msra.mxu0 %v2768_v35 }
0x10a0   : > { %1732 = vadd.xlane.f32.xlu0 %v1731_v30  ;;  %2718 = vmatprep.subr.bf16.mxu0 %v2814_v1 }
0x10a3   : > { %2719 = vmatpush3.bf16.msra.mxu0 %v2769_v57 }
0x10b6   : > { %2208 = vrot.lane.b32.xlu0 %v1936_v34, %s3425_s24  ;;  %s644_s24 = scalar_lea.vmem %s3386_s20, %s3427_s0 }
0x1110   : > { %v2213_v48 = vpop.permute.xlu1 %2212 }
0x1129   : > { %v2146_v36 = vpop.xlane.xlu0 %2145 }
0x112a   : > { %2802 = vrcp.f32 %v2146_v36 }
0x112d   : > { %v1733_v44 = vpop.xlane.xlu0 %1732 }
0x112e   : > { %2804 = vrcp.f32 %v1733_v44 }
0x1131   : > { %v2209_v46 = vpop.permute.xlu0 %2208 }
0x1134   : > { %v2803_v37 = vpop.eup %2802 }
0x1138   : > { %v2805_v45 = vpop.eup %2804 }
0x1139   : > { %v1800_v1 = vmul.f32 %v2805_v45, %v3259_v8 }
0x113b   : > { %v2219_v47 = vsel %vm726_vm2, %v1800_v1, %v2209_v46 }
0x113c   : > { %v2220_v49 = vsel %vm1181_vm4, %v2219_v47, %v2213_v48 }
0x1170   : > { %v2199_v38 = vpop.f32.mrb[48].mxu0 }
0x1171   : > { %v2206_v39 = vmul.f32 %v2803_v37, %v2199_v38  ;;  %v2714_v40 = vpop.f32.mrb[49].mxu0 }
0x1172   : > { %v2202_v42 = vpop.f32.mrb[50].mxu0 }
0x1173   : > { %2216 = vrot.lane.b32.xlu0 %v2206_v39, %s3426_s25  ;;  %v2715_v43 = vpop.f32.mrb[51].mxu0 }
0x11e5   : > { %v2217_v50 = vpop.permute.xlu0 %2216 }
0x11e6   : > { %v2221_v51 = vsel %vm1183_vm5, %v2220_v49, %v2217_v50 }
0x11e7   : > { %v2222_v52 = vpack.c.bf16 %v2221_v51, %v2221_v51 }
0x11e9   : > { %2721 = vmatmul.mubr.msk.bf16.vlgmr.msra.gmra.mrb[52].mxu0 %vm678_vm1, %v2222_v52 }
0x12bc   : > { %v2283_v54 = vpop.f32.mrb[52].mxu0 }
0x12bd   : > { %v2284_v55 = vadd.f32 %v2416_v53, %v2283_v54  ;;  %v2722_v56 = vpop.f32.mrb[53].mxu0 }
0x12be   : > { %v2286_v8 = vpop.f32.mrb[54].mxu0 }
0x12bf   : > { %v2289_v59 = vadd.f32 %v2284_v55, %v3147_v58  ;;  %v2723_v21 = vpop.f32.mrb[55].mxu0 }
0x12c1   : > { %2290 = vst.msk [vmem:[%s644_s24] sm:$0xff] %vm678_vm1, %v2289_v59 }
0x12c2 PF: > { %s30_s1 = sadd.s32 1, %s2812_s1  }
0x12c3   : > { %p27_p4 = scmp.ge.s32.totalorder %s30_s1, 4  }
0x12c5   :  { %29 = sbr.rel (!%p27_p4) target bundleno = 6 (0x6), region = 133 }

</bundles_post_ra>
